<compile_context>
chip_gen: v7x
topology: tpu7x:2x2x1
jax: 0.10.0
libtpu: 0.0.40
codegen_flags: <defaults>
</compile_context>

<pallas_src>
import functools
import math

import jax
import jax.numpy as jnp
from jax.experimental import pallas as pl
from jax.experimental.pallas import tpu as pltpu


_VMEM_LIMIT = 32 * 1024 * 1024


def _cparams():
    return pltpu.CompilerParams(
        dimension_semantics=("parallel",),
        vmem_limit_bytes=_VMEM_LIMIT)


# ---------------------------------------------------------------------------
# In-kernel helpers
# ---------------------------------------------------------------------------
def _build_patches(x, H, W):
    """(H+2, W+2, Cin) f32 -> (H*W, 9*Cin) bf16 patch matrix.

    Fold the 3 kw taps, then the 3 kh taps, into the channel (lane) dim so a
    single matmul with K = 9*Cin does the whole conv. Column order is
    (kh*3 + kw)*Cin + ci, matching the folded weight layout.
    """
    xc = jnp.concatenate([x[:, kw:kw + W, :] for kw in range(3)], axis=-1)
    patches = jnp.concatenate([xc[kh:kh + H, :, :] for kh in range(3)], axis=-1)
    return patches.reshape(H * W, -1).astype(jnp.bfloat16)


def _matmul_with_stats(patches, w_ref, y_ref, ssum_ref, ssq_ref):
    """y = patches @ W  (+ per-image channel sum / sum-of-squares in f32)."""
    acc = jnp.dot(patches, w_ref[...], preferred_element_type=jnp.float32)
    y_ref[...] = acc.astype(y_ref.dtype)
    ssum_ref[...] = jnp.sum(acc, axis=0, keepdims=True)
    ssq_ref[...] = jnp.sum(acc * acc, axis=0, keepdims=True)


def _elu(v):
    # ELU(alpha=1); exp goes to the EUP (separate bundle slot).
    return jnp.where(v > 0.0, v, jnp.exp(jnp.minimum(v, 0.0)) - 1.0)


# ---------------------------------------------------------------------------
# Pallas kernels
# ---------------------------------------------------------------------------
def _conv3x3_kernel(xpad_ref, w_ref, y_ref, ssum_ref, ssq_ref, *, H, W):
    """3x3 'same' conv (stride 1, no bias) on one zero-padded NHWC image.

    xpad_ref: (H+2, W+2, Cin) bf16  -- one image per grid step (batch squeezed)
    w_ref:    (9*Cin, Cout)   bf16  -- tap-folded weights, VMEM-resident
    y_ref:    (H*W, Cout)     bf16
    ssum/ssq: (1, Cout)       f32   -- partial BatchNorm batch statistics
    """
    x = xpad_ref[...].astype(jnp.float32)
    _matmul_with_stats(_build_patches(x, H, W), w_ref, y_ref, ssum_ref, ssq_ref)


def _bn_elu_conv3x3_kernel(hpad_ref, scale_ref, shift_ref, w_ref,
                           y_ref, ssum_ref, ssq_ref, *, H, W):
    """Fused BN1 + ELU + 3x3 conv2 on one zero-padded image.

    hpad_ref: (H+2, W+2, C) bf16 -- conv1 output, zero-padded by 1 pixel.
    BN/ELU are applied to the whole block, then the 1-pixel border is masked
    back to zero (Conv2d padding=1 pads the *activated* tensor with zeros).
    """
    h = hpad_ref[...].astype(jnp.float32)                       # (H+2, W+2, C)
    scale = scale_ref[...].reshape(1, 1, -1)
    shift = shift_ref[...].reshape(1, 1, -1)
    a = _elu(h * scale + shift)

    Hp, Wp, C = h.shape
    row = jax.lax.broadcasted_iota(jnp.int32, (Hp, Wp, C), 0)
    col = jax.lax.broadcasted_iota(jnp.int32, (Hp, Wp, C), 1)
    interior = (row >= 1) & (row <= H) & (col >= 1) & (col <= W)
    x = jnp.where(interior, a, 0.0)

    _matmul_with_stats(_build_patches(x, H, W), w_ref, y_ref, ssum_ref, ssq_ref)


def _conv1x1_kernel(x_ref, w_ref, y_ref, ssum_ref, ssq_ref):
    """1x1 conv (plain matmul) + partial BN stats; one image per grid step."""
    acc = jnp.dot(x_ref[...], w_ref[...], preferred_element_type=jnp.float32)
    y_ref[...] = acc.astype(y_ref.dtype)
    ssum_ref[...] = jnp.sum(acc, axis=0, keepdims=True)
    ssq_ref[...] = jnp.sum(acc * acc, axis=0, keepdims=True)


def _bn_add_kernel(a_ref, sa_ref, ha_ref, b_ref, sb_ref, hb_ref, o_ref):
    """out = (a*sa + ha) + (b*sb + hb): BN2(main) + BN3(skip)/identity + add."""
    ya = a_ref[...].astype(jnp.float32) * sa_ref[...] + ha_ref[...]
    yb = b_ref[...].astype(jnp.float32) * sb_ref[...] + hb_ref[...]
    o_ref[...] = (ya + yb).astype(o_ref.dtype)


# ---------------------------------------------------------------------------
# pallas_call wrappers (grid over batch, weights/scales resident)
# ---------------------------------------------------------------------------
def _conv_out_specs(N, M, Cout):
    specs = (
        pl.BlockSpec((None, M, Cout), lambda n: (n, 0, 0)),
        pl.BlockSpec((None, 1, Cout), lambda n: (n, 0, 0)),
        pl.BlockSpec((None, 1, Cout), lambda n: (n, 0, 0)),
    )
    shapes = (
        jax.ShapeDtypeStruct((N, M, Cout), jnp.bfloat16),
        jax.ShapeDtypeStruct((N, 1, Cout), jnp.float32),
        jax.ShapeDtypeStruct((N, 1, Cout), jnp.float32),
    )
    return specs, shapes


def run_conv3x3(xpad, w):
    N, Hp, Wp, Cin = xpad.shape
    H, W = Hp - 2, Wp - 2
    Cout = w.shape[-1]
    kern = functools.partial(_conv3x3_kernel, H=H, W=W)
    out_specs, out_shape = _conv_out_specs(N, H * W, Cout)
    # TODO(synk): for very large H*W, tile over H with a 1-row halo instead of
    # whole-image blocks to bound the per-step VMEM footprint.
    return pl.pallas_call(
        kern,
        grid=(N,),
        in_specs=[
            pl.BlockSpec((None, Hp, Wp, Cin), lambda n: (n, 0, 0, 0)),
            pl.BlockSpec((9 * Cin, Cout), lambda n: (0, 0)),      # resident
        ],
        out_specs=out_specs,
        out_shape=out_shape,
        compiler_params=_cparams(),
    )(xpad, w)


def run_bn_elu_conv3x3(hpad, scale, shift, w):
    N, Hp, Wp, C = hpad.shape
    H, W = Hp - 2, Wp - 2
    Cout = w.shape[-1]
    kern = functools.partial(_bn_elu_conv3x3_kernel, H=H, W=W)
    out_specs, out_shape = _conv_out_specs(N, H * W, Cout)
    return pl.pallas_call(
        kern,
        grid=(N,),
        in_specs=[
            pl.BlockSpec((None, Hp, Wp, C), lambda n: (n, 0, 0, 0)),
            pl.BlockSpec((1, C), lambda n: (0, 0)),               # resident
            pl.BlockSpec((1, C), lambda n: (0, 0)),               # resident
            pl.BlockSpec((9 * C, Cout), lambda n: (0, 0)),        # resident
        ],
        out_specs=out_specs,
        out_shape=out_shape,
        compiler_params=_cparams(),
    )(hpad, scale, shift, w)


def run_conv1x1(x, w):
    N, M, Cin = x.shape
    Cout = w.shape[-1]
    out_specs, out_shape = _conv_out_specs(N, M, Cout)
    return pl.pallas_call(
        _conv1x1_kernel,
        grid=(N,),
        in_specs=[
            pl.BlockSpec((None, M, Cin), lambda n: (n, 0, 0)),
            pl.BlockSpec((Cin, Cout), lambda n: (0, 0)),          # resident
        ],
        out_specs=out_specs,
        out_shape=out_shape,
        compiler_params=_cparams(),
    )(x, w)


def run_bn_add(a, sa, ha, b, sb, hb):
    N, M, C = a.shape
    return pl.pallas_call(
        _bn_add_kernel,
        grid=(N,),
        in_specs=[
            pl.BlockSpec((None, M, C), lambda n: (n, 0, 0)),
            pl.BlockSpec((1, C), lambda n: (0, 0)),
            pl.BlockSpec((1, C), lambda n: (0, 0)),
            pl.BlockSpec((None, M, C), lambda n: (n, 0, 0)),
            pl.BlockSpec((1, C), lambda n: (0, 0)),
            pl.BlockSpec((1, C), lambda n: (0, 0)),
        ],
        out_specs=pl.BlockSpec((None, M, C), lambda n: (n, 0, 0)),
        out_shape=jax.ShapeDtypeStruct((N, M, C), jnp.float32),
        compiler_params=_cparams(),
    )(a, sa, ha, b, sb, hb)


# ---------------------------------------------------------------------------
# BatchNorm (training-mode batch stats) finalization — tiny, done in XLA
# ---------------------------------------------------------------------------
def _bn_scale_shift(mean, var, gamma, beta, eps=1e-5):
    inv = jax.lax.rsqrt(var + eps)
    scale = gamma * inv
    shift = beta - mean * scale
    return (scale.reshape(1, -1).astype(jnp.float32),
            shift.reshape(1, -1).astype(jnp.float32))


def _bn_from_sums(ssum, ssq, count, gamma, beta):
    s = jnp.sum(ssum, axis=(0, 1))
    ss = jnp.sum(ssq, axis=(0, 1))
    mean = s / count
    var = jnp.maximum(ss / count - mean * mean, 0.0)      # biased variance
    return _bn_scale_shift(mean, var, gamma, beta)


def _bn_from_values(h, gamma, beta):
    hf = h.astype(jnp.float32)
    mean = jnp.mean(hf, axis=(0, 1))
    var = jnp.maximum(jnp.mean(hf * hf, axis=(0, 1)) - mean * mean, 0.0)
    return _bn_scale_shift(mean, var, gamma, beta)


# ---------------------------------------------------------------------------
# Forward pass
# ---------------------------------------------------------------------------
def residual_block_forward(p, x_nchw, *, same_shape=True):
    """ResidualBlock forward; BatchNorm uses training-mode batch statistics."""
    x = jnp.transpose(x_nchw, (0, 2, 3, 1)).astype(jnp.float32)   # NHWC
    N, H, W, Cin = x.shape
    stride = 1 if same_shape else 2

    # ---- conv1: 3x3, pad 1, stride s, bias=False ----------------------------
    xpad = jnp.pad(x, ((0, 0), (1, 1), (1, 1), (0, 0))).astype(jnp.bfloat16)
    h1, s1, q1 = run_conv3x3(xpad, p["w1"])                # (N, H*W, Cout) bf16
    Cout = h1.shape[-1]
    if stride == 1:
        Ho, Wo = H, W
        sc1, sh1 = _bn_from_sums(s1, q1, N * H * W, p["g1"], p["b1"])
    else:
        # TODO(synk): the stride-2 conv is computed at stride 1 and subsampled
        # (exact result, ~4x extra FLOPs for this conv); a strided in-kernel
        # patch gather would remove the waste.
        Ho, Wo = (H + 1) // 2, (W + 1) // 2
        h1 = h1.reshape(N, H, W, Cout)[:, ::2, ::2, :].reshape(N, Ho * Wo, Cout)
        sc1, sh1 = _bn_from_values(h1, p["g1"], p["b1"])

    # ---- BN1 + ELU fused into conv2 (3x3, pad 1, stride 1, bias=False) ------
    h1pad = jnp.pad(h1.reshape(N, Ho, Wo, Cout), ((0, 0), (1, 1), (1, 1), (0, 0)))
    h2, s2, q2 = run_bn_elu_conv3x3(h1pad, sc1, sh1, p["w2"])   # (N, Ho*Wo, Cout)
    sc2, sh2 = _bn_from_sums(s2, q2, N * Ho * Wo, p["g2"], p["b2"])

    # ---- skip branch --------------------------------------------------------
    if same_shape:
        assert Cin == Cout, "identity skip requires in_channel == out_channel"
        skip = x.reshape(N, Ho * Wo, Cin)                  # identity skip, f32
        sc3 = jnp.ones((1, Cout), jnp.float32)
        sh3 = jnp.zeros((1, Cout), jnp.float32)
    else:
        x_ds = x[:, ::2, ::2, :].reshape(N, Ho * Wo, Cin).astype(jnp.bfloat16)
        skip, s3, q3 = run_conv1x1(x_ds, p["w3"])          # conv3 (1x1, stride 2)
        sc3, sh3 = _bn_from_sums(s3, q3, N * Ho * Wo, p["g3"], p["b3"])

    # ---- BN2(main) + BN3(skip)/identity + residual add ----------------------
    out = run_bn_add(h2, sc2, sh2, skip, sc3, sh3)         # (N, Ho*Wo, Cout) f32
    return jnp.transpose(out.reshape(N, Ho, Wo, Cout), (0, 3, 1, 2))   # NCHW


# ---------------------------------------------------------------------------
# Parameters (PyTorch layouts folded for the TPU kernels)
# ---------------------------------------------------------------------------
def _fold_conv3x3_weight(w):
    """PyTorch (Cout, Cin, 3, 3) -> (9*Cin, Cout), row index = (kh*3+kw)*Cin+ci."""
    cout, cin = w.shape[0], w.shape[1]
    return jnp.transpose(w, (2, 3, 1, 0)).reshape(9 * cin, cout).astype(jnp.bfloat16)


def init_params(key, in_channel, out_channel, *, same_shape=True):
    ks = jax.random.split(key, 3)

    def conv_w(k, cout, cin, ksize):
        bound = 1.0 / math.sqrt(cin * ksize * ksize)   # ~ kaiming_uniform(a=sqrt(5))
        return jax.random.uniform(k, (cout, cin, ksize, ksize), jnp.float32,
                                  -bound, bound)

    p = {
        "w1": _fold_conv3x3_weight(conv_w(ks[0], out_channel, in_channel, 3)),
        "g1": jnp.ones((out_channel,), jnp.float32),
        "b1": jnp.zeros((out_channel,), jnp.float32),
        "w2": _fold_conv3x3_weight(conv_w(ks[1], out_channel, out_channel, 3)),
        "g2": jnp.ones((out_channel,), jnp.float32),
        "b2": jnp.zeros((out_channel,), jnp.float32),
    }
    if not same_shape:
        w3 = conv_w(ks[2], out_channel, in_channel, 1)[:, :, 0, 0]   # (Cout, Cin)
        p["w3"] = jnp.transpose(w3, (1, 0)).astype(jnp.bfloat16)     # (Cin, Cout)
        p["g3"] = jnp.ones((out_channel,), jnp.float32)
        p["b3"] = jnp.zeros((out_channel,), jnp.float32)
    return p


if __name__ == "__main__":
    key = jax.random.PRNGKey(0)
    kx, kp1, kp2 = jax.random.split(key, 3)
    x = jax.random.normal(kx, (2, 4, 16, 16), jnp.float32)   # NCHW, like PyTorch

    # ResidualBlock(4, 4, same_shape=True): identity skip, stride 1
    p_same = init_params(kp1, 4, 4, same_shape=True)
    fwd_same = jax.jit(functools.partial(residual_block_forward, same_shape=True))
    out_same = jax.block_until_ready(fwd_same(p_same, x))
    assert out_same.shape == (2, 4, 16, 16), out_same.shape
    assert bool(jnp.all(jnp.isfinite(out_same)))

    # ResidualBlock(4, 8, same_shape=False): stride-2 main path + conv1x1/BN skip
    p_down = init_params(kp2, 4, 8, same_shape=False)
    fwd_down = jax.jit(functools.partial(residual_block_forward, same_shape=False))
    out_down = jax.block_until_ready(fwd_down(p_down, x))
    assert out_down.shape == (2, 8, 8, 8), out_down.shape
    assert bool(jnp.all(jnp.isfinite(out_down)))

    print("KERNEL_OK")
</pallas_src>

<mosaic_0001>
module attributes {stable_mosaic.version = 11 : i64} {
  func.func @_conv3x3_kernel(%arg0: i32, %arg1: memref<1x18x18x4xbf16, #tpu.memory_space<vmem>>, %arg2: memref<36x4xbf16, #tpu.memory_space<vmem>>, %arg3: memref<1x256x4xbf16, #tpu.memory_space<vmem>>, %arg4: memref<1x1x4xf32, #tpu.memory_space<vmem>>, %arg5: memref<1x1x4xf32, #tpu.memory_space<vmem>>) attributes {dimension_semantics = [#tpu.dimension_semantics<parallel>], iteration_bounds = array<i64: 2>, scalar_prefetch = 0 : i64, scratch_operands = 0 : i64, tpu.core_type = #tpu.core_type<tc>, window_params = [{transform_indices = @transform_0, window_bounds = array<i64: 1, 18, 18, 4>}, {pipeline_mode = #tpu.pipeline_mode<synchronous>, transform_indices = @transform_1, window_bounds = array<i64: 36, 4>}, {transform_indices = @transform_2, window_bounds = array<i64: 1, 256, 4>}, {transform_indices = @transform_3, window_bounds = array<i64: 1, 1, 4>}, {transform_indices = @transform_4, window_bounds = array<i64: 1, 1, 4>}]} {
    %c0 = arith.constant 0 : index
    %c0_0 = arith.constant 0 : index
    %c0_1 = arith.constant 0 : index
    %c0_2 = arith.constant 0 : index
    %0 = vector.load %arg1[%c0, %c0_0, %c0_1, %c0_2] : memref<1x18x18x4xbf16, #tpu.memory_space<vmem>>, vector<1x18x18x4xbf16>
    %1 = vector.shape_cast %0 : vector<1x18x18x4xbf16> to vector<18x18x4xbf16>
    %2 = arith.extf %1 : vector<18x18x4xbf16> to vector<18x18x4xf32>
    %3 = vector.extract_strided_slice %2 {offsets = [0, 0, 0], sizes = [18, 16, 4], strides = [1, 1, 1]} : vector<18x18x4xf32> to vector<18x16x4xf32>
    %4 = vector.extract_strided_slice %2 {offsets = [0, 1, 0], sizes = [18, 16, 4], strides = [1, 1, 1]} : vector<18x18x4xf32> to vector<18x16x4xf32>
    %5 = vector.extract_strided_slice %2 {offsets = [0, 2, 0], sizes = [18, 16, 4], strides = [1, 1, 1]} : vector<18x18x4xf32> to vector<18x16x4xf32>
    %6 = tpu.concatenate %3, %4, %5 in 2 : vector<18x16x4xf32>, vector<18x16x4xf32>, vector<18x16x4xf32> -> vector<18x16x12xf32>
    %7 = vector.extract_strided_slice %6 {offsets = [0, 0, 0], sizes = [16, 16, 12], strides = [1, 1, 1]} : vector<18x16x12xf32> to vector<16x16x12xf32>
    %8 = vector.extract_strided_slice %6 {offsets = [1, 0, 0], sizes = [16, 16, 12], strides = [1, 1, 1]} : vector<18x16x12xf32> to vector<16x16x12xf32>
    %9 = vector.extract_strided_slice %6 {offsets = [2, 0, 0], sizes = [16, 16, 12], strides = [1, 1, 1]} : vector<18x16x12xf32> to vector<16x16x12xf32>
    %10 = tpu.concatenate %7, %8, %9 in 2 : vector<16x16x12xf32>, vector<16x16x12xf32>, vector<16x16x12xf32> -> vector<16x16x36xf32>
    %11 = vector.shape_cast %10 : vector<16x16x36xf32> to vector<256x36xf32>
    %12 = arith.truncf %11 : vector<256x36xf32> to vector<256x36xbf16>
    %c0_3 = arith.constant 0 : index
    %c0_4 = arith.constant 0 : index
    %13 = vector.load %arg2[%c0_3, %c0_4] : memref<36x4xbf16, #tpu.memory_space<vmem>>, vector<36x4xbf16>
    %cst = arith.constant dense<0.000000e+00> : vector<256x4xf32>
    %14 = tpu.matmul %12, %13, %cst {dimension_numbers = #tpu.dot_dimension_numbers<[1], [0], [0], [1], [0, 0, 1, 1], [], []>} : vector<256x36xbf16>, vector<36x4xbf16>, vector<256x4xf32> -> vector<256x4xf32>
    %15 = arith.truncf %14 : vector<256x4xf32> to vector<256x4xbf16>
    %c0_5 = arith.constant 0 : index
    %c0_6 = arith.constant 0 : index
    %c0_7 = arith.constant 0 : index
    %16 = vector.load %arg3[%c0_5, %c0_6, %c0_7] : memref<1x256x4xbf16, #tpu.memory_space<vmem>>, vector<1x256x4xbf16>
    %17 = vector.shape_cast %16 : vector<1x256x4xbf16> to vector<256x4xbf16>
    %18 = vector.shape_cast %15 : vector<256x4xbf16> to vector<1x256x4xbf16>
    tpu.vector_store %arg3[%c0_5, %c0_6, %c0_7], %18 {strides = array<i32>} : memref<1x256x4xbf16, #tpu.memory_space<vmem>>, vector<1x256x4xbf16>,
    %cst_8 = arith.constant dense<0.000000e+00> : vector<4xf32>
    %19 = vector.multi_reduction <add>, %14, %cst_8 [0] : vector<256x4xf32> to vector<4xf32>
    %20 = vector.shape_cast %19 : vector<4xf32> to vector<1x4xf32>
    %c0_9 = arith.constant 0 : index
    %c0_10 = arith.constant 0 : index
    %c0_11 = arith.constant 0 : index
    %21 = vector.load %arg4[%c0_9, %c0_10, %c0_11] : memref<1x1x4xf32, #tpu.memory_space<vmem>>, vector<1x1x4xf32>
    %22 = vector.shape_cast %21 : vector<1x1x4xf32> to vector<1x4xf32>
    %23 = vector.shape_cast %20 : vector<1x4xf32> to vector<1x1x4xf32>
    tpu.vector_store %arg4[%c0_9, %c0_10, %c0_11], %23 {strides = array<i32>} : memref<1x1x4xf32, #tpu.memory_space<vmem>>, vector<1x1x4xf32>,
    %24 = arith.mulf %14, %14 : vector<256x4xf32>
    %cst_12 = arith.constant dense<0.000000e+00> : vector<4xf32>
    %25 = vector.multi_reduction <add>, %24, %cst_12 [0] : vector<256x4xf32> to vector<4xf32>
    %26 = vector.shape_cast %25 : vector<4xf32> to vector<1x4xf32>
    %c0_13 = arith.constant 0 : index
    %c0_14 = arith.constant 0 : index
    %c0_15 = arith.constant 0 : index
    %27 = vector.load %arg5[%c0_13, %c0_14, %c0_15] : memref<1x1x4xf32, #tpu.memory_space<vmem>>, vector<1x1x4xf32>
    %28 = vector.shape_cast %27 : vector<1x1x4xf32> to vector<1x4xf32>
    %29 = vector.shape_cast %26 : vector<1x4xf32> to vector<1x1x4xf32>
    tpu.vector_store %arg5[%c0_13, %c0_14, %c0_15], %29 {strides = array<i32>} : memref<1x1x4xf32, #tpu.memory_space<vmem>>, vector<1x1x4xf32>,
    return
  }
  func.func @transform_0(%arg0: i32) -> (i32, i32, i32, i32) {
    %c0_i32 = arith.constant 0 : i32
    %c0_i32_0 = arith.constant 0 : i32
    %c0_i32_1 = arith.constant 0 : i32
    %c0_i32_2 = arith.constant 0 : i32
    return %arg0, %c0_i32, %c0_i32_0, %c0_i32_1 : i32, i32, i32, i32
  }
  func.func @transform_1(%arg0: i32) -> (i32, i32) {
    %c0_i32 = arith.constant 0 : i32
    %c0_i32_0 = arith.constant 0 : i32
    %c0_i32_1 = arith.constant 0 : i32
    return %c0_i32, %c0_i32_0 : i32, i32
  }
  func.func @transform_2(%arg0: i32) -> (i32, i32, i32) {
    %c0_i32 = arith.constant 0 : i32
    %c0_i32_0 = arith.constant 0 : i32
    %c0_i32_1 = arith.constant 0 : i32
    return %arg0, %c0_i32, %c0_i32_0 : i32, i32, i32
  }
  func.func @transform_3(%arg0: i32) -> (i32, i32, i32) {
    %c0_i32 = arith.constant 0 : i32
    %c0_i32_0 = arith.constant 0 : i32
    %c0_i32_1 = arith.constant 0 : i32
    return %arg0, %c0_i32, %c0_i32_0 : i32, i32, i32
  }
  func.func @transform_4(%arg0: i32) -> (i32, i32, i32) {
    %c0_i32 = arith.constant 0 : i32
    %c0_i32_0 = arith.constant 0 : i32
    %c0_i32_1 = arith.constant 0 : i32
    return %arg0, %c0_i32, %c0_i32_0 : i32, i32, i32
  }
}

module attributes {stable_mosaic.version = 11 : i64} {
  func.func @_bn_elu_conv3x3_kernel(%arg0: i32, %arg1: memref<1x18x18x4xbf16, #tpu.memory_space<vmem>>, %arg2: memref<1x4xf32, #tpu.memory_space<vmem>>, %arg3: memref<1x4xf32, #tpu.memory_space<vmem>>, %arg4: memref<36x4xbf16, #tpu.memory_space<vmem>>, %arg5: memref<1x256x4xbf16, #tpu.memory_space<vmem>>, %arg6: memref<1x1x4xf32, #tpu.memory_space<vmem>>, %arg7: memref<1x1x4xf32, #tpu.memory_space<vmem>>) attributes {dimension_semantics = [#tpu.dimension_semantics<parallel>], iteration_bounds = array<i64: 2>, scalar_prefetch = 0 : i64, scratch_operands = 0 : i64, tpu.core_type = #tpu.core_type<tc>, window_params = [{transform_indices = @transform_0, window_bounds = array<i64: 1, 18, 18, 4>}, {pipeline_mode = #tpu.pipeline_mode<synchronous>, transform_indices = @transform_1, window_bounds = array<i64: 1, 4>}, {pipeline_mode = #tpu.pipeline_mode<synchronous>, transform_indices = @transform_2, window_bounds = array<i64: 1, 4>}, {pipeline_mode = #tpu.pipeline_mode<synchronous>, transform_indices = @transform_3, window_bounds = array<i64: 36, 4>}, {transform_indices = @transform_4, window_bounds = array<i64: 1, 256, 4>}, {transform_indices = @transform_5, window_bounds = array<i64: 1, 1, 4>}, {transform_indices = @transform_6, window_bounds = array<i64: 1, 1, 4>}]} {
    %c0 = arith.constant 0 : index
    %c0_0 = arith.constant 0 : index
    %c0_1 = arith.constant 0 : index
    %c0_2 = arith.constant 0 : index
    %0 = vector.load %arg1[%c0, %c0_0, %c0_1, %c0_2] : memref<1x18x18x4xbf16, #tpu.memory_space<vmem>>, vector<1x18x18x4xbf16>
    %1 = vector.shape_cast %0 : vector<1x18x18x4xbf16> to vector<18x18x4xbf16>
    %2 = arith.extf %1 : vector<18x18x4xbf16> to vector<18x18x4xf32>
    %c0_3 = arith.constant 0 : index
    %c0_4 = arith.constant 0 : index
    %3 = vector.load %arg2[%c0_3, %c0_4] : memref<1x4xf32, #tpu.memory_space<vmem>>, vector<1x4xf32>
    %4 = vector.shape_cast %3 : vector<1x4xf32> to vector<1x1x4xf32>
    %c0_5 = arith.constant 0 : index
    %c0_6 = arith.constant 0 : index
    %5 = vector.load %arg3[%c0_5, %c0_6] : memref<1x4xf32, #tpu.memory_space<vmem>>, vector<1x4xf32>
    %6 = vector.shape_cast %5 : vector<1x4xf32> to vector<1x1x4xf32>
    %7 = vector.broadcast %4 : vector<1x1x4xf32> to vector<18x18x4xf32>
    %8 = arith.mulf %2, %7 : vector<18x18x4xf32>
    %9 = vector.broadcast %6 : vector<1x1x4xf32> to vector<18x18x4xf32>
    %10 = arith.addf %8, %9 : vector<18x18x4xf32>
    %cst = arith.constant 0.000000e+00 : f32
    %11 = vector.broadcast %cst : f32 to vector<18x18x4xf32>
    %12 = arith.cmpf ogt, %10, %11 : vector<18x18x4xf32>
    %cst_7 = arith.constant 0.000000e+00 : f32
    %13 = vector.broadcast %cst_7 : f32 to vector<18x18x4xf32>
    %14 = arith.minimumf %10, %13 : vector<18x18x4xf32>
    %15 = math.exp %14 : vector<18x18x4xf32>
    %cst_8 = arith.constant 1.000000e+00 : f32
    %16 = vector.broadcast %cst_8 : f32 to vector<18x18x4xf32>
    %17 = arith.subf %15, %16 : vector<18x18x4xf32>
    %18 = arith.select %12, %10, %17 : vector<18x18x4xi1>, vector<18x18x4xf32>
    %19 = tpu.iota {dimensions = array<i32: 0>} : vector<18x18x4xi32>
    %20 = tpu.iota {dimensions = array<i32: 1>} : vector<18x18x4xi32>
    %c1_i32 = arith.constant 1 : i32
    %21 = vector.broadcast %c1_i32 : i32 to vector<18x18x4xi32>
    %22 = arith.cmpi sge, %19, %21 : vector<18x18x4xi32>
    %c16_i32 = arith.constant 16 : i32
    %23 = vector.broadcast %c16_i32 : i32 to vector<18x18x4xi32>
    %24 = arith.cmpi sle, %19, %23 : vector<18x18x4xi32>
    %25 = arith.andi %22, %24 : vector<18x18x4xi1>
    %c1_i32_9 = arith.constant 1 : i32
    %26 = vector.broadcast %c1_i32_9 : i32 to vector<18x18x4xi32>
    %27 = arith.cmpi sge, %20, %26 : vector<18x18x4xi32>
    %28 = arith.andi %25, %27 : vector<18x18x4xi1>
    %c16_i32_10 = arith.constant 16 : i32
    %29 = vector.broadcast %c16_i32_10 : i32 to vector<18x18x4xi32>
    %30 = arith.cmpi sle, %20, %29 : vector<18x18x4xi32>
    %31 = arith.andi %28, %30 : vector<18x18x4xi1>
    %cst_11 = arith.constant 0.000000e+00 : f32
    %32 = vector.broadcast %cst_11 : f32 to vector<18x18x4xf32>
    %33 = arith.select %31, %18, %32 : vector<18x18x4xi1>, vector<18x18x4xf32>
    %34 = vector.extract_strided_slice %33 {offsets = [0, 0, 0], sizes = [18, 16, 4], strides = [1, 1, 1]} : vector<18x18x4xf32> to vector<18x16x4xf32>
    %35 = vector.extract_strided_slice %33 {offsets = [0, 1, 0], sizes = [18, 16, 4], strides = [1, 1, 1]} : vector<18x18x4xf32> to vector<18x16x4xf32>
    %36 = vector.extract_strided_slice %33 {offsets = [0, 2, 0], sizes = [18, 16, 4], strides = [1, 1, 1]} : vector<18x18x4xf32> to vector<18x16x4xf32>
    %37 = tpu.concatenate %34, %35, %36 in 2 : vector<18x16x4xf32>, vector<18x16x4xf32>, vector<18x16x4xf32> -> vector<18x16x12xf32>
    %38 = vector.extract_strided_slice %37 {offsets = [0, 0, 0], sizes = [16, 16, 12], strides = [1, 1, 1]} : vector<18x16x12xf32> to vector<16x16x12xf32>
    %39 = vector.extract_strided_slice %37 {offsets = [1, 0, 0], sizes = [16, 16, 12], strides = [1, 1, 1]} : vector<18x16x12xf32> to vector<16x16x12xf32>
    %40 = vector.extract_strided_slice %37 {offsets = [2, 0, 0], sizes = [16, 16, 12], strides = [1, 1, 1]} : vector<18x16x12xf32> to vector<16x16x12xf32>
    %41 = tpu.concatenate %38, %39, %40 in 2 : vector<16x16x12xf32>, vector<16x16x12xf32>, vector<16x16x12xf32> -> vector<16x16x36xf32>
    %42 = vector.shape_cast %41 : vector<16x16x36xf32> to vector<256x36xf32>
    %43 = arith.truncf %42 : vector<256x36xf32> to vector<256x36xbf16>
    %c0_12 = arith.constant 0 : index
    %c0_13 = arith.constant 0 : index
    %44 = vector.load %arg4[%c0_12, %c0_13] : memref<36x4xbf16, #tpu.memory_space<vmem>>, vector<36x4xbf16>
    %cst_14 = arith.constant dense<0.000000e+00> : vector<256x4xf32>
    %45 = tpu.matmul %43, %44, %cst_14 {dimension_numbers = #tpu.dot_dimension_numbers<[1], [0], [0], [1], [0, 0, 1, 1], [], []>} : vector<256x36xbf16>, vector<36x4xbf16>, vector<256x4xf32> -> vector<256x4xf32>
    %46 = arith.truncf %45 : vector<256x4xf32> to vector<256x4xbf16>
    %c0_15 = arith.constant 0 : index
    %c0_16 = arith.constant 0 : index
    %c0_17 = arith.constant 0 : index
    %47 = vector.load %arg5[%c0_15, %c0_16, %c0_17] : memref<1x256x4xbf16, #tpu.memory_space<vmem>>, vector<1x256x4xbf16>
    %48 = vector.shape_cast %47 : vector<1x256x4xbf16> to vector<256x4xbf16>
    %49 = vector.shape_cast %46 : vector<256x4xbf16> to vector<1x256x4xbf16>
    tpu.vector_store %arg5[%c0_15, %c0_16, %c0_17], %49 {strides = array<i32>} : memref<1x256x4xbf16, #tpu.memory_space<vmem>>, vector<1x256x4xbf16>,
    %cst_18 = arith.constant dense<0.000000e+00> : vector<4xf32>
    %50 = vector.multi_reduction <add>, %45, %cst_18 [0] : vector<256x4xf32> to vector<4xf32>
    %51 = vector.shape_cast %50 : vector<4xf32> to vector<1x4xf32>
    %c0_19 = arith.constant 0 : index
    %c0_20 = arith.constant 0 : index
    %c0_21 = arith.constant 0 : index
    %52 = vector.load %arg6[%c0_19, %c0_20, %c0_21] : memref<1x1x4xf32, #tpu.memory_space<vmem>>, vector<1x1x4xf32>
    %53 = vector.shape_cast %52 : vector<1x1x4xf32> to vector<1x4xf32>
    %54 = vector.shape_cast %51 : vector<1x4xf32> to vector<1x1x4xf32>
    tpu.vector_store %arg6[%c0_19, %c0_20, %c0_21], %54 {strides = array<i32>} : memref<1x1x4xf32, #tpu.memory_space<vmem>>, vector<1x1x4xf32>,
    %55 = arith.mulf %45, %45 : vector<256x4xf32>
    %cst_22 = arith.constant dense<0.000000e+00> : vector<4xf32>
    %56 = vector.multi_reduction <add>, %55, %cst_22 [0] : vector<256x4xf32> to vector<4xf32>
    %57 = vector.shape_cast %56 : vector<4xf32> to vector<1x4xf32>
    %c0_23 = arith.constant 0 : index
    %c0_24 = arith.constant 0 : index
    %c0_25 = arith.constant 0 : index
    %58 = vector.load %arg7[%c0_23, %c0_24, %c0_25] : memref<1x1x4xf32, #tpu.memory_space<vmem>>, vector<1x1x4xf32>
    %59 = vector.shape_cast %58 : vector<1x1x4xf32> to vector<1x4xf32>
    %60 = vector.shape_cast %57 : vector<1x4xf32> to vector<1x1x4xf32>
    tpu.vector_store %arg7[%c0_23, %c0_24, %c0_25], %60 {strides = array<i32>} : memref<1x1x4xf32, #tpu.memory_space<vmem>>, vector<1x1x4xf32>,
    return
  }
  func.func @transform_0(%arg0: i32) -> (i32, i32, i32, i32) {
    %c0_i32 = arith.constant 0 : i32
    %c0_i32_0 = arith.constant 0 : i32
    %c0_i32_1 = arith.constant 0 : i32
    %c0_i32_2 = arith.constant 0 : i32
    return %arg0, %c0_i32, %c0_i32_0, %c0_i32_1 : i32, i32, i32, i32
  }
  func.func @transform_1(%arg0: i32) -> (i32, i32) {
    %c0_i32 = arith.constant 0 : i32
    %c0_i32_0 = arith.constant 0 : i32
    %c0_i32_1 = arith.constant 0 : i32
    return %c0_i32, %c0_i32_0 : i32, i32
  }
  func.func @transform_2(%arg0: i32) -> (i32, i32) {
    %c0_i32 = arith.constant 0 : i32
    %c0_i32_0 = arith.constant 0 : i32
    %c0_i32_1 = arith.constant 0 : i32
    return %c0_i32, %c0_i32_0 : i32, i32
  }
  func.func @transform_3(%arg0: i32) -> (i32, i32) {
    %c0_i32 = arith.constant 0 : i32
    %c0_i32_0 = arith.constant 0 : i32
    %c0_i32_1 = arith.constant 0 : i32
    return %c0_i32, %c0_i32_0 : i32, i32
  }
  func.func @transform_4(%arg0: i32) -> (i32, i32, i32) {
    %c0_i32 = arith.constant 0 : i32
    %c0_i32_0 = arith.constant 0 : i32
    %c0_i32_1 = arith.constant 0 : i32
    return %arg0, %c0_i32, %c0_i32_0 : i32, i32, i32
  }
  func.func @transform_5(%arg0: i32) -> (i32, i32, i32) {
    %c0_i32 = arith.constant 0 : i32
    %c0_i32_0 = arith.constant 0 : i32
    %c0_i32_1 = arith.constant 0 : i32
    return %arg0, %c0_i32, %c0_i32_0 : i32, i32, i32
  }
  func.func @transform_6(%arg0: i32) -> (i32, i32, i32) {
    %c0_i32 = arith.constant 0 : i32
    %c0_i32_0 = arith.constant 0 : i32
    %c0_i32_1 = arith.constant 0 : i32
    return %arg0, %c0_i32, %c0_i32_0 : i32, i32, i32
  }
}

module attributes {stable_mosaic.version = 11 : i64} {
  func.func @_bn_add_kernel(%arg0: i32, %arg1: memref<1x256x4xbf16, #tpu.memory_space<vmem>>, %arg2: memref<1x4xf32, #tpu.memory_space<vmem>>, %arg3: memref<1x4xf32, #tpu.memory_space<vmem>>, %arg4: memref<1x256x4xf32, #tpu.memory_space<vmem>>, %arg5: memref<1x4xf32, #tpu.memory_space<vmem>>, %arg6: memref<1x4xf32, #tpu.memory_space<vmem>>, %arg7: memref<1x256x4xf32, #tpu.memory_space<vmem>>) attributes {dimension_semantics = [#tpu.dimension_semantics<parallel>], iteration_bounds = array<i64: 2>, scalar_prefetch = 0 : i64, scratch_operands = 0 : i64, tpu.core_type = #tpu.core_type<tc>, window_params = [{transform_indices = @transform_0, window_bounds = array<i64: 1, 256, 4>}, {pipeline_mode = #tpu.pipeline_mode<synchronous>, transform_indices = @transform_1, window_bounds = array<i64: 1, 4>}, {pipeline_mode = #tpu.pipeline_mode<synchronous>, transform_indices = @transform_2, window_bounds = array<i64: 1, 4>}, {transform_indices = @transform_3, window_bounds = array<i64: 1, 256, 4>}, {pipeline_mode = #tpu.pipeline_mode<synchronous>, transform_indices = @transform_4, window_bounds = array<i64: 1, 4>}, {pipeline_mode = #tpu.pipeline_mode<synchronous>, transform_indices = @transform_5, window_bounds = array<i64: 1, 4>}, {transform_indices = @transform_6, window_bounds = array<i64: 1, 256, 4>}]} {
    %c0 = arith.constant 0 : index
    %c0_0 = arith.constant 0 : index
    %c0_1 = arith.constant 0 : index
    %0 = vector.load %arg1[%c0, %c0_0, %c0_1] : memref<1x256x4xbf16, #tpu.memory_space<vmem>>, vector<1x256x4xbf16>
    %1 = vector.shape_cast %0 : vector<1x256x4xbf16> to vector<256x4xbf16>
    %2 = arith.extf %1 : vector<256x4xbf16> to vector<256x4xf32>
    %c0_2 = arith.constant 0 : index
    %c0_3 = arith.constant 0 : index
    %3 = vector.load %arg2[%c0_2, %c0_3] : memref<1x4xf32, #tpu.memory_space<vmem>>, vector<1x4xf32>
    %4 = vector.broadcast %3 : vector<1x4xf32> to vector<256x4xf32>
    %5 = arith.mulf %2, %4 : vector<256x4xf32>
    %c0_4 = arith.constant 0 : index
    %c0_5 = arith.constant 0 : index
    %6 = vector.load %arg3[%c0_4, %c0_5] : memref<1x4xf32, #tpu.memory_space<vmem>>, vector<1x4xf32>
    %7 = vector.broadcast %6 : vector<1x4xf32> to vector<256x4xf32>
    %8 = arith.addf %5, %7 : vector<256x4xf32>
    %c0_6 = arith.constant 0 : index
    %c0_7 = arith.constant 0 : index
    %c0_8 = arith.constant 0 : index
    %9 = vector.load %arg4[%c0_6, %c0_7, %c0_8] : memref<1x256x4xf32, #tpu.memory_space<vmem>>, vector<1x256x4xf32>
    %10 = vector.shape_cast %9 : vector<1x256x4xf32> to vector<256x4xf32>
    %c0_9 = arith.constant 0 : index
    %c0_10 = arith.constant 0 : index
    %11 = vector.load %arg5[%c0_9, %c0_10] : memref<1x4xf32, #tpu.memory_space<vmem>>, vector<1x4xf32>
    %12 = vector.broadcast %11 : vector<1x4xf32> to vector<256x4xf32>
    %13 = arith.mulf %10, %12 : vector<256x4xf32>
    %c0_11 = arith.constant 0 : index
    %c0_12 = arith.constant 0 : index
    %14 = vector.load %arg6[%c0_11, %c0_12] : memref<1x4xf32, #tpu.memory_space<vmem>>, vector<1x4xf32>
    %15 = vector.broadcast %14 : vector<1x4xf32> to vector<256x4xf32>
    %16 = arith.addf %13, %15 : vector<256x4xf32>
    %17 = arith.addf %8, %16 : vector<256x4xf32>
    %c0_13 = arith.constant 0 : index
    %c0_14 = arith.constant 0 : index
    %c0_15 = arith.constant 0 : index
    %18 = vector.load %arg7[%c0_13, %c0_14, %c0_15] : memref<1x256x4xf32, #tpu.memory_space<vmem>>, vector<1x256x4xf32>
    %19 = vector.shape_cast %18 : vector<1x256x4xf32> to vector<256x4xf32>
    %20 = vector.shape_cast %17 : vector<256x4xf32> to vector<1x256x4xf32>
    tpu.vector_store %arg7[%c0_13, %c0_14, %c0_15], %20 {strides = array<i32>} : memref<1x256x4xf32, #tpu.memory_space<vmem>>, vector<1x256x4xf32>,
    return
  }
  func.func @transform_0(%arg0: i32) -> (i32, i32, i32) {
    %c0_i32 = arith.constant 0 : i32
    %c0_i32_0 = arith.constant 0 : i32
    %c0_i32_1 = arith.constant 0 : i32
    return %arg0, %c0_i32, %c0_i32_0 : i32, i32, i32
  }
  func.func @transform_1(%arg0: i32) -> (i32, i32) {
    %c0_i32 = arith.constant 0 : i32
    %c0_i32_0 = arith.constant 0 : i32
    %c0_i32_1 = arith.constant 0 : i32
    return %c0_i32, %c0_i32_0 : i32, i32
  }
  func.func @transform_2(%arg0: i32) -> (i32, i32) {
    %c0_i32 = arith.constant 0 : i32
    %c0_i32_0 = arith.constant 0 : i32
    %c0_i32_1 = arith.constant 0 : i32
    return %c0_i32, %c0_i32_0 : i32, i32
  }
  func.func @transform_3(%arg0: i32) -> (i32, i32, i32) {
    %c0_i32 = arith.constant 0 : i32
    %c0_i32_0 = arith.constant 0 : i32
    %c0_i32_1 = arith.constant 0 : i32
    return %arg0, %c0_i32, %c0_i32_0 : i32, i32, i32
  }
  func.func @transform_4(%arg0: i32) -> (i32, i32) {
    %c0_i32 = arith.constant 0 : i32
    %c0_i32_0 = arith.constant 0 : i32
    %c0_i32_1 = arith.constant 0 : i32
    return %c0_i32, %c0_i32_0 : i32, i32
  }
  func.func @transform_5(%arg0: i32) -> (i32, i32) {
    %c0_i32 = arith.constant 0 : i32
    %c0_i32_0 = arith.constant 0 : i32
    %c0_i32_1 = arith.constant 0 : i32
    return %c0_i32, %c0_i32_0 : i32, i32
  }
  func.func @transform_6(%arg0: i32) -> (i32, i32, i32) {
    %c0_i32 = arith.constant 0 : i32
    %c0_i32_0 = arith.constant 0 : i32
    %c0_i32_1 = arith.constant 0 : i32
    return %arg0, %c0_i32, %c0_i32_0 : i32, i32, i32
  }
}

</mosaic_0001>

<bundles_post_ra>
// kernel: residual_block_forward.5
= control target key start
LH: loop header
LB: loop body
LE: loop exit
PB: predicated region body
PF: predicated region fallthrough
CT: control target
= control target key end

     0   :  { %s806_s21 = smov 0   ;;  %s1100_s0 = inlined_call_operand.vmem [shape: bf16[2,256,4], index: 0, kind: input, shape index: {}]   ;;  %s1101_s1 = inlined_call_operand.vmem [shape: f32[1,4], index: 1, kind: input, shape index: {}]   ;;  %s1102_s2 = inlined_call_operand.vmem [shape: f32[1,4], index: 2, kind: input, shape index: {}]   ;;  %s1103_s3 = inlined_call_operand.vmem [shape: f32[2,256,4], index: 3, kind: input, shape index: {}]   ;;  %s1104_s4 = inlined_call_operand.vmem [shape: f32[1,4], index: 4, kind: input, shape index: {}]   ;;  %s1105_s5 = inlined_call_operand.vmem [shape: f32[1,4], index: 5, kind: input, shape index: {}]   ;;  %s1106_s6 = inlined_call_operand.vmem [shape: f32[2,256,4], index: 6, kind: output, shape index: {}]  }
   0x1 LB: > { %s656_s22 = sadd.s32 4294967295, %s769_s21   ;;  %p660_p0 = scmp.ge.s32.totalorder %s769_s21, 1  ;;  %s769_s21 = sphi %s806_s21, %s16_s21  }
   0x2   : > { %p222_p1 = scmp.lt.s32.totalorder %s769_s21, 3 }
   0x4   : > { %p223_p2 = pnand %p660_p0, %p222_p1 }
   0x5   : > { %p257_p3 = scmp.lt.s32.totalorder (!%p223_p2), %s656_s22, 1  ;;  %v821_v0 = vld [vmem:[%s1104_s4] ss:$0 sm:$0xff] (!%p223_p2)  ;;  %vm556_vm0 = vcmask (!%p223_p2), 31744  }
   0x6   : > { %226 = sbr.rel (%p223_p2) target bundleno = 70 (0x46), region = 44  ;;  %v838_v1 = vld [vmem:[%s1101_s1] ss:$0 sm:$0xff] (!%p223_p2) }
   0x7   : > { %v843_v2 = vld [vmem:[%s1105_s5] ss:$0 sm:$0xff] (!%p223_p2) }
   0x8   : > { %v856_v13 = vld [vmem:[%s1102_s2] ss:$0 sm:$0xff] (!%p223_p2) }
   0xd   : > { %s1108_s22 = smov (!%p257_p3, %s656_s22), 1 }
   0xe   : > { %s673_s23 = sshll.u32 %s1108_s22, 7  ;;  %s674_s24 = sshll.u32 %s1108_s22, 8 }
   0xf   : > { %s826_s29 = scalar_lea.vmem %s1100_s0, %s673_s23  ;;  %s833_s8 = scalar_lea.vmem %s1103_s3, %s674_s24 }
  0x10   : > { %v677_v3 = vld [vmem:[%s826_s29] sm:$0xff]   ;;  %v415_v5 = vld [vmem:[%s833_s8 + $0x8] sm:$0xff]  ;;  %v416_v11 = vld [vmem:[%s833_s8 + $0x10] sm:$0xff]  ;;  %s879_s17 = scalar_lea.vmem %s1106_s6, %s674_s24 }
  0x11   : > { %v414_v4 = vld [vmem:[%s833_s8] sm:$0xff]  ;;  %v678_v6 = vunpack.c.l.bf16 %v677_v3  ;;  %v679_v8 = vunpack.c.h.bf16 %v677_v3  ;;  %v454_v9 = vmul.f32 %v821_v0, %v415_v5  ;;  %v740_v10 = vld [vmem:[%s826_s29 + $0x8] sm:$0xff]   ;;  %v417_v12 = vld [vmem:[%s833_s8 + $0x18] sm:$0xff]  ;;  %v455_v15 = vmul.f32 %v821_v0, %v416_v11 }
  0x12   : > { %v453_v7 = vmul.f32 %v821_v0, %v414_v4  ;;  %v682_v14 = vunpack.c.l.bf16 %v740_v10  ;;  %v683_v16 = vunpack.c.h.bf16 %v740_v10  ;;  %v456_v17 = vmul.f32 %v821_v0, %v417_v12  ;;  %v741_v18 = vld [vmem:[%s826_s29 + $0x10] sm:$0xff]   ;;  %v418_v19 = vld [vmem:[%s833_s8 + $0x20] sm:$0xff]  ;;  %v419_v24 = vld [vmem:[%s833_s8 + $0x28] sm:$0xff] }
  0x13   : > { %v343_v20 = vmul.f32 %v678_v6, %v838_v1  ;;  %v344_v22 = vmul.f32 %v679_v8, %v838_v1  ;;  %v493_v23 = vadd.f32 %v843_v2, %v454_v9  ;;  %v494_v26 = vadd.f32 %v843_v2, %v455_v15  ;;  %v742_v37 = vld [vmem:[%s826_s29 + $0x18] sm:$0xff]   ;;  %v420_v38 = vld [vmem:[%s833_s8 + $0x30] sm:$0xff]  ;;  %v743_v44 = vld [vmem:[%s826_s29 + $0x20] sm:$0xff]  }
  0x14   : > { %v492_v21 = vadd.f32 %v843_v2, %v453_v7  ;;  %v345_v25 = vmul.f32 %v682_v14, %v838_v1  ;;  %v346_v27 = vmul.f32 %v683_v16, %v838_v1  ;;  %v495_v28 = vadd.f32 %v843_v2, %v456_v17  ;;  %v421_v43 = vld [vmem:[%s833_s8 + $0x38] sm:$0xff]  ;;  %v422_v45 = vld [vmem:[%s833_s8 + $0x40] sm:$0xff]  ;;  %v423_v58 = vld [vmem:[%s833_s8 + $0x48] sm:$0xff] }
  0x15   : > { %v382_v29 = vadd.f32 %v856_v13, %v343_v20  ;;  %v383_v30 = vadd.f32 %v856_v13, %v344_v22  ;;  %v686_v31 = vunpack.c.l.bf16 %v741_v18  ;;  %v457_v32 = vmul.f32 %v821_v0, %v418_v19  ;;  %v744_v63 = vld [vmem:[%s826_s29 + $0x28] sm:$0xff]   ;;  %v424_v3 = vld [vmem:[%s833_s8 + $0x50] sm:$0xff]  ;;  %v425_v17 = vld [vmem:[%s833_s8 + $0x58] sm:$0xff] }
  0x16   : > { %v384_v33 = vadd.f32 %v856_v13, %v345_v25  ;;  %v385_v34 = vadd.f32 %v856_v13, %v346_v27  ;;  %v687_v35 = vunpack.c.h.bf16 %v741_v18  ;;  %v458_v36 = vmul.f32 %v821_v0, %v419_v24  ;;  %v745_v18 = vld [vmem:[%s826_s29 + $0x30] sm:$0xff]   ;;  %v426_v19 = vld [vmem:[%s833_s8 + $0x60] sm:$0xff]  ;;  %v427_v24 = vld [vmem:[%s833_s8 + $0x68] sm:$0xff] }
  0x17   : > { %v524_v39 = vadd.f32 %v492_v21, %v382_v29  ;;  %v525_v40 = vadd.f32 %v493_v23, %v383_v30  ;;  %v347_v41 = vmul.f32 %v686_v31, %v838_v1  ;;  %v496_v42 = vadd.f32 %v843_v2, %v457_v32 }
  0x18   : > { %v526_v46 = vadd.f32 %v494_v26, %v384_v33  ;;  %v527_v47 = vadd.f32 %v495_v28, %v385_v34  ;;  %v348_v48 = vmul.f32 %v687_v35, %v838_v1  ;;  %v497_v49 = vadd.f32 %v843_v2, %v458_v36  ;;  %v746_v33 = vld [vmem:[%s826_s29 + $0x38] sm:$0xff]  }
  0x19   : > { %557 = vst.msk [vmem:[%s879_s17] sm:$0xff] %vm556_vm0, %v524_v39  ;;  %558 = vst.msk [vmem:[%s879_s17 + $0x8] sm:$0xff] %vm556_vm0, %v525_v40  ;;  %v386_v50 = vadd.f32 %v856_v13, %v347_v41  ;;  %v690_v51 = vunpack.c.l.bf16 %v742_v37  ;;  %v459_v52 = vmul.f32 %v821_v0, %v420_v38  ;;  %v691_v53 = vunpack.c.h.bf16 %v742_v37  ;;  %v428_v38 = vld [vmem:[%s833_s8 + $0x70] sm:$0xff] }
  0x1a   : > { %559 = vst.msk [vmem:[%s879_s17 + $0x10] sm:$0xff] %vm556_vm0, %v526_v46  ;;  %560 = vst.msk [vmem:[%s879_s17 + $0x18] sm:$0xff] %vm556_vm0, %v527_v47  ;;  %v387_v54 = vadd.f32 %v856_v13, %v348_v48  ;;  %v460_v55 = vmul.f32 %v821_v0, %v421_v43  ;;  %v694_v56 = vunpack.c.l.bf16 %v743_v44  ;;  %v461_v57 = vmul.f32 %v821_v0, %v422_v45  ;;  %v429_v43 = vld [vmem:[%s833_s8 + $0x78] sm:$0xff] }
  0x1b   : > { %v528_v59 = vadd.f32 %v496_v42, %v386_v50  ;;  %v349_v60 = vmul.f32 %v690_v51, %v838_v1  ;;  %v498_v61 = vadd.f32 %v843_v2, %v459_v52  ;;  %v350_v62 = vmul.f32 %v691_v53, %v838_v1 }
  0x1c   : > { %v529_v4 = vadd.f32 %v497_v49, %v387_v54  ;;  %v499_v5 = vadd.f32 %v843_v2, %v460_v55  ;;  %v351_v6 = vmul.f32 %v694_v56, %v838_v1  ;;  %v500_v7 = vadd.f32 %v843_v2, %v461_v57  ;;  %v430_v49 = vld [vmem:[%s833_s8 + $0x80] sm:$0xff] }
  0x1d   : > { %561 = vst.msk [vmem:[%s879_s17 + $0x20] sm:$0xff] %vm556_vm0, %v528_v59  ;;  %v388_v8 = vadd.f32 %v856_v13, %v349_v60  ;;  %v389_v9 = vadd.f32 %v856_v13, %v350_v62  ;;  %v695_v10 = vunpack.c.h.bf16 %v743_v44  ;;  %v462_v11 = vmul.f32 %v821_v0, %v423_v58  ;;  %v747_v44 = vld [vmem:[%s826_s29 + $0x40] sm:$0xff]   ;;  %v431_v58 = vld [vmem:[%s833_s8 + $0x88] sm:$0xff] }
  0x1e   : > { %562 = vst.msk [vmem:[%s879_s17 + $0x28] sm:$0xff] %vm556_vm0, %v529_v4  ;;  %v390_v12 = vadd.f32 %v856_v13, %v351_v6  ;;  %v698_v14 = vunpack.c.l.bf16 %v744_v63  ;;  %v463_v15 = vmul.f32 %v821_v0, %v424_v3  ;;  %v699_v16 = vunpack.c.h.bf16 %v744_v63  ;;  %v748_v63 = vld [vmem:[%s826_s29 + $0x48] sm:$0xff]   ;;  %v432_v3 = vld [vmem:[%s833_s8 + $0x90] sm:$0xff] }
  0x1f   : > { %v530_v20 = vadd.f32 %v498_v61, %v388_v8  ;;  %v531_v21 = vadd.f32 %v499_v5, %v389_v9  ;;  %v352_v22 = vmul.f32 %v695_v10, %v838_v1  ;;  %v501_v23 = vadd.f32 %v843_v2, %v462_v11 }
  0x20   : > { %v532_v25 = vadd.f32 %v500_v7, %v390_v12  ;;  %v353_v26 = vmul.f32 %v698_v14, %v838_v1  ;;  %v502_v27 = vadd.f32 %v843_v2, %v463_v15  ;;  %v354_v28 = vmul.f32 %v699_v16, %v838_v1  ;;  %v433_v12 = vld [vmem:[%s833_s8 + $0x98] sm:$0xff] }
  0x21   : > { %563 = vst.msk [vmem:[%s879_s17 + $0x30] sm:$0xff] %vm556_vm0, %v530_v20  ;;  %564 = vst.msk [vmem:[%s879_s17 + $0x38] sm:$0xff] %vm556_vm0, %v531_v21  ;;  %v391_v29 = vadd.f32 %v856_v13, %v352_v22  ;;  %v464_v30 = vmul.f32 %v821_v0, %v425_v17  ;;  %v702_v31 = vunpack.c.l.bf16 %v745_v18  ;;  %v465_v32 = vmul.f32 %v821_v0, %v426_v19  ;;  %v434_v19 = vld [vmem:[%s833_s8 + $0xa0] sm:$0xff] }
  0x22   : > { %565 = vst.msk [vmem:[%s879_s17 + $0x40] sm:$0xff] %vm556_vm0, %v532_v25  ;;  %v392_v34 = vadd.f32 %v856_v13, %v353_v26  ;;  %v393_v35 = vadd.f32 %v856_v13, %v354_v28  ;;  %v703_v36 = vunpack.c.h.bf16 %v745_v18  ;;  %v466_v37 = vmul.f32 %v821_v0, %v427_v24  ;;  %v749_v18 = vld [vmem:[%s826_s29 + $0x50] sm:$0xff]   ;;  %v435_v24 = vld [vmem:[%s833_s8 + $0xa8] sm:$0xff] }
  0x23   : > { %v533_v39 = vadd.f32 %v501_v23, %v391_v29  ;;  %v503_v40 = vadd.f32 %v843_v2, %v464_v30  ;;  %v355_v41 = vmul.f32 %v702_v31, %v838_v1  ;;  %v504_v42 = vadd.f32 %v843_v2, %v465_v32 }
  0x24   : > { %v534_v45 = vadd.f32 %v502_v27, %v392_v34  ;;  %v356_v46 = vmul.f32 %v703_v36, %v838_v1  ;;  %v505_v47 = vadd.f32 %v843_v2, %v466_v37  ;;  %v706_v48 = vunpack.c.l.bf16 %v746_v33 }
  0x25   : > { %566 = vst.msk [vmem:[%s879_s17 + $0x48] sm:$0xff] %vm556_vm0, %v533_v39  ;;  %v535_v50 = vadd.f32 %v503_v40, %v393_v35  ;;  %v394_v51 = vadd.f32 %v856_v13, %v355_v41  ;;  %v467_v52 = vmul.f32 %v821_v0, %v428_v38  ;;  %v707_v53 = vunpack.c.h.bf16 %v746_v33  ;;  %v750_v33 = vld [vmem:[%s826_s29 + $0x58] sm:$0xff]   ;;  %v436_v38 = vld [vmem:[%s833_s8 + $0xb0] sm:$0xff] }
  0x26   : > { %567 = vst.msk [vmem:[%s879_s17 + $0x50] sm:$0xff] %vm556_vm0, %v534_v45  ;;  %v395_v54 = vadd.f32 %v856_v13, %v356_v46  ;;  %v357_v55 = vmul.f32 %v706_v48, %v838_v1  ;;  %v468_v56 = vmul.f32 %v821_v0, %v429_v43  ;;  %v710_v57 = vunpack.c.l.bf16 %v747_v44  ;;  %v437_v43 = vld [vmem:[%s833_s8 + $0xb8] sm:$0xff] }
  0x27   : > { %568 = vst.msk [vmem:[%s879_s17 + $0x58] sm:$0xff] %vm556_vm0, %v535_v50  ;;  %v536_v59 = vadd.f32 %v504_v42, %v394_v51  ;;  %v506_v60 = vadd.f32 %v843_v2, %v467_v52  ;;  %v358_v61 = vmul.f32 %v707_v53, %v838_v1  ;;  %v469_v62 = vmul.f32 %v821_v0, %v430_v49  ;;  %v438_v49 = vld [vmem:[%s833_s8 + $0xc0] sm:$0xff] }
  0x28   : > { %v537_v4 = vadd.f32 %v505_v47, %v395_v54  ;;  %v396_v5 = vadd.f32 %v856_v13, %v357_v55  ;;  %v507_v6 = vadd.f32 %v843_v2, %v468_v56  ;;  %v359_v7 = vmul.f32 %v710_v57, %v838_v1 }
  0x29   : > { %569 = vst.msk [vmem:[%s879_s17 + $0x60] sm:$0xff] %vm556_vm0, %v536_v59  ;;  %v397_v8 = vadd.f32 %v856_v13, %v358_v61  ;;  %v508_v9 = vadd.f32 %v843_v2, %v469_v62  ;;  %v711_v10 = vunpack.c.h.bf16 %v747_v44  ;;  %v470_v11 = vmul.f32 %v821_v0, %v431_v58  ;;  %v751_v44 = vld [vmem:[%s826_s29 + $0x60] sm:$0xff]   ;;  %v439_v58 = vld [vmem:[%s833_s8 + $0xc8] sm:$0xff] }
  0x2a   : > { %570 = vst.msk [vmem:[%s879_s17 + $0x68] sm:$0xff] %vm556_vm0, %v537_v4  ;;  %v538_v14 = vadd.f32 %v506_v60, %v396_v5  ;;  %v398_v15 = vadd.f32 %v856_v13, %v359_v7  ;;  %v714_v16 = vunpack.c.l.bf16 %v748_v63  ;;  %v471_v17 = vmul.f32 %v821_v0, %v432_v3  ;;  %v440_v3 = vld [vmem:[%s833_s8 + $0xd0] sm:$0xff] }
  0x2b   : > { %v539_v20 = vadd.f32 %v507_v6, %v397_v8  ;;  %v360_v21 = vmul.f32 %v711_v10, %v838_v1  ;;  %v509_v22 = vadd.f32 %v843_v2, %v470_v11  ;;  %v715_v23 = vunpack.c.h.bf16 %v748_v63  ;;  %v752_v63 = vld [vmem:[%s826_s29 + $0x68] sm:$0xff]  }
  0x2c   : > { %571 = vst.msk [vmem:[%s879_s17 + $0x70] sm:$0xff] %vm556_vm0, %v538_v14  ;;  %v540_v25 = vadd.f32 %v508_v9, %v398_v15  ;;  %v361_v26 = vmul.f32 %v714_v16, %v838_v1  ;;  %v510_v27 = vadd.f32 %v843_v2, %v471_v17  ;;  %v472_v28 = vmul.f32 %v821_v0, %v433_v12  ;;  %v441_v12 = vld [vmem:[%s833_s8 + $0xd8] sm:$0xff] }
  0x2d   : > { %572 = vst.msk [vmem:[%s879_s17 + $0x78] sm:$0xff] %vm556_vm0, %v539_v20  ;;  %v399_v29 = vadd.f32 %v856_v13, %v360_v21  ;;  %v362_v30 = vmul.f32 %v715_v23, %v838_v1  ;;  %v718_v31 = vunpack.c.l.bf16 %v749_v18  ;;  %v473_v32 = vmul.f32 %v821_v0, %v434_v19  ;;  %v442_v19 = vld [vmem:[%s833_s8 + $0xe0] sm:$0xff] }
  0x2e   : > { %573 = vst.msk [vmem:[%s879_s17 + $0x80] sm:$0xff] %vm556_vm0, %v540_v25  ;;  %v400_v34 = vadd.f32 %v856_v13, %v361_v26  ;;  %v511_v35 = vadd.f32 %v843_v2, %v472_v28  ;;  %v719_v36 = vunpack.c.h.bf16 %v749_v18  ;;  %v474_v37 = vmul.f32 %v821_v0, %v435_v24  ;;  %v753_v18 = vld [vmem:[%s826_s29 + $0x70] sm:$0xff]   ;;  %v443_v24 = vld [vmem:[%s833_s8 + $0xe8] sm:$0xff] }
  0x2f   : > { %v541_v39 = vadd.f32 %v509_v22, %v399_v29  ;;  %v401_v40 = vadd.f32 %v856_v13, %v362_v30  ;;  %v363_v41 = vmul.f32 %v718_v31, %v838_v1  ;;  %v512_v42 = vadd.f32 %v843_v2, %v473_v32 }
  0x30   : > { %v542_v45 = vadd.f32 %v510_v27, %v400_v34  ;;  %v364_v46 = vmul.f32 %v719_v36, %v838_v1  ;;  %v513_v47 = vadd.f32 %v843_v2, %v474_v37  ;;  %v722_v48 = vunpack.c.l.bf16 %v750_v33 }
  0x31   : > { %574 = vst.msk [vmem:[%s879_s17 + $0x88] sm:$0xff] %vm556_vm0, %v541_v39  ;;  %v543_v50 = vadd.f32 %v511_v35, %v401_v40  ;;  %v402_v51 = vadd.f32 %v856_v13, %v363_v41  ;;  %v475_v52 = vmul.f32 %v821_v0, %v436_v38  ;;  %v723_v53 = vunpack.c.h.bf16 %v750_v33  ;;  %v754_v33 = vld [vmem:[%s826_s29 + $0x78] sm:$0xff]   ;;  %v444_v38 = vld [vmem:[%s833_s8 + $0xf0] sm:$0xff] }
  0x32   : > { %575 = vst.msk [vmem:[%s879_s17 + $0x90] sm:$0xff] %vm556_vm0, %v542_v45  ;;  %v403_v54 = vadd.f32 %v856_v13, %v364_v46  ;;  %v365_v55 = vmul.f32 %v722_v48, %v838_v1  ;;  %v476_v56 = vmul.f32 %v821_v0, %v437_v43  ;;  %v726_v57 = vunpack.c.l.bf16 %v751_v44  ;;  %v445_v43 = vld [vmem:[%s833_s8 + $0xf8] sm:$0xff] }
  0x33   : > { %576 = vst.msk [vmem:[%s879_s17 + $0x98] sm:$0xff] %vm556_vm0, %v543_v50  ;;  %v544_v59 = vadd.f32 %v512_v42, %v402_v51  ;;  %v514_v60 = vadd.f32 %v843_v2, %v475_v52  ;;  %v366_v61 = vmul.f32 %v723_v53, %v838_v1  ;;  %v477_v62 = vmul.f32 %v821_v0, %v438_v49 }
  0x34   : > { %v545_v4 = vadd.f32 %v513_v47, %v403_v54  ;;  %v404_v5 = vadd.f32 %v856_v13, %v365_v55  ;;  %v515_v6 = vadd.f32 %v843_v2, %v476_v56  ;;  %v367_v7 = vmul.f32 %v726_v57, %v838_v1 }
  0x35   : > { %577 = vst.msk [vmem:[%s879_s17 + $0xa0] sm:$0xff] %vm556_vm0, %v544_v59  ;;  %v405_v8 = vadd.f32 %v856_v13, %v366_v61  ;;  %v516_v9 = vadd.f32 %v843_v2, %v477_v62  ;;  %v727_v10 = vunpack.c.h.bf16 %v751_v44  ;;  %v478_v11 = vmul.f32 %v821_v0, %v439_v58 }
  0x36   : > { %578 = vst.msk [vmem:[%s879_s17 + $0xa8] sm:$0xff] %vm556_vm0, %v545_v4  ;;  %v546_v14 = vadd.f32 %v514_v60, %v404_v5  ;;  %v406_v15 = vadd.f32 %v856_v13, %v367_v7  ;;  %v730_v16 = vunpack.c.l.bf16 %v752_v63  ;;  %v479_v17 = vmul.f32 %v821_v0, %v440_v3 }
  0x37   : > { %v547_v20 = vadd.f32 %v515_v6, %v405_v8  ;;  %v368_v21 = vmul.f32 %v727_v10, %v838_v1  ;;  %v517_v22 = vadd.f32 %v843_v2, %v478_v11  ;;  %v731_v23 = vunpack.c.h.bf16 %v752_v63 }
  0x38   : > { %579 = vst.msk [vmem:[%s879_s17 + $0xb0] sm:$0xff] %vm556_vm0, %v546_v14  ;;  %v548_v25 = vadd.f32 %v516_v9, %v406_v15  ;;  %v369_v26 = vmul.f32 %v730_v16, %v838_v1  ;;  %v518_v27 = vadd.f32 %v843_v2, %v479_v17  ;;  %v480_v28 = vmul.f32 %v821_v0, %v441_v12 }
  0x39   : > { %580 = vst.msk [vmem:[%s879_s17 + $0xb8] sm:$0xff] %vm556_vm0, %v547_v20  ;;  %v407_v29 = vadd.f32 %v856_v13, %v368_v21  ;;  %v370_v30 = vmul.f32 %v731_v23, %v838_v1  ;;  %v734_v31 = vunpack.c.l.bf16 %v753_v18  ;;  %v481_v32 = vmul.f32 %v821_v0, %v442_v19 }
  0x3a   : > { %581 = vst.msk [vmem:[%s879_s17 + $0xc0] sm:$0xff] %vm556_vm0, %v548_v25  ;;  %v408_v34 = vadd.f32 %v856_v13, %v369_v26  ;;  %v519_v35 = vadd.f32 %v843_v2, %v480_v28  ;;  %v735_v36 = vunpack.c.h.bf16 %v753_v18  ;;  %v482_v37 = vmul.f32 %v821_v0, %v443_v24 }
  0x3b   : > { %v549_v39 = vadd.f32 %v517_v22, %v407_v29  ;;  %v409_v40 = vadd.f32 %v856_v13, %v370_v30  ;;  %v371_v41 = vmul.f32 %v734_v31, %v838_v1  ;;  %v520_v42 = vadd.f32 %v843_v2, %v481_v32 }
  0x3c   : > { %v550_v44 = vadd.f32 %v518_v27, %v408_v34  ;;  %v372_v45 = vmul.f32 %v735_v36, %v838_v1  ;;  %v521_v46 = vadd.f32 %v843_v2, %v482_v37  ;;  %v738_v47 = vunpack.c.l.bf16 %v754_v33 }
  0x3d   : > { %582 = vst.msk [vmem:[%s879_s17 + $0xc8] sm:$0xff] %vm556_vm0, %v549_v39  ;;  %v551_v48 = vadd.f32 %v519_v35, %v409_v40  ;;  %v410_v49 = vadd.f32 %v856_v13, %v371_v41  ;;  %v483_v50 = vmul.f32 %v821_v0, %v444_v38  ;;  %v739_v51 = vunpack.c.h.bf16 %v754_v33 }
  0x3e   : > { %583 = vst.msk [vmem:[%s879_s17 + $0xd0] sm:$0xff] %vm556_vm0, %v550_v44  ;;  %v411_v52 = vadd.f32 %v856_v13, %v372_v45  ;;  %v373_v53 = vmul.f32 %v738_v47, %v838_v1  ;;  %v484_v54 = vmul.f32 %v821_v0, %v445_v43 }
  0x3f   : > { %584 = vst.msk [vmem:[%s879_s17 + $0xd8] sm:$0xff] %vm556_vm0, %v551_v48  ;;  %v552_v55 = vadd.f32 %v520_v42, %v410_v49  ;;  %v522_v56 = vadd.f32 %v843_v2, %v483_v50  ;;  %v374_v57 = vmul.f32 %v739_v51, %v838_v1 }
  0x40   : > { %v553_v58 = vadd.f32 %v521_v46, %v411_v52  ;;  %v412_v59 = vadd.f32 %v856_v13, %v373_v53  ;;  %v523_v60 = vadd.f32 %v843_v2, %v484_v54 }
  0x41   : > { %585 = vst.msk [vmem:[%s879_s17 + $0xe0] sm:$0xff] %vm556_vm0, %v552_v55  ;;  %v413_v61 = vadd.f32 %v856_v13, %v374_v57 }
  0x42   : > { %586 = vst.msk [vmem:[%s879_s17 + $0xe8] sm:$0xff] %vm556_vm0, %v553_v58  ;;  %v554_v62 = vadd.f32 %v522_v56, %v412_v59 }
  0x43   : > { %v555_v0 = vadd.f32 %v523_v60, %v413_v61 }
  0x44   : > { %587 = vst.msk [vmem:[%s879_s17 + $0xf0] sm:$0xff] %vm556_vm0, %v554_v62 }
  0x45   : > { %588 = vst.msk [vmem:[%s879_s17 + $0xf8] sm:$0xff] %vm556_vm0, %v555_v0 }
  0x46 PF: > { %s16_s21 = sadd.s32 1, %s769_s21  }
  0x47   : > { %p13_p4 = scmp.ge.s32.totalorder %s16_s21, 4  }
  0x49   :  { %15 = sbr.rel (!%p13_p4) target bundleno = 1 (0x1), region = 77 }

// kernel: residual_block_forward.3
= control target key start
LH: loop header
LB: loop body
LE: loop exit
PB: predicated region body
PF: predicated region fallthrough
CT: control target
= control target key end

     0   :  { %s2427_s15 = smov 0   ;;  %s3225_s0 = inlined_call_operand.vmem [shape: bf16[2,18,18,4], index: 0, kind: input, shape index: {}]   ;;  %s3226_s1 = inlined_call_operand.vmem [shape: bf16[36,4], index: 1, kind: input, shape index: {}]   ;;  %s3227_s2 = inlined_call_operand.vmem [shape: bf16[2,256,4], index: 2, kind: output, shape index: {0}]   ;;  %s3228_s3 = inlined_call_operand.vmem [shape: f32[2,1,4], index: 3, kind: output, shape index: {1}]   ;;  %s3229_s4 = inlined_call_operand.vmem [shape: f32[2,1,4], index: 4, kind: output, shape index: {2}]  }
   0x1 LB: > { %s1831_s16 = sadd.s32 4294967295, %s2396_s15   ;;  %p1835_p0 = scmp.ge.s32.totalorder %s2396_s15, 1  ;;  %s2396_s15 = sphi %s2427_s15, %s15_s15  }
   0x2   : > { %p167_p1 = scmp.lt.s32.totalorder %s2396_s15, 3 }
   0x4   : > { %p168_p2 = pnand %p1835_p0, %p167_p1 }
   0x5   : > { %p199_p3 = scmp.lt.s32.totalorder (!%p168_p2), %s1831_s16, 1  ;;  %vm577_vm0 = vcmask (!%p168_p2), 1045504   ;;  %vm378_vm1 = vcmask (!%p168_p2), 1046528   ;;  %s2398_s21 = smov (!%p168_p2), 8   ;;  %vm776_vm2 = vcmask (!%p168_p2), 31744   ;;  %vm813_vm3 = vcmask (!%p168_p2), 64512  }
   0x6   : > { %171 = sbr.rel (%p168_p2) target bundleno = 571 (0x23b), region = 28  ;;  %s2399_s22 = smov (!%p168_p2), 4   ;;  %vm1227_vm4 = vcmask (!%p168_p2), 1041408   ;;  %vm1076_vm5 = vcmask (!%p168_p2), 97280   ;;  %vm1109_vm6 = vcmask (!%p168_p2), 195584   ;;  %vm1178_vm7 = vcmask (!%p168_p2), 293888  }
   0x7   : > { %s2400_s29 = smov (!%p168_p2), 12   ;;  %s2401_s30 = smov (!%p168_p2), 24   ;;  %vm1520_vm8 = vcmask (!%p168_p2), 27648   ;;  %vm1622_vm9 = vcmask (!%p168_p2), 24576  }
   0xd   : > { %s3231_s16 = smov (!%p199_p3, %s1831_s16), 1 }
   0xe   : > { %s2034_s17 = smul.u32 216, %s3231_s16  ;;  %s1892_s5 = sshll.u32 %s3231_s16, 7 }
   0xf   : > { %s3084_s8 = scalar_lea.vmem %s3227_s2, %s1892_s5  ;;  %s211_s11 = scalar_lea.vmem %s3228_s3, %s3231_s16 }
  0x10   : > { %s2441_s20 = scalar_lea.vmem %s3225_s0, %s2034_s17  ;;  %s214_s14 = scalar_lea.vmem %s3229_s4, %s3231_s16 }
  0x11   : > { %v219_v0 = vld [vmem:[%s2441_s20 + $0xc] sm:$0xff]   ;;  %v221_v1 = vld [vmem:[%s2441_s20 + $0x14] sm:$0x1]  ;;  %v225_v2 = vld [vmem:[%s2441_s20 + $0x24] sm:$0xff]  }
  0x12   : > { %v2446_v3 = vunpack.c.l.bf16 %v219_v0  ;;  %v2448_v4 = vunpack.c.h.bf16 %v219_v0  ;;  %v275_v5 = vunpack.c.l.bf16 %v221_v1  ;;  %v227_v6 = vld [vmem:[%s2441_s20 + $0x2c] sm:$0x1]  ;;  %v2451_v7 = vunpack.c.l.bf16 %v225_v2  ;;  %v1961_v8 = vld [vmem:[%s2441_s20 + $0x18] sm:$0xff]   ;;  %v224_v13 = vld [vmem:[%s2441_s20 + $0x20] sm:$0x1] }
  0x13   : > { %v2454_v9 = vunpack.c.h.bf16 %v225_v2  ;;  %v281_v10 = vunpack.c.l.bf16 %v227_v6  ;;  %v2456_v11 = vunpack.c.l.bf16 %v1961_v8  ;;  %v2458_v12 = vunpack.c.h.bf16 %v1961_v8  ;;  %v231_v34 = vld [vmem:[%s2441_s20 + $0x3c] sm:$0xff]   ;;  %v233_v43 = vld [vmem:[%s2441_s20 + $0x44] sm:$0x1]  ;;  %v1962_v48 = vld [vmem:[%s2441_s20 + $0x30] sm:$0xff]  }
  0x14   : > { %v583_v14 = vrot.slane %v2446_v3, 2  ;;  %v584_v15 = vrot.slane %v2448_v4, 2  ;;  %v586_v16 = vrot.slane %v275_v5, 2  ;;  %v384_v17 = vrot.slane %v2446_v3, 1  ;;  %v230_v53 = vld [vmem:[%s2441_s20 + $0x38] sm:$0x1] }
  0x15   : > { %v385_v18 = vrot.slane %v2448_v4, 1  ;;  %v387_v19 = vrot.slane %v275_v5, 1  ;;  %v394_v20 = vrot.slane %v2451_v7, 1  ;;  %v395_v21 = vrot.slane %v2454_v9, 1 }
  0x16   : > { %v585_v22 = vsel %vm577_vm0, %v583_v14, %v584_v15  ;;  %v587_v23 = vsel %vm577_vm0, %v584_v15, %v586_v16  ;;  %v397_v24 = vrot.slane %v281_v10, 1  ;;  %v278_v25 = vunpack.c.l.bf16 %v224_v13 }
  0x17   : > { %v2057_v26 = vpack.i.bf16 %v587_v23, %v585_v22  ;;  %v386_v27 = vsel %vm378_vm1, %v384_v17, %v385_v18  ;;  %v388_v28 = vsel %vm378_vm1, %v385_v18, %v387_v19  ;;  %v396_v29 = vsel %vm378_vm1, %v394_v20, %v395_v21  ;;  %v239_v17 = vld [vmem:[%s2441_s20 + $0x5c] sm:$0x1]  ;;  %v1963_v22 = vld [vmem:[%s2441_s20 + $0x48] sm:$0xff]  }
  0x18   : > { %v2047_v30 = vpack.i.bf16 %v388_v28, %v386_v27  ;;  %v398_v31 = vsel %vm378_vm1, %v395_v21, %v397_v24  ;;  %v389_v32 = vrot.slane %v2456_v11, 1  ;;  %v390_v33 = vrot.slane %v2458_v12, 1  ;;  %v236_v27 = vld [vmem:[%s2441_s20 + $0x50] sm:$0x1] }
  0x19   : > { %2058 = vrot.lane.b32.xlu1 %v2057_v26, %s2398_s21  ;;  %v2062_v35 = vpack.i.bf16 %v398_v31, %v396_v29  ;;  %v392_v36 = vrot.slane %v278_v25, 1  ;;  %v593_v37 = vrot.slane %v2451_v7, 2  ;;  %v594_v38 = vrot.slane %v2454_v9, 2 }
  0x1a   : > { %2048 = vrot.lane.b32.xlu0 %v2047_v30, %s2399_s22  ;;  %v391_v39 = vsel %vm378_vm1, %v389_v32, %v390_v33  ;;  %v596_v40 = vrot.slane %v281_v10, 2  ;;  %v588_v41 = vrot.slane %v2456_v11, 2  ;;  %v589_v42 = vrot.slane %v2458_v12, 2  ;;  %v237_v10 = vld [vmem:[%s2441_s20 + $0x54] sm:$0xff]  }
  0x1b   : > { %v393_v44 = vsel %vm378_vm1, %v390_v33, %v392_v36  ;;  %v595_v45 = vsel %vm577_vm0, %v593_v37, %v594_v38  ;;  %v591_v46 = vrot.slane %v278_v25, 2  ;;  %v2486_v47 = vunpack.c.l.bf16 %v231_v34 }
  0x1c   : > { %v2052_v49 = vpack.i.bf16 %v393_v44, %v391_v39  ;;  %v597_v50 = vsel %vm577_vm0, %v594_v38, %v596_v40  ;;  %v590_v51 = vsel %vm577_vm0, %v588_v41, %v589_v42  ;;  %v2491_v52 = vunpack.c.h.bf16 %v231_v34 }
  0x1d   : > { %2063 = vrot.lane.b32.xlu1 %v2062_v35, %s2399_s22  ;;  %v2072_v54 = vpack.i.bf16 %v597_v50, %v595_v45  ;;  %v592_v55 = vsel %vm577_vm0, %v589_v42, %v591_v46  ;;  %v287_v56 = vunpack.c.l.bf16 %v233_v43  ;;  %v404_v57 = vrot.slane %v2486_v47, 1 }
  0x1e   : > { %2053 = vrot.lane.b32.xlu0 %v2052_v49, %s2399_s22  ;;  %v2067_v58 = vpack.i.bf16 %v592_v55, %v590_v51  ;;  %v405_v59 = vrot.slane %v2491_v52, 1  ;;  %v2499_v60 = vunpack.c.l.bf16 %v1962_v48  ;;  %v2501_v61 = vunpack.c.h.bf16 %v1962_v48  ;;  %v243_v49 = vld [vmem:[%s2441_s20 + $0x6c] sm:$0xff]   ;;  %v245_v55 = vld [vmem:[%s2441_s20 + $0x74] sm:$0x1] }
  0x1f   : > { %v407_v62 = vrot.slane %v287_v56, 1  ;;  %v284_v63 = vunpack.c.l.bf16 %v230_v53  ;;  %v603_v0 = vrot.slane %v2486_v47, 2  ;;  %v604_v1 = vrot.slane %v2491_v52, 2 }
  0x20   : > { %v406_v2 = vsel %vm378_vm1, %v404_v57, %v405_v59  ;;  %v399_v5 = vrot.slane %v2499_v60, 1  ;;  %v400_v6 = vrot.slane %v2501_v61, 1  ;;  %v606_v8 = vrot.slane %v287_v56, 2  ;;  %v1964_v56 = vld [vmem:[%s2441_s20 + $0x60] sm:$0xff]  }
  0x21   : > { %2073 = vrot.lane.b32.xlu1 %v2072_v54, %s2398_s21  ;;  %v408_v13 = vsel %vm378_vm1, %v405_v59, %v407_v62  ;;  %v402_v14 = vrot.slane %v284_v63, 1  ;;  %v605_v15 = vsel %vm577_vm0, %v603_v0, %v604_v1  ;;  %v598_v16 = vrot.slane %v2499_v60, 2 }
  0x22   : > { %2068 = vrot.lane.b32.xlu0 %v2067_v58, %s2398_s21  ;;  %v2082_v18 = vpack.i.bf16 %v408_v13, %v406_v2  ;;  %v401_v19 = vsel %vm378_vm1, %v399_v5, %v400_v6  ;;  %v607_v20 = vsel %vm577_vm0, %v604_v1, %v606_v8  ;;  %v599_v21 = vrot.slane %v2501_v61, 2  ;;  %v242_v5 = vld [vmem:[%s2441_s20 + $0x68] sm:$0x1] }
  0x23   : > { %v403_v23 = vsel %vm378_vm1, %v400_v6, %v402_v14  ;;  %v2092_v24 = vpack.i.bf16 %v607_v20, %v605_v15  ;;  %v601_v25 = vrot.slane %v284_v63, 2  ;;  %v2520_v26 = vunpack.c.l.bf16 %v237_v10 }
  0x24   : > { %v2077_v28 = vpack.i.bf16 %v403_v23, %v401_v19  ;;  %v600_v29 = vsel %vm577_vm0, %v598_v16, %v599_v21  ;;  %v2524_v30 = vunpack.c.h.bf16 %v237_v10  ;;  %v293_v31 = vunpack.c.l.bf16 %v239_v17 }
  0x25   : > { %2083 = vrot.lane.b32.xlu1 %v2082_v18, %s2399_s22  ;;  %v602_v32 = vsel %vm577_vm0, %v599_v21, %v601_v25  ;;  %v414_v33 = vrot.slane %v2520_v26, 1  ;;  %v2529_v34 = vunpack.c.l.bf16 %v1963_v22  ;;  %v2531_v35 = vunpack.c.h.bf16 %v1963_v22 }
  0x26   : > { %2078 = vrot.lane.b32.xlu0 %v2077_v28, %s2399_s22  ;;  %v2087_v36 = vpack.i.bf16 %v602_v32, %v600_v29  ;;  %v415_v37 = vrot.slane %v2524_v30, 1  ;;  %v417_v38 = vrot.slane %v293_v31, 1  ;;  %v290_v39 = vunpack.c.l.bf16 %v236_v27  ;;  %v249_v32 = vld [vmem:[%s2441_s20 + $0x84] sm:$0xff]  }
  0x27   : > { %v409_v40 = vrot.slane %v2529_v34, 1  ;;  %v410_v41 = vrot.slane %v2531_v35, 1  ;;  %v613_v42 = vrot.slane %v2520_v26, 2  ;;  %v614_v43 = vrot.slane %v2524_v30, 2 }
  0x28   : > { %v416_v44 = vsel %vm378_vm1, %v414_v33, %v415_v37  ;;  %v418_v45 = vsel %vm378_vm1, %v415_v37, %v417_v38  ;;  %v412_v46 = vrot.slane %v290_v39, 1  ;;  %v616_v48 = vrot.slane %v293_v31, 2  ;;  %v251_v33 = vld [vmem:[%s2441_s20 + $0x8c] sm:$0x1] }
  0x29   : > { %2093 = vrot.lane.b32.xlu1 %v2092_v24, %s2398_s21  ;;  %v2102_v50 = vpack.i.bf16 %v418_v45, %v416_v44  ;;  %v411_v51 = vsel %vm378_vm1, %v409_v40, %v410_v41  ;;  %v615_v53 = vsel %vm577_vm0, %v613_v42, %v614_v43  ;;  %v608_v54 = vrot.slane %v2529_v34, 2  ;;  %v1965_v40 = vld [vmem:[%s2441_s20 + $0x78] sm:$0xff]  }
  0x2a   : > { %2088 = vrot.lane.b32.xlu0 %v2087_v36, %s2398_s21  ;;  %v413_v57 = vsel %vm378_vm1, %v410_v41, %v412_v46  ;;  %v617_v58 = vsel %vm577_vm0, %v614_v43, %v616_v48  ;;  %v609_v59 = vrot.slane %v2531_v35, 2  ;;  %v611_v62 = vrot.slane %v290_v39, 2  ;;  %v248_v41 = vld [vmem:[%s2441_s20 + $0x80] sm:$0x1] }
  0x2b   : > { %v2097_v63 = vpack.i.bf16 %v413_v57, %v411_v51  ;;  %v2112_v0 = vpack.i.bf16 %v617_v58, %v615_v53  ;;  %v2552_v1 = vunpack.c.l.bf16 %v243_v49  ;;  %v2554_v2 = vunpack.c.h.bf16 %v243_v49 }
  0x2c   : > { %v610_v6 = vsel %vm577_vm0, %v608_v54, %v609_v59  ;;  %v612_v8 = vsel %vm577_vm0, %v609_v59, %v611_v62  ;;  %v299_v10 = vunpack.c.l.bf16 %v245_v55  ;;  %v2559_v13 = vunpack.c.l.bf16 %v1964_v56 }
  0x2d   : > { %2103 = vrot.lane.b32.xlu1 %v2102_v50, %s2399_s22  ;;  %v2107_v14 = vpack.i.bf16 %v612_v8, %v610_v6  ;;  %v424_v15 = vrot.slane %v2552_v1, 1  ;;  %v425_v16 = vrot.slane %v2554_v2, 1  ;;  %v2564_v17 = vunpack.c.h.bf16 %v1964_v56 }
  0x2e   : > { %2098 = vrot.lane.b32.xlu0 %v2097_v63, %s2399_s22  ;;  %v427_v18 = vrot.slane %v299_v10, 1  ;;  %v296_v19 = vunpack.c.l.bf16 %v242_v5  ;;  %v419_v20 = vrot.slane %v2559_v13, 1  ;;  %v623_v21 = vrot.slane %v2552_v1, 2 }
  0x2f   : > { %v426_v22 = vsel %vm378_vm1, %v424_v15, %v425_v16  ;;  %v420_v23 = vrot.slane %v2564_v17, 1  ;;  %v624_v24 = vrot.slane %v2554_v2, 2  ;;  %v626_v25 = vrot.slane %v299_v10, 2  ;;  %v255_v15 = vld [vmem:[%s2441_s20 + $0x9c] sm:$0xff]  }
  0x30   : > { %v428_v27 = vsel %vm378_vm1, %v425_v16, %v427_v18  ;;  %v422_v28 = vrot.slane %v296_v19, 1  ;;  %v618_v29 = vrot.slane %v2559_v13, 2  ;;  %v619_v31 = vrot.slane %v2564_v17, 2 }
  0x31   : > { %2113 = vrot.lane.b32.xlu1 %v2112_v0, %s2398_s21  ;;  %v2122_v36 = vpack.i.bf16 %v428_v27, %v426_v22  ;;  %v421_v37 = vsel %vm378_vm1, %v419_v20, %v420_v23  ;;  %v625_v38 = vsel %vm577_vm0, %v623_v21, %v624_v24  ;;  %v627_v39 = vsel %vm577_vm0, %v624_v24, %v626_v25  ;;  %v257_v21 = vld [vmem:[%s2441_s20 + $0xa4] sm:$0x1]  ;;  %v1966_v22 = vld [vmem:[%s2441_s20 + $0x90] sm:$0xff]  }
  0x32   : > { %2108 = vrot.lane.b32.xlu0 %v2107_v14, %s2398_s21  ;;  %v423_v42 = vsel %vm378_vm1, %v420_v23, %v422_v28  ;;  %v2132_v43 = vpack.i.bf16 %v627_v39, %v625_v38  ;;  %v620_v44 = vsel %vm577_vm0, %v618_v29, %v619_v31  ;;  %v621_v45 = vrot.slane %v296_v19, 2  ;;  %v254_v28 = vld [vmem:[%s2441_s20 + $0x98] sm:$0x1] }
  0x33   : > { %v2117_v46 = vpack.i.bf16 %v423_v42, %v421_v37  ;;  %v2586_v48 = vunpack.c.l.bf16 %v249_v32  ;;  %v2588_v49 = vunpack.c.h.bf16 %v249_v32  ;;  %v305_v50 = vunpack.c.l.bf16 %v251_v33 }
  0x34   : > { %v622_v51 = vsel %vm577_vm0, %v619_v31, %v621_v45  ;;  %v2591_v53 = vunpack.c.l.bf16 %v1965_v40  ;;  %v2593_v54 = vunpack.c.h.bf16 %v1965_v40  ;;  %v302_v55 = vunpack.c.l.bf16 %v248_v41 }
  0x35   : > { %2123 = vrot.lane.b32.xlu1 %v2122_v36, %s2399_s22  ;;  %v2127_v56 = vpack.i.bf16 %v622_v51, %v620_v44  ;;  %v434_v57 = vrot.slane %v2586_v48, 1  ;;  %v435_v58 = vrot.slane %v2588_v49, 1  ;;  %v437_v59 = vrot.slane %v305_v50, 1 }
  0x36   : > { %2118 = vrot.lane.b32.xlu0 %v2117_v46, %s2399_s22  ;;  %v429_v62 = vrot.slane %v2591_v53, 1  ;;  %v430_v63 = vrot.slane %v2593_v54, 1  ;;  %v432_v0 = vrot.slane %v302_v55, 1  ;;  %v633_v5 = vrot.slane %v2586_v48, 2 }
  0x37   : > { %v436_v6 = vsel %vm378_vm1, %v434_v57, %v435_v58  ;;  %v438_v8 = vsel %vm378_vm1, %v435_v58, %v437_v59  ;;  %v634_v10 = vrot.slane %v2588_v49, 2  ;;  %v636_v14 = vrot.slane %v305_v50, 2  ;;  %v261_v58 = vld [vmem:[%s2441_s20 + $0xb4] sm:$0xff]  }
  0x38   : > { %v2142_v16 = vpack.i.bf16 %v438_v8, %v436_v6  ;;  %v431_v18 = vsel %vm378_vm1, %v429_v62, %v430_v63  ;;  %v433_v19 = vsel %vm378_vm1, %v430_v63, %v432_v0  ;;  %v628_v20 = vrot.slane %v2591_v53, 2 }
  0x39   : > { %2133 = vrot.lane.b32.xlu1 %v2132_v43, %s2398_s21  ;;  %v2137_v23 = vpack.i.bf16 %v433_v19, %v431_v18  ;;  %v635_v24 = vsel %vm577_vm0, %v633_v5, %v634_v10  ;;  %v637_v25 = vsel %vm577_vm0, %v634_v10, %v636_v14  ;;  %v629_v27 = vrot.slane %v2593_v54, 2  ;;  %v263_v5 = vld [vmem:[%s2441_s20 + $0xbc] sm:$0x1] }
  0x3a   : > { %2128 = vrot.lane.b32.xlu0 %v2127_v56, %s2398_s21  ;;  %v2152_v29 = vpack.i.bf16 %v637_v25, %v635_v24  ;;  %v631_v31 = vrot.slane %v302_v55, 2  ;;  %v2617_v32 = vunpack.c.l.bf16 %v255_v15  ;;  %v2619_v33 = vunpack.c.h.bf16 %v255_v15  ;;  %v1967_v15 = vld [vmem:[%s2441_s20 + $0xa8] sm:$0xff]  }
  0x3b   : > { %v630_v36 = vsel %vm577_vm0, %v628_v20, %v629_v27  ;;  %v311_v37 = vunpack.c.l.bf16 %v257_v21  ;;  %v2622_v38 = vunpack.c.l.bf16 %v1966_v22  ;;  %v2624_v39 = vunpack.c.h.bf16 %v1966_v22  ;;  %v260_v21 = vld [vmem:[%s2441_s20 + $0xb0] sm:$0x1] }
  0x3c   : > { %v632_v40 = vsel %vm577_vm0, %v629_v27, %v631_v31  ;;  %v444_v41 = vrot.slane %v2617_v32, 1  ;;  %v445_v42 = vrot.slane %v2619_v33, 1  ;;  %v308_v43 = vunpack.c.l.bf16 %v254_v28 }
  0x3d   : > { %2143 = vrot.lane.b32.xlu1 %v2142_v16, %s2399_s22  ;;  %v2147_v44 = vpack.i.bf16 %v632_v40, %v630_v36  ;;  %v447_v45 = vrot.slane %v311_v37, 1  ;;  %v439_v46 = vrot.slane %v2622_v38, 1  ;;  %v440_v50 = vrot.slane %v2624_v39, 1 }
  0x3e   : > { %2138 = vrot.lane.b32.xlu0 %v2137_v23, %s2399_s22  ;;  %v446_v51 = vsel %vm378_vm1, %v444_v41, %v445_v42  ;;  %v442_v55 = vrot.slane %v308_v43, 1  ;;  %v643_v56 = vrot.slane %v2617_v32, 2  ;;  %v644_v57 = vrot.slane %v2619_v33, 2 }
  0x3f   : > { %v448_v59 = vsel %vm378_vm1, %v445_v42, %v447_v45  ;;  %v441_v62 = vsel %vm378_vm1, %v439_v46, %v440_v50  ;;  %v646_v63 = vrot.slane %v311_v37, 2  ;;  %v638_v0 = vrot.slane %v2622_v38, 2 }
  0x40   : > { %v2162_v6 = vpack.i.bf16 %v448_v59, %v446_v51  ;;  %v443_v8 = vsel %vm378_vm1, %v440_v50, %v442_v55  ;;  %v645_v10 = vsel %vm577_vm0, %v643_v56, %v644_v57  ;;  %v639_v14 = vrot.slane %v2624_v39, 2  ;;  %v1968_v56 = vld [vmem:[%s2441_s20 + $0xc0] sm:$0xff]  }
  0x41   : > { %2153 = vrot.lane.b32.xlu1 %v2152_v29, %s2398_s21  ;;  %v2157_v16 = vpack.i.bf16 %v443_v8, %v441_v62  ;;  %v647_v18 = vsel %vm577_vm0, %v644_v57, %v646_v63  ;;  %v641_v19 = vrot.slane %v308_v43, 2  ;;  %v2647_v20 = vunpack.c.l.bf16 %v261_v58  ;;  %v266_v63 = vld [vmem:[%s2441_s20 + $0xc8] sm:$0x1] }
  0x42   : > { %2148 = vrot.lane.b32.xlu0 %v2147_v44, %s2398_s21  ;;  %v2172_v22 = vpack.i.bf16 %v647_v18, %v645_v10  ;;  %v640_v23 = vsel %vm577_vm0, %v638_v0, %v639_v14  ;;  %v2652_v24 = vunpack.c.h.bf16 %v261_v58  ;;  %v317_v25 = vunpack.c.l.bf16 %v263_v5  ;;  %v1926_v0 = vld [vmem:[%s2441_s20] sm:$0xff]  }
  0x43   : > { %v642_v27 = vsel %vm577_vm0, %v639_v14, %v641_v19  ;;  %v454_v28 = vrot.slane %v2647_v20, 1  ;;  %v2656_v29 = vunpack.c.l.bf16 %v1967_v15  ;;  %v2658_v31 = vunpack.c.h.bf16 %v1967_v15  ;;  %v218_v19 = vld [vmem:[%s2441_s20 + $0x8] sm:$0x1] }
  0x44   : > { %v2167_v36 = vpack.i.bf16 %v642_v27, %v640_v23  ;;  %v455_v37 = vrot.slane %v2652_v24, 1  ;;  %v457_v40 = vrot.slane %v317_v25, 1  ;;  %v314_v41 = vunpack.c.l.bf16 %v260_v21  ;;  %v267_v21 = vld [vmem:[%s2441_s20 + $0xcc] sm:$0xff]  }
  0x45   : > { %2163 = vrot.lane.b32.xlu1 %v2162_v6, %s2399_s22  ;;  %v449_v42 = vrot.slane %v2656_v29, 1  ;;  %v450_v43 = vrot.slane %v2658_v31, 1  ;;  %v653_v44 = vrot.slane %v2647_v20, 2  ;;  %v654_v45 = vrot.slane %v2652_v24, 2 }
  0x46   : > { %2158 = vrot.lane.b32.xlu0 %v2157_v16, %s2399_s22  ;;  %v456_v46 = vsel %vm378_vm1, %v454_v28, %v455_v37  ;;  %v458_v50 = vsel %vm378_vm1, %v455_v37, %v457_v40  ;;  %v452_v51 = vrot.slane %v314_v41, 1  ;;  %v656_v55 = vrot.slane %v317_v25, 2  ;;  %v269_v37 = vld [vmem:[%s2441_s20 + $0xd4] sm:$0x1] }
  0x47   : > { %v2182_v57 = vpack.i.bf16 %v458_v50, %v456_v46  ;;  %v451_v58 = vsel %vm378_vm1, %v449_v42, %v450_v43  ;;  %v655_v59 = vsel %vm577_vm0, %v653_v44, %v654_v45  ;;  %v648_v62 = vrot.slane %v2656_v29, 2 }
  0x48   : > { %v453_v5 = vsel %vm378_vm1, %v450_v43, %v452_v51  ;;  %v657_v6 = vsel %vm577_vm0, %v654_v45, %v656_v55  ;;  %v649_v8 = vrot.slane %v2658_v31, 2  ;;  %v651_v10 = vrot.slane %v314_v41, 2 }
  0x49   : > { %2173 = vrot.lane.b32.xlu1 %v2172_v22, %s2398_s21  ;;  %v2177_v14 = vpack.i.bf16 %v453_v5, %v451_v58  ;;  %v2192_v15 = vpack.i.bf16 %v657_v6, %v655_v59  ;;  %v2679_v16 = vunpack.c.l.bf16 %v1968_v56  ;;  %v2681_v18 = vunpack.c.h.bf16 %v1968_v56 }
  0x4a   : > { %2168 = vrot.lane.b32.xlu0 %v2167_v36, %s2398_s21  ;;  %v650_v23 = vsel %vm577_vm0, %v648_v62, %v649_v8  ;;  %v652_v25 = vsel %vm577_vm0, %v649_v8, %v651_v10  ;;  %v320_v27 = vunpack.c.l.bf16 %v266_v63  ;;  %v2688_v28 = vunpack.c.l.bf16 %v1926_v0 }
  0x4b   : > { %v2187_v40 = vpack.i.bf16 %v652_v25, %v650_v23  ;;  %v459_v22 = vrot.slane %v2679_v16, 1  ;;  %v460_v41 = vrot.slane %v2681_v18, 1  ;;  %v2693_v42 = vunpack.c.h.bf16 %v1926_v0 }
  0x4c   : > { %v462_v43 = vrot.slane %v320_v27, 1  ;;  %v272_v44 = vunpack.c.l.bf16 %v218_v19  ;;  %v379_v45 = vrot.slane %v2688_v28, 1  ;;  %v2696_v36 = vunpack.c.l.bf16 %v267_v21 }
  0x4d   : > { %2183 = vrot.lane.b32.xlu1 %v2182_v57, %s2399_s22  ;;  %v461_v46 = vsel %vm378_vm1, %v459_v22, %v460_v41  ;;  %v380_v50 = vrot.slane %v2693_v42, 1  ;;  %v2701_v51 = vunpack.c.h.bf16 %v267_v21  ;;  %v323_v55 = vunpack.c.l.bf16 %v269_v37 }
  0x4e   : > { %2178 = vrot.lane.b32.xlu0 %v2177_v14, %s2399_s22  ;;  %v463_v56 = vsel %vm378_vm1, %v460_v41, %v462_v43  ;;  %v382_v58 = vrot.slane %v272_v44, 1  ;;  %v464_v59 = vrot.slane %v2696_v36, 1  ;;  %v658_v62 = vrot.slane %v2679_v16, 2 }
  0x4f   : > { %v381_v63 = vsel %vm378_vm1, %v379_v45, %v380_v50  ;;  %v465_v57 = vrot.slane %v2701_v51, 1  ;;  %v467_v0 = vrot.slane %v323_v55, 1  ;;  %v659_v6 = vrot.slane %v2681_v18, 2 }
  0x50   : > { %v383_v5 = vsel %vm378_vm1, %v380_v50, %v382_v58  ;;  %v661_v8 = vrot.slane %v320_v27, 2  ;;  %v2197_v10 = vpack.i.bf16 %v463_v56, %v461_v46  ;;  %v578_v22 = vrot.slane %v2688_v28, 2 }
  0x51   : > { %2193 = vrot.lane.b32.xlu1 %v2192_v15, %s2398_s21  ;;  %v2202_v14 = vpack.i.bf16 %v383_v5, %v381_v63  ;;  %v466_v19 = vsel %vm378_vm1, %v464_v59, %v465_v57  ;;  %v468_v21 = vsel %vm378_vm1, %v465_v57, %v467_v0  ;;  %v660_v25 = vsel %vm577_vm0, %v658_v62, %v659_v6  ;;  %v2388_v5 = vld [vmem:[%s3226_s1 + $0x8] sm:$0xff]  }
  0x52   : > { %2188 = vrot.lane.b32.xlu0 %v2187_v40, %s2398_s21  ;;  %v2207_v23 = vpack.i.bf16 %v468_v21, %v466_v19  ;;  %v662_v37 = vsel %vm577_vm0, %v659_v6, %v661_v8  ;;  %v579_v41 = vrot.slane %v2693_v42, 2  ;;  %v581_v27 = vrot.slane %v272_v44, 2 }
  0x53   : > { %v663_v15 = vrot.slane %v2696_v36, 2  ;;  %v664_v43 = vrot.slane %v2701_v51, 2  ;;  %v666_v45 = vrot.slane %v323_v55, 2  ;;  %v2212_v46 = vpack.i.bf16 %v662_v37, %v660_v25  ;;  %v2387_v55 = vld [vmem:[%s3226_s1] sm:$0xff]  }
  0x54   : > { %v580_v56 = vsel %vm577_vm0, %v578_v22, %v579_v41  ;;  %v582_v58 = vsel %vm577_vm0, %v579_v41, %v581_v27  ;;  %1988 = vmatprep.subr.bf16.mxu0 %v2387_v55  ;;  %2026 = vmatprep.subr.bf16.mxu1 %v2387_v55  ;;  %v2389_v37 = vld [vmem:[%s3226_s1 + $0x10] ss:$0 sps:$4 sm:$0x33]  }
  0x55   : > { %2203 = vrot.lane.b32.xlu1 %v2202_v14, %s2399_s22  ;;  %v665_v40 = vsel %vm577_vm0, %v663_v15, %v664_v43  ;;  %v667_v50 = vsel %vm577_vm0, %v664_v43, %v666_v45  ;;  %v2217_v44 = vpack.i.bf16 %v582_v58, %v580_v56  ;;  %1989 = vmatpush3.bf16.msra.mxu0 %v2387_v55  ;;  %v1229_v41 = vsel %vm1227_vm4, %v2389_v37, 0 }
  0x56   : > { %2198 = vrot.lane.b32.xlu0 %v2197_v10, %s2399_s22  ;;  %v2222_v59 = vpack.i.bf16 %v667_v50, %v665_v40  ;;  %2029 = vmatpush3.bf16.msra.mxu1 %v2387_v55 }
  0x57   : > { %1990 = vmatprep.subr.bf16.mxu0 %v2388_v5  ;;  %2027 = vmatprep.subr.bf16.mxu1 %v2388_v5 }
  0x59   : > { %2213 = vrot.lane.b32.xlu1 %v2212_v46, %s2398_s21  ;;  %1991 = vmatpush3.bf16.msra.mxu0 %v2388_v5 }
  0x5a   : > { %2208 = vrot.lane.b32.xlu0 %v2207_v23, %s2399_s22  ;;  %2030 = vmatpush3.bf16.msra.mxu1 %v2388_v5 }
  0x5b   : > { %2032 = vmatprep.subr.msk.bf16.mxu0 %vm1227_vm4, %v2389_v37  ;;  %2033 = vmatprep.subr.msk.bf16.mxu1 %vm1227_vm4, %v2389_v37 }
  0x5d   : > { %2223 = vrot.lane.b32.xlu1 %v2222_v59, %s2398_s21  ;;  %1993 = vmatpush3.bf16.msra.mxu0 %v1229_v41 }
  0x5e   : > { %2218 = vrot.lane.b32.xlu0 %v2217_v44, %s2398_s21  ;;  %2031 = vmatpush3.bf16.msra.mxu1 %v1229_v41 }
  0x8b   : > { %v2059_v62 = vpop.permute.xlu1 %2058 }
  0x8c   : > { %v2061_v63 = vunpack.i.h.bf16 %v2059_v62  ;;  %v2060_v57 = vunpack.i.l.bf16 %v2059_v62  ;;  %v2049_v0 = vpop.permute.xlu0 %2048 }
  0x8d   : > { %v2051_v6 = vunpack.i.h.bf16 %v2049_v0  ;;  %v2050_v8 = vunpack.i.l.bf16 %v2049_v0 }
  0x8f   : > { %v780_v10 = vsel %vm776_vm2, %v2448_v4, %v2051_v6  ;;  %v779_v14 = vsel %vm776_vm2, %v2446_v3, %v2050_v8  ;;  %v2064_v19 = vpop.permute.xlu1 %2063 }
  0x90   : > { %v2054_v21 = vpop.permute.xlu0 %2053  ;;  %v2742_v23 = vsel %vm813_vm3, %v779_v14, %v2060_v57  ;;  %v2745_v25 = vsel %vm813_vm3, %v780_v10, %v2061_v63  ;;  %v2066_v15 = vunpack.i.h.bf16 %v2064_v19  ;;  %v2065_v43 = vunpack.i.l.bf16 %v2064_v19 }
  0x91   : > { %v2227_v4 = vpack.i.bf16 %v2745_v25, %v2742_v23  ;;  %v2056_v22 = vunpack.i.h.bf16 %v2054_v21  ;;  %v2055_v3 = vunpack.i.l.bf16 %v2054_v21 }
  0x92   : > { %v784_v63 = vsel %vm776_vm2, %v2454_v9, %v2066_v15  ;;  %v783_v57 = vsel %vm776_vm2, %v2451_v7, %v2065_v43 }
  0x93   : > { %2228 = vrot.lane.b32.xlu0 %v2227_v4, %s2400_s29  ;;  %v2074_v27 = vpop.permute.xlu1 %2073  ;;  %v782_v58 = vsel %vm776_vm2, %v2458_v12, %v2056_v22  ;;  %v781_v59 = vsel %vm776_vm2, %v2456_v11, %v2055_v3 }
  0x94   : > { %v2069_v45 = vpop.permute.xlu0 %2068  ;;  %v2076_v46 = vunpack.i.h.bf16 %v2074_v27  ;;  %v2075_v40 = vunpack.i.l.bf16 %v2074_v27 }
  0x95   : > { %v2071_v50 = vunpack.i.h.bf16 %v2069_v45  ;;  %v2070_v56 = vunpack.i.l.bf16 %v2069_v45 }
  0x96   : > { %v2770_v5 = vsel %vm813_vm3, %v783_v57, %v2075_v40  ;;  %v2773_v11 = vsel %vm813_vm3, %v784_v63, %v2076_v46 }
  0x97   : > { %v2084_v44 = vpop.permute.xlu1 %2083  ;;  %v2758_v55 = vsel %vm813_vm3, %v781_v59, %v2070_v56  ;;  %v2761_v62 = vsel %vm813_vm3, %v782_v58, %v2071_v50  ;;  %v2247_v19 = vpack.i.bf16 %v2773_v11, %v2770_v5 }
  0x98   : > { %v2079_v0 = vpop.permute.xlu0 %2078  ;;  %v2237_v12 = vpack.i.bf16 %v2761_v62, %v2758_v55  ;;  %v2086_v10 = vunpack.i.h.bf16 %v2084_v44  ;;  %v2085_v7 = vunpack.i.l.bf16 %v2084_v44 }
  0x99   : > { %v2081_v6 = vunpack.i.h.bf16 %v2079_v0  ;;  %v2080_v8 = vunpack.i.l.bf16 %v2079_v0 }
  0x9a   : > { %2238 = vrot.lane.b32.xlu0 %v2237_v12, %s2401_s30  ;;  %2233 = vrot.lane.b32.xlu1 %v2237_v12, %s2400_s29  ;;  %v788_v45 = vsel %vm776_vm2, %v2491_v52, %v2086_v10 }
  0x9b   : > { %v2094_v9 = vpop.permute.xlu1 %2093  ;;  %v786_v3 = vsel %vm776_vm2, %v2501_v61, %v2081_v6  ;;  %v785_v41 = vsel %vm776_vm2, %v2499_v60, %v2080_v8  ;;  %v787_v61 = vsel %vm776_vm2, %v2486_v47, %v2085_v7 }
  0x9c   : > { %v2089_v14 = vpop.permute.xlu0 %2088  ;;  %v2096_v21 = vunpack.i.h.bf16 %v2094_v9  ;;  %v2095_v37 = vunpack.i.l.bf16 %v2094_v9 }
  0x9d   : > { %v2091_v4 = vunpack.i.h.bf16 %v2089_v14  ;;  %v2090_v22 = vunpack.i.l.bf16 %v2089_v14 }
  0x9e   : > { %2248 = vrot.lane.b32.xlu0 %v2247_v19, %s2400_s29  ;;  %2243 = vrot.lane.b32.xlu1 %v2247_v19, %s2401_s30  ;;  %v2798_v40 = vsel %vm813_vm3, %v787_v61, %v2095_v37  ;;  %v2801_v50 = vsel %vm813_vm3, %v788_v45, %v2096_v21 }
  0x9f   : > { %v2104_v27 = vpop.permute.xlu1 %2103  ;;  %v2786_v15 = vsel %vm813_vm3, %v785_v41, %v2090_v22  ;;  %v2789_v43 = vsel %vm813_vm3, %v786_v3, %v2091_v4  ;;  %v2267_v63 = vpack.i.bf16 %v2801_v50, %v2798_v40 }
  0xa0   : > { %v2099_v46 = vpop.permute.xlu0 %2098  ;;  %v2257_v60 = vpack.i.bf16 %v2789_v43, %v2786_v15  ;;  %v2106_v59 = vunpack.i.h.bf16 %v2104_v27  ;;  %v2105_v44 = vunpack.i.l.bf16 %v2104_v27 }
  0xa1   : > { %v2101_v56 = vunpack.i.h.bf16 %v2099_v46  ;;  %v2100_v58 = vunpack.i.l.bf16 %v2099_v46 }
  0xa2   : > { %2258 = vrot.lane.b32.xlu0 %v2257_v60, %s2401_s30  ;;  %2253 = vrot.lane.b32.xlu1 %v2257_v60, %s2400_s29  ;;  %v792_v19 = vsel %vm776_vm2, %v2524_v30, %v2106_v59 }
  0xa3   : > { %v2114_v52 = vpop.permute.xlu1 %2113  ;;  %v790_v8 = vsel %vm776_vm2, %v2531_v35, %v2101_v56  ;;  %v789_v9 = vsel %vm776_vm2, %v2529_v34, %v2100_v58  ;;  %v791_v35 = vsel %vm776_vm2, %v2520_v26, %v2105_v44 }
  0xa4   : > { %v2109_v47 = vpop.permute.xlu0 %2108  ;;  %v2116_v57 = vunpack.i.h.bf16 %v2114_v52  ;;  %v2115_v0 = vunpack.i.l.bf16 %v2114_v52 }
  0xa5   : > { %v2111_v12 = vunpack.i.h.bf16 %v2109_v47  ;;  %v2110_v6 = vunpack.i.l.bf16 %v2109_v47 }
  0xa6   : > { %2268 = vrot.lane.b32.xlu0 %v2267_v63, %s2400_s29  ;;  %2263 = vrot.lane.b32.xlu1 %v2267_v63, %s2401_s30  ;;  %v2826_v37 = vsel %vm813_vm3, %v791_v35, %v2115_v0  ;;  %v2829_v4 = vsel %vm813_vm3, %v792_v19, %v2116_v57 }
  0xa7   : > { %v2124_v10 = vpop.permute.xlu1 %2123  ;;  %v2814_v7 = vsel %vm813_vm3, %v789_v9, %v2110_v6  ;;  %v2817_v14 = vsel %vm813_vm3, %v790_v8, %v2111_v12  ;;  %v2287_v45 = vpack.i.bf16 %v2829_v4, %v2826_v37 }
  0xa8   : > { %v2119_v21 = vpop.permute.xlu0 %2118  ;;  %v2277_v34 = vpack.i.bf16 %v2817_v14, %v2814_v7  ;;  %v2126_v41 = vunpack.i.h.bf16 %v2124_v10  ;;  %v2125_v27 = vunpack.i.l.bf16 %v2124_v10 }
  0xa9   : > { %v2121_v22 = vunpack.i.h.bf16 %v2119_v21  ;;  %v2120_v3 = vunpack.i.l.bf16 %v2119_v21 }
  0xaa   : > { %2278 = vrot.lane.b32.xlu0 %v2277_v34, %s2401_s30  ;;  %2273 = vrot.lane.b32.xlu1 %v2277_v34, %s2400_s29  ;;  %v796_v63 = vsel %vm776_vm2, %v2554_v2, %v2126_v41 }
  0xab   : > { %v2134_v30 = vpop.permute.xlu1 %2133  ;;  %v794_v58 = vsel %vm776_vm2, %v2564_v17, %v2121_v22  ;;  %v793_v52 = vsel %vm776_vm2, %v2559_v13, %v2120_v3  ;;  %v795_v17 = vsel %vm776_vm2, %v2552_v1, %v2125_v27 }
  0xac   : > { %v2129_v26 = vpop.permute.xlu0 %2128  ;;  %v2136_v61 = vunpack.i.h.bf16 %v2134_v30  ;;  %v2135_v46 = vunpack.i.l.bf16 %v2134_v30 }
  0xad   : > { %v2131_v60 = vunpack.i.h.bf16 %v2129_v26  ;;  %v2130_v56 = vunpack.i.l.bf16 %v2129_v26 }
  0xae   : > { %2288 = vrot.lane.b32.xlu0 %v2287_v45, %s2400_s29  ;;  %2283 = vrot.lane.b32.xlu1 %v2287_v45, %s2401_s30  ;;  %v2854_v0 = vsel %vm813_vm3, %v795_v17, %v2135_v46  ;;  %v2857_v12 = vsel %vm813_vm3, %v796_v63, %v2136_v61 }
  0xaf   : > { %v2144_v59 = vpop.permute.xlu1 %2143  ;;  %v2842_v44 = vsel %vm813_vm3, %v793_v52, %v2130_v56  ;;  %v2845_v47 = vsel %vm813_vm3, %v794_v58, %v2131_v60  ;;  %v2307_v19 = vpack.i.bf16 %v2857_v12, %v2854_v0 }
  0xb0   : > { %v2139_v57 = vpop.permute.xlu0 %2138  ;;  %v2297_v13 = vpack.i.bf16 %v2845_v47, %v2842_v44  ;;  %v2146_v9 = vunpack.i.h.bf16 %v2144_v59  ;;  %v2145_v10 = vunpack.i.l.bf16 %v2144_v59 }
  0xb1   : > { %v2141_v6 = vunpack.i.h.bf16 %v2139_v57  ;;  %v2140_v8 = vunpack.i.l.bf16 %v2139_v57 }
  0xb2   : > { %2298 = vrot.lane.b32.xlu0 %v2297_v13, %s2401_s30  ;;  %2293 = vrot.lane.b32.xlu1 %v2297_v13, %s2400_s29  ;;  %v800_v45 = vsel %vm776_vm2, %v2588_v49, %v2146_v9 }
  0xb3   : > { %v2154_v2 = vpop.permute.xlu1 %2153  ;;  %v798_v3 = vsel %vm776_vm2, %v2593_v54, %v2141_v6  ;;  %v797_v30 = vsel %vm776_vm2, %v2591_v53, %v2140_v8  ;;  %v799_v54 = vsel %vm776_vm2, %v2586_v48, %v2145_v10 }
  0xb4   : > { %v2149_v1 = vpop.permute.xlu0 %2148  ;;  %v2156_v35 = vunpack.i.h.bf16 %v2154_v2  ;;  %v2155_v21 = vunpack.i.l.bf16 %v2154_v2 }
  0xb5   : > { %v2151_v34 = vunpack.i.h.bf16 %v2149_v1  ;;  %v2150_v22 = vunpack.i.l.bf16 %v2149_v1 }
  0xb6   : > { %2308 = vrot.lane.b32.xlu0 %v2307_v19, %s2400_s29  ;;  %2303 = vrot.lane.b32.xlu1 %v2307_v19, %s2401_s30  ;;  %v2882_v46 = vsel %vm813_vm3, %v799_v54, %v2155_v21  ;;  %v2885_v60 = vsel %vm813_vm3, %v800_v45, %v2156_v35 }
  0xb7   : > { %v2164_v41 = vpop.permute.xlu1 %2163  ;;  %v2870_v27 = vsel %vm813_vm3, %v797_v30, %v2150_v22  ;;  %v2873_v26 = vsel %vm813_vm3, %v798_v3, %v2151_v34  ;;  %v2327_v63 = vpack.i.bf16 %v2885_v60, %v2882_v46 }
  0xb8   : > { %v2159_v61 = vpop.permute.xlu0 %2158  ;;  %v2317_v53 = vpack.i.bf16 %v2873_v26, %v2870_v27  ;;  %v2166_v52 = vunpack.i.h.bf16 %v2164_v41  ;;  %v2165_v59 = vunpack.i.l.bf16 %v2164_v41 }
  0xb9   : > { %v2161_v56 = vunpack.i.h.bf16 %v2159_v61  ;;  %v2160_v58 = vunpack.i.l.bf16 %v2159_v61 }
  0xba   : > { %2318 = vrot.lane.b32.xlu0 %v2317_v53, %s2401_s30  ;;  %2313 = vrot.lane.b32.xlu1 %v2317_v53, %s2400_s29  ;;  %v804_v19 = vsel %vm776_vm2, %v2619_v33, %v2166_v52 }
  0xbb   : > { %v2174_v49 = vpop.permute.xlu1 %2173  ;;  %v802_v8 = vsel %vm776_vm2, %v2624_v39, %v2161_v56  ;;  %v801_v2 = vsel %vm776_vm2, %v2622_v38, %v2160_v58  ;;  %v803_v39 = vsel %vm776_vm2, %v2617_v32, %v2165_v59 }
  0xbc   : > { %v2169_v48 = vpop.permute.xlu0 %2168  ;;  %v2176_v17 = vunpack.i.h.bf16 %v2174_v49  ;;  %v2175_v57 = vunpack.i.l.bf16 %v2174_v49 }
  0xbd   : > { %v2171_v13 = vunpack.i.h.bf16 %v2169_v48  ;;  %v2170_v6 = vunpack.i.l.bf16 %v2169_v48 }
  0xbe   : > { %2328 = vrot.lane.b32.xlu0 %v2327_v63, %s2400_s29  ;;  %2323 = vrot.lane.b32.xlu1 %v2327_v63, %s2401_s30  ;;  %v2910_v21 = vsel %vm813_vm3, %v803_v39, %v2175_v57  ;;  %v2913_v34 = vsel %vm813_vm3, %v804_v19, %v2176_v17 }
  0xbf   : > { %v2184_v9 = vpop.permute.xlu1 %2183  ;;  %v2898_v10 = vsel %vm813_vm3, %v801_v2, %v2170_v6  ;;  %v2901_v1 = vsel %vm813_vm3, %v802_v8, %v2171_v13  ;;  %v2347_v45 = vpack.i.bf16 %v2913_v34, %v2910_v21 }
  0xc0   : > { %v2179_v35 = vpop.permute.xlu0 %2178  ;;  %v2337_v38 = vpack.i.bf16 %v2901_v1, %v2898_v10  ;;  %v2186_v30 = vunpack.i.h.bf16 %v2184_v9  ;;  %v2185_v41 = vunpack.i.l.bf16 %v2184_v9 }
  0xc1   : > { %v2181_v22 = vunpack.i.h.bf16 %v2179_v35  ;;  %v2180_v3 = vunpack.i.l.bf16 %v2179_v35 }
  0xc2   : > { %2338 = vrot.lane.b32.xlu0 %v2337_v38, %s2401_s30  ;;  %2333 = vrot.lane.b32.xlu1 %v2337_v38, %s2400_s29  ;;  %v808_v63 = vsel %vm776_vm2, %v2652_v24, %v2186_v30 }
  0xc3   : > { %v2194_v33 = vpop.permute.xlu1 %2193  ;;  %v806_v58 = vsel %vm776_vm2, %v2658_v31, %v2181_v22  ;;  %v805_v49 = vsel %vm776_vm2, %v2656_v29, %v2180_v3  ;;  %v807_v31 = vsel %vm776_vm2, %v2647_v20, %v2185_v41 }
  0xc4   : > { %v2189_v32 = vpop.permute.xlu0 %2188  ;;  %v2196_v54 = vunpack.i.h.bf16 %v2194_v33  ;;  %v2195_v61 = vunpack.i.l.bf16 %v2194_v33 }
  0xc5   : > { %v2191_v53 = vunpack.i.h.bf16 %v2189_v32  ;;  %v2190_v56 = vunpack.i.l.bf16 %v2189_v32 }
  0xc6   : > { %2348 = vrot.lane.b32.xlu0 %v2347_v45, %s2400_s29  ;;  %2343 = vrot.lane.b32.xlu1 %v2347_v45, %s2401_s30  ;;  %v2938_v6 = vsel %vm813_vm3, %v807_v31, %v2195_v61  ;;  %v2941_v8 = vsel %vm813_vm3, %v808_v63, %v2196_v54 }
  0xc7   : > { %v2204_v52 = vpop.permute.xlu1 %2203  ;;  %v2926_v59 = vsel %vm813_vm3, %v805_v49, %v2190_v56  ;;  %v2929_v48 = vsel %vm813_vm3, %v806_v58, %v2191_v53  ;;  %v2367_v35 = vpack.i.bf16 %v2941_v8, %v2938_v6 }
  0xc8   : > { %v2199_v17 = vpop.permute.xlu0 %2198  ;;  %v2357_v29 = vpack.i.bf16 %v2929_v48, %v2926_v59  ;;  %v2206_v58 = vunpack.i.h.bf16 %v2204_v52  ;;  %v2205_v49 = vunpack.i.l.bf16 %v2204_v52 }
  0xc9   : > { %v2201_v57 = vunpack.i.h.bf16 %v2199_v17  ;;  %v2200_v13 = vunpack.i.l.bf16 %v2199_v17 }
  0xca   : > { %2358 = vrot.lane.b32.xlu0 %v2357_v29, %s2401_s30  ;;  %2353 = vrot.lane.b32.xlu1 %v2357_v29, %s2400_s29  ;;  %v778_v29 = vsel %vm776_vm2, %v2693_v42, %v2206_v58 }
  0xcb   : > { %v810_v24 = vsel %vm776_vm2, %v2681_v18, %v2201_v57  ;;  %v809_v20 = vsel %vm776_vm2, %v2679_v16, %v2200_v13  ;;  %v2214_v2 = vpop.permute.xlu1 %2213  ;;  %v777_v57 = vsel %vm776_vm2, %v2688_v28, %v2205_v49 }
  0xcc   : > { %v2209_v9 = vpop.permute.xlu0 %2208  ;;  %v2216_v19 = vunpack.i.h.bf16 %v2214_v2  ;;  %v2215_v39 = vunpack.i.l.bf16 %v2214_v2 }
  0xcd   : > { %v2211_v38 = vunpack.i.h.bf16 %v2209_v9  ;;  %v2210_v22 = vunpack.i.l.bf16 %v2209_v9 }
  0xce   : > { %2368 = vrot.lane.b32.xlu0 %v2367_v35, %s2400_s29  ;;  %2363 = vrot.lane.b32.xlu1 %v2367_v35, %s2401_s30  ;;  %v846_v3 = vsel %vm813_vm3, %v809_v20, %v2215_v39  ;;  %v847_v18 = vsel %vm813_vm3, %v810_v24, %v2216_v19 }
  0xcf   : > { %v812_v16 = vsel %vm776_vm2, %v2701_v51, %v2211_v38  ;;  %v811_v33 = vsel %vm776_vm2, %v2696_v36, %v2210_v22  ;;  %v2224_v30 = vpop.permute.xlu1 %2223  ;;  %v2377_v41 = vpack.i.bf16 %v847_v18, %v846_v3 }
  0xd0   : > { %v2226_v32 = vunpack.i.h.bf16 %v2224_v30  ;;  %v2225_v45 = vunpack.i.l.bf16 %v2224_v30  ;;  %v2219_v56 = vpop.permute.xlu0 %2218 }
  0xd1   : > { %v2221_v36 = vunpack.i.h.bf16 %v2219_v56  ;;  %v2220_v63 = vunpack.i.l.bf16 %v2219_v56 }
  0xd2   : > { %2378 = vrot.lane.b32.xlu0 %v2377_v41, %s2401_s30  ;;  %2373 = vrot.lane.b32.xlu1 %v2377_v41, %s2400_s29  ;;  %v848_v54 = vsel %vm813_vm3, %v811_v33, %v2225_v45  ;;  %v849_v61 = vsel %vm813_vm3, %v812_v16, %v2226_v32 }
  0xd3   : > { %v2382_v53 = vpack.i.bf16 %v849_v61, %v848_v54  ;;  %v814_v20 = vsel %vm813_vm3, %v777_v57, %v2220_v63  ;;  %v815_v2 = vsel %vm813_vm3, %v778_v29, %v2221_v36 }
  0xd6   : > { %2383 = vrot.lane.b32.xlu1 %v2382_v53, %s2401_s30 }
 0x105   : > { %v2229_v51 = vpop.permute.xlu0 %2228 }
 0x106   : > { %v2231_v31 = vunpack.i.h.bf16 %v2229_v51  ;;  %v2230_v17 = vunpack.i.l.bf16 %v2229_v51 }
 0x108   : > { %v1077_v35 = vsel %vm1076_vm5, %v814_v20, %v2230_v17  ;;  %v1078_v38 = vsel %vm1076_vm5, %v815_v2, %v2231_v31 }
 0x10c   : > { %v2239_v13 = vpop.permute.xlu0 %2238  ;;  %v2234_v24 = vpop.permute.xlu1 %2233 }
 0x10d   : > { %v2241_v9 = vunpack.i.h.bf16 %v2239_v13  ;;  %v2240_v52 = vunpack.i.l.bf16 %v2239_v13  ;;  %v2236_v19 = vunpack.i.h.bf16 %v2234_v24  ;;  %v2235_v39 = vunpack.i.l.bf16 %v2234_v24 }
 0x10f   : > { %v1110_v42 = vsel %vm1109_vm6, %v1077_v35, %v2240_v52  ;;  %v1111_v22 = vsel %vm1109_vm6, %v1078_v38, %v2241_v9  ;;  %v1080_v30 = vsel %vm1076_vm5, %v2745_v25, %v2236_v19  ;;  %v1079_v41 = vsel %vm1076_vm5, %v2742_v23, %v2235_v39 }
 0x110   : > { %v2249_v28 = vpop.permute.xlu0 %2248  ;;  %v2244_v3 = vpop.permute.xlu1 %2243  ;;  %v1142_v18 = vpack.c.bf16 %v1111_v22, %v1110_v42 }
 0x111   : > { %v2246_v16 = vunpack.i.h.bf16 %v2244_v3  ;;  %v2245_v33 = vunpack.i.l.bf16 %v2244_v3  ;;  %v2251_v32 = vunpack.i.h.bf16 %v2249_v28  ;;  %v2250_v45 = vunpack.i.l.bf16 %v2249_v28 }
 0x112   : > { %1994 = vmatprep.mubr.msk.bf16.mxu0 %vm1178_vm7, %v1142_v18 }
 0x113   : > { %v1112_v54 = vsel %vm1109_vm6, %v1079_v41, %v2245_v33  ;;  %v1113_v61 = vsel %vm1109_vm6, %v1080_v30, %v2246_v16  ;;  %v1082_v36 = vsel %vm1076_vm5, %v2761_v62, %v2251_v32  ;;  %v1081_v25 = vsel %vm1076_vm5, %v2758_v55, %v2250_v45 }
 0x114   : > { %v1143_v53 = vpack.c.bf16 %v1113_v61, %v1112_v54  ;;  %v2259_v56 = vpop.permute.xlu0 %2258  ;;  %v2254_v51 = vpop.permute.xlu1 %2253 }
 0x115   : > { %v2261_v58 = vunpack.i.h.bf16 %v2259_v56  ;;  %v2260_v49 = vunpack.i.l.bf16 %v2259_v56  ;;  %v2256_v23 = vunpack.i.h.bf16 %v2254_v51  ;;  %v2255_v63 = vunpack.i.l.bf16 %v2254_v51 }
 0x116   : > { %1995 = vmatmul.mubr.msk.bf16.vlgmr.msra.gmra.mrb[0].mxu0 %vm1178_vm7, %v1143_v53 }
 0x117   : > { %v1114_v31 = vsel %vm1109_vm6, %v1081_v25, %v2260_v49  ;;  %v1115_v17 = vsel %vm1109_vm6, %v1082_v36, %v2261_v58  ;;  %v1084_v2 = vsel %vm1076_vm5, %v2773_v11, %v2256_v23  ;;  %v1083_v62 = vsel %vm1076_vm5, %v2770_v5, %v2255_v63 }
 0x118   : > { %v1144_v29 = vpack.c.bf16 %v1115_v17, %v1114_v31  ;;  %v2269_v57 = vpop.permute.xlu0 %2268  ;;  %v2264_v13 = vpop.permute.xlu1 %2263 }
 0x119   : > { %v2266_v24 = vunpack.i.h.bf16 %v2264_v13  ;;  %v2265_v20 = vunpack.i.l.bf16 %v2264_v13  ;;  %v2271_v55 = vunpack.i.h.bf16 %v2269_v57  ;;  %v2270_v9 = vunpack.i.l.bf16 %v2269_v57 }
 0x11a   : > { %1998 = vmatprep.mubr.msk.bf16.mxu0 %vm1178_vm7, %v1144_v29 }
 0x11b   : > { %v1116_v52 = vsel %vm1109_vm6, %v1083_v62, %v2265_v20  ;;  %v1117_v19 = vsel %vm1109_vm6, %v1084_v2, %v2266_v24  ;;  %v1086_v28 = vsel %vm1076_vm5, %v2789_v43, %v2271_v55  ;;  %v1085_v11 = vsel %vm1076_vm5, %v2786_v15, %v2270_v9 }
 0x11c   : > { %v1145_v39 = vpack.c.bf16 %v1117_v19, %v1116_v52  ;;  %v2279_v35 = vpop.permute.xlu0 %2278  ;;  %v2274_v38 = vpop.permute.xlu1 %2273 }
 0x11d   : > { %v2281_v42 = vunpack.i.h.bf16 %v2279_v35  ;;  %v2280_v22 = vunpack.i.l.bf16 %v2279_v35  ;;  %v2276_v5 = vunpack.i.h.bf16 %v2274_v38  ;;  %v2275_v3 = vunpack.i.l.bf16 %v2274_v38 }
 0x11e   : > { %1999 = vmatmul.mubr.msk.bf16.gmra.mrb[4].mxu0 %vm1178_vm7, %v1145_v39 }
 0x11f   : > { %v1118_v18 = vsel %vm1109_vm6, %v1085_v11, %v2280_v22  ;;  %v1119_v16 = vsel %vm1109_vm6, %v1086_v28, %v2281_v42  ;;  %v1088_v54 = vsel %vm1076_vm5, %v2801_v50, %v2276_v5  ;;  %v1087_v43 = vsel %vm1076_vm5, %v2798_v40, %v2275_v3 }
 0x120   : > { %v1146_v33 = vpack.c.bf16 %v1119_v16, %v1118_v18  ;;  %v2289_v30 = vpop.permute.xlu0 %2288  ;;  %v2284_v41 = vpop.permute.xlu1 %2283 }
 0x121   : > { %v2286_v32 = vunpack.i.h.bf16 %v2284_v41  ;;  %v2285_v45 = vunpack.i.l.bf16 %v2284_v41  ;;  %v2291_v15 = vunpack.i.h.bf16 %v2289_v30  ;;  %v2290_v61 = vunpack.i.l.bf16 %v2289_v30 }
 0x122   : > { %2002 = vmatprep.mubr.msk.bf16.mxu0 %vm1178_vm7, %v1146_v33 }
 0x123   : > { %v1120_v53 = vsel %vm1109_vm6, %v1087_v43, %v2285_v45  ;;  %v1121_v56 = vsel %vm1109_vm6, %v1088_v54, %v2286_v32  ;;  %v1090_v23 = vsel %vm1076_vm5, %v2817_v14, %v2291_v15  ;;  %v1089_v50 = vsel %vm1076_vm5, %v2814_v7, %v2290_v61 }
 0x124   : > { %v1147_v51 = vpack.c.bf16 %v1121_v56, %v1120_v53  ;;  %v2299_v58 = vpop.permute.xlu0 %2298  ;;  %v2294_v49 = vpop.permute.xlu1 %2293 }
 0x125   : > { %v2301_v36 = vunpack.i.h.bf16 %v2299_v58  ;;  %v2300_v25 = vunpack.i.l.bf16 %v2299_v58  ;;  %v2296_v40 = vunpack.i.h.bf16 %v2294_v49  ;;  %v2295_v63 = vunpack.i.l.bf16 %v2294_v49 }
 0x126   : > { %2003 = vmatmul.mubr.msk.bf16.gmra.mrb[8].mxu0 %vm1178_vm7, %v1147_v51 }
 0x127   : > { %v1122_v31 = vsel %vm1109_vm6, %v1089_v50, %v2300_v25  ;;  %v1123_v17 = vsel %vm1109_vm6, %v1090_v23, %v2301_v36  ;;  %v1092_v2 = vsel %vm1076_vm5, %v2829_v4, %v2296_v40  ;;  %v1091_v14 = vsel %vm1076_vm5, %v2826_v37, %v2295_v63 }
 0x128   : > { %v1148_v29 = vpack.c.bf16 %v1123_v17, %v1122_v31  ;;  %v2309_v57 = vpop.permute.xlu0 %2308  ;;  %v2304_v13 = vpop.permute.xlu1 %2303 }
 0x129   : > { %v2306_v24 = vunpack.i.h.bf16 %v2304_v13  ;;  %v2305_v20 = vunpack.i.l.bf16 %v2304_v13  ;;  %v2311_v7 = vunpack.i.h.bf16 %v2309_v57  ;;  %v2310_v62 = vunpack.i.l.bf16 %v2309_v57 }
 0x12a   : > { %2006 = vmatprep.mubr.msk.bf16.mxu0 %vm1178_vm7, %v1148_v29 }
 0x12b   : > { %v1124_v55 = vsel %vm1109_vm6, %v1091_v14, %v2305_v20  ;;  %v1125_v9 = vsel %vm1109_vm6, %v1092_v2, %v2306_v24  ;;  %v1093_v37 = vsel %vm1076_vm5, %v2842_v44, %v2310_v62  ;;  %v1094_v4 = vsel %vm1076_vm5, %v2845_v47, %v2311_v7 }
 0x12c   : > { %v1149_v52 = vpack.c.bf16 %v1125_v9, %v1124_v55  ;;  %v2319_v19 = vpop.permute.xlu0 %2318  ;;  %v2314_v39 = vpop.permute.xlu1 %2313 }
 0x12d   : > { %v2321_v35 = vunpack.i.h.bf16 %v2319_v19  ;;  %v2320_v38 = vunpack.i.l.bf16 %v2319_v19  ;;  %v2316_v42 = vunpack.i.h.bf16 %v2314_v39  ;;  %v2315_v22 = vunpack.i.l.bf16 %v2314_v39 }
 0x12e   : > { %2007 = vmatmul.mubr.msk.bf16.gmra.mrb[12].mxu0 %vm1178_vm7, %v1149_v52 }
 0x12f   : > { %v1126_v28 = vsel %vm1109_vm6, %v1093_v37, %v2320_v38  ;;  %v1127_v11 = vsel %vm1109_vm6, %v1094_v4, %v2321_v35  ;;  %v1096_v30 = vsel %vm1076_vm5, %v2857_v12, %v2316_v42  ;;  %v1095_v41 = vsel %vm1076_vm5, %v2854_v0, %v2315_v22 }
 0x130   : > { %v2329_v5 = vpop.permute.xlu0 %2328  ;;  %v2324_v3 = vpop.permute.xlu1 %2323  ;;  %v1150_v18 = vpack.c.bf16 %v1127_v11, %v1126_v28 }
 0x131   : > { %v2326_v16 = vunpack.i.h.bf16 %v2324_v3  ;;  %v2325_v33 = vunpack.i.l.bf16 %v2324_v3  ;;  %v2331_v32 = vunpack.i.h.bf16 %v2329_v5  ;;  %v2330_v44 = vunpack.i.l.bf16 %v2329_v5 }
 0x132   : > { %2010 = vmatprep.mubr.msk.bf16.mxu1 %vm1178_vm7, %v1150_v18 }
 0x133   : > { %v1128_v47 = vsel %vm1109_vm6, %v1095_v41, %v2325_v33  ;;  %v1129_v45 = vsel %vm1109_vm6, %v1096_v30, %v2326_v16  ;;  %v1098_v56 = vsel %vm1076_vm5, %v2873_v26, %v2331_v32  ;;  %v1097_v12 = vsel %vm1076_vm5, %v2870_v27, %v2330_v44 }
 0x134   : > { %v1151_v54 = vpack.c.bf16 %v1129_v45, %v1128_v47  ;;  %v2339_v43 = vpop.permute.xlu0 %2338  ;;  %v2334_v15 = vpop.permute.xlu1 %2333 }
 0x135   : > { %v2341_v61 = vunpack.i.h.bf16 %v2339_v43  ;;  %v2340_v53 = vunpack.i.l.bf16 %v2339_v43  ;;  %v2336_v0 = vunpack.i.h.bf16 %v2334_v15  ;;  %v2335_v51 = vunpack.i.l.bf16 %v2334_v15 }
 0x136   : > { %2011 = vmatmul.mubr.msk.bf16.vlgmr.msra.gmra.mrb[0].mxu1 %vm1178_vm7, %v1151_v54 }
 0x137   : > { %v1130_v58 = vsel %vm1109_vm6, %v1097_v12, %v2340_v53  ;;  %v1131_v49 = vsel %vm1109_vm6, %v1098_v56, %v2341_v61  ;;  %v1100_v63 = vsel %vm1076_vm5, %v2885_v60, %v2336_v0  ;;  %v1099_v26 = vsel %vm1076_vm5, %v2882_v46, %v2335_v51 }
 0x138   : > { %v1152_v36 = vpack.c.bf16 %v1131_v49, %v1130_v58  ;;  %v2349_v25 = vpop.permute.xlu0 %2348  ;;  %v2344_v23 = vpop.permute.xlu1 %2343 }
 0x139   : > { %v2346_v50 = vunpack.i.h.bf16 %v2344_v23  ;;  %v2345_v40 = vunpack.i.l.bf16 %v2344_v23  ;;  %v2351_v27 = vunpack.i.h.bf16 %v2349_v25  ;;  %v2350_v31 = vunpack.i.l.bf16 %v2349_v25 }
 0x13a   : > { %2014 = vmatprep.mubr.msk.bf16.mxu1 %vm1178_vm7, %v1152_v36 }
 0x13b   : > { %v1132_v17 = vsel %vm1109_vm6, %v1099_v26, %v2345_v40  ;;  %v1133_v29 = vsel %vm1109_vm6, %v1100_v63, %v2346_v50  ;;  %v1102_v14 = vsel %vm1076_vm5, %v2901_v1, %v2351_v27  ;;  %v1101_v60 = vsel %vm1076_vm5, %v2898_v10, %v2350_v31 }
 0x13c   : > { %v1153_v57 = vpack.c.bf16 %v1133_v29, %v1132_v17  ;;  %v2359_v13 = vpop.permute.xlu0 %2358  ;;  %v2354_v24 = vpop.permute.xlu1 %2353 }
 0x13d   : > { %v2361_v20 = vunpack.i.h.bf16 %v2359_v13  ;;  %v2360_v2 = vunpack.i.l.bf16 %v2359_v13  ;;  %v2356_v46 = vunpack.i.h.bf16 %v2354_v24  ;;  %v2355_v7 = vunpack.i.l.bf16 %v2354_v24 }
 0x13e   : > { %2015 = vmatmul.mubr.msk.bf16.gmra.mrb[4].mxu1 %vm1178_vm7, %v1153_v57 }
 0x13f   : > { %v1134_v62 = vsel %vm1109_vm6, %v1101_v60, %v2360_v2  ;;  %v1135_v55 = vsel %vm1109_vm6, %v1102_v14, %v2361_v20  ;;  %v1104_v38 = vsel %vm1076_vm5, %v2913_v34, %v2356_v46  ;;  %v1103_v1 = vsel %vm1076_vm5, %v2910_v21, %v2355_v7 }
 0x140   : > { %v1154_v9 = vpack.c.bf16 %v1135_v55, %v1134_v62  ;;  %v2369_v52 = vpop.permute.xlu0 %2368  ;;  %v2364_v19 = vpop.permute.xlu1 %2363 }
 0x141   : > { %v2366_v39 = vunpack.i.h.bf16 %v2364_v19  ;;  %v2365_v35 = vunpack.i.l.bf16 %v2364_v19  ;;  %v2371_v10 = vunpack.i.h.bf16 %v2369_v52  ;;  %v2370_v42 = vunpack.i.l.bf16 %v2369_v52 }
 0x142   : > { %2018 = vmatprep.mubr.msk.bf16.mxu1 %vm1178_vm7, %v1154_v9 }
 0x143   : > { %v1136_v22 = vsel %vm1109_vm6, %v1103_v1, %v2365_v35  ;;  %v1137_v37 = vsel %vm1109_vm6, %v1104_v38, %v2366_v39  ;;  %v1106_v18 = vsel %vm1076_vm5, %v2929_v48, %v2371_v10  ;;  %v1105_v34 = vsel %vm1076_vm5, %v2926_v59, %v2370_v42 }
 0x144   : > { %v1155_v4 = vpack.c.bf16 %v1137_v37, %v1136_v22  ;;  %v2379_v28 = vpop.permute.xlu0 %2378  ;;  %v2374_v11 = vpop.permute.xlu1 %2373 }
 0x145   : > { %v2381_v5 = vunpack.i.h.bf16 %v2379_v28  ;;  %v2380_v3 = vunpack.i.l.bf16 %v2379_v28  ;;  %v2376_v21 = vunpack.i.h.bf16 %v2374_v11  ;;  %v2375_v16 = vunpack.i.l.bf16 %v2374_v11 }
 0x146   : > { %2019 = vmatmul.mubr.msk.bf16.gmra.mrb[8].mxu1 %vm1178_vm7, %v1155_v4 }
 0x147   : > { %v1139_v33 = vsel %vm1109_vm6, %v1106_v18, %v2381_v5  ;;  %v1138_v30 = vsel %vm1109_vm6, %v1105_v34, %v2380_v3  ;;  %v1108_v45 = vsel %vm1076_vm5, %v2941_v8, %v2376_v21  ;;  %v1107_v48 = vsel %vm1076_vm5, %v2938_v6, %v2375_v16 }
 0x148   : > { %v1156_v41 = vpack.c.bf16 %v1139_v33, %v1138_v30  ;;  %v2384_v32 = vpop.permute.xlu1 %2383 }
 0x149   : > { %v2386_v44 = vunpack.i.h.bf16 %v2384_v32  ;;  %v2385_v47 = vunpack.i.l.bf16 %v2384_v32 }
 0x14a   : > { %2022 = vmatprep.mubr.msk.bf16.mxu1 %vm1178_vm7, %v1156_v41 }
 0x14b   : > { %v1140_v59 = vsel %vm1109_vm6, %v1107_v48, %v2385_v47  ;;  %v1141_v54 = vsel %vm1109_vm6, %v1108_v45, %v2386_v44 }
 0x14c   : > { %v1157_v43 = vpack.c.bf16 %v1141_v54, %v1140_v59 }
 0x14e   : > { %2023 = vmatmul.mubr.msk.bf16.gmra.mrb[12].mxu1 %vm1178_vm7, %v1157_v43 }
 0x1e9   : > { %v1996_v8 = vpop.f32.mrb[0].mxu0 }
 0x1ea   : > { %v1895_v6 = vpack.c.bf16 %v1996_v8, %v1996_v8  ;;  %v1265_v15 = vpop.f32.mrb[1].mxu0  ;;  %v1626_v12 = vmul.f32 %v1996_v8, %v1996_v8  ;;  %v1556_v40 = vsel %vm776_vm2, %v1996_v8, 0.0 }
 0x1eb   : > { %v1893_v61 = vpack.c.bf16 %v1265_v15, %v1265_v15  ;;  %v1624_v53 = vmul.f32 %v1265_v15, %v1265_v15  ;;  %v1997_v56 = vpop.f32.mrb[2].mxu0  ;;  %v1553_v58 = vsel %vm776_vm2, %v1265_v15, 0.0 }
 0x1ec   : > { %1523 = vst.msk [vmem:[%s3084_s8 + $0x8] sm:$0xf] %vm1520_vm8, %v1895_v6  ;;  %v1896_v0 = vpack.c.bf16 %v1997_v56, %v1997_v56  ;;  %v1268_v51 = vpop.f32.mrb[3].mxu0  ;;  %v1627_v23 = vmul.f32 %v1997_v56, %v1997_v56  ;;  %v1659_v17 = vsel %vm776_vm2, %v1626_v12, 0.0  ;;  %v1558_v57 = vsel %vm776_vm2, %v1997_v56, 0.0 }
 0x1ed   : > { %1521 = vst.msk [vmem:[%s3084_s8] sm:$0xf] %vm1520_vm8, %v1893_v61  ;;  %v1894_v49 = vpack.c.bf16 %v1268_v51, %v1268_v51  ;;  %v1554_v36 = vsel %vm776_vm2, %v1268_v51, 0.0  ;;  %v1625_v25 = vmul.f32 %v1268_v51, %v1268_v51  ;;  %v1656_v63 = vsel %vm776_vm2, %v1624_v53, 0.0 }
 0x1ee   : > { %1524 = vst.msk [vmem:[%s3084_s8 + $0xc] sm:$0xf] %vm1520_vm8, %v1896_v0  ;;  %v1555_v50 = vadd.f32 %v1554_v36, %v1553_v58  ;;  %v1661_v13 = vsel %vm776_vm2, %v1627_v23, 0.0 }
 0x1ef   : > { %1522 = vst.msk [vmem:[%s3084_s8 + $0x4] sm:$0xf] %vm1520_vm8, %v1894_v49  ;;  %v1657_v26 = vsel %vm776_vm2, %v1625_v25, 0.0 }
 0x1f0   : > { %v1557_v27 = vadd.f32 %v1556_v40, %v1555_v50  ;;  %v1658_v31 = vadd.f32 %v1657_v26, %v1656_v63 }
 0x1f1   : > { %v2000_v29 = vpop.f32.mrb[4].mxu0 }
 0x1f2   : > { %v1660_v24 = vadd.f32 %v1659_v17, %v1658_v31  ;;  %v1899_v20 = vpack.c.bf16 %v2000_v29, %v2000_v29  ;;  %v1281_v2 = vpop.f32.mrb[5].mxu0  ;;  %v1559_v60 = vadd.f32 %v1558_v57, %v1557_v27  ;;  %v1630_v38 = vmul.f32 %v2000_v29, %v2000_v29 }
 0x1f3   : > { %v1897_v14 = vpack.c.bf16 %v1281_v2, %v1281_v2  ;;  %v1560_v46 = vsel %vm776_vm2, %v1281_v2, 0.0  ;;  %v1628_v7 = vmul.f32 %v1281_v2, %v1281_v2  ;;  %v2001_v62 = vpop.f32.mrb[6].mxu0  ;;  %v1564_v37 = vsel %vm776_vm2, %v2000_v29, 0.0 }
 0x1f4   : > { %1527 = vst.msk [vmem:[%s3084_s8 + $0x18] sm:$0xf] %vm1520_vm8, %v1899_v20  ;;  %v1662_v55 = vadd.f32 %v1661_v13, %v1660_v24  ;;  %v1900_v9 = vpack.c.bf16 %v2001_v62, %v2001_v62  ;;  %v1284_v52 = vpop.f32.mrb[7].mxu0  ;;  %v1561_v19 = vadd.f32 %v1560_v46, %v1559_v60  ;;  %v1631_v4 = vmul.f32 %v2001_v62, %v2001_v62 }
 0x1f5   : > { %1525 = vst.msk [vmem:[%s3084_s8 + $0x10] sm:$0xf] %vm1520_vm8, %v1897_v14  ;;  %v1663_v39 = vsel %vm776_vm2, %v1628_v7, 0.0  ;;  %v1898_v35 = vpack.c.bf16 %v1284_v52, %v1284_v52  ;;  %v1562_v10 = vsel %vm776_vm2, %v1284_v52, 0.0  ;;  %v1629_v42 = vmul.f32 %v1284_v52, %v1284_v52 }
 0x1f6   : > { %v1664_v1 = vadd.f32 %v1663_v39, %v1662_v55  ;;  %1528 = vst.msk [vmem:[%s3084_s8 + $0x1c] sm:$0xf] %vm1520_vm8, %v1900_v9  ;;  %v1563_v22 = vadd.f32 %v1562_v10, %v1561_v19  ;;  %v1667_v18 = vsel %vm776_vm2, %v1630_v38, 0.0  ;;  %v1566_v34 = vsel %vm776_vm2, %v2001_v62, 0.0 }
 0x1f7   : > { %1526 = vst.msk [vmem:[%s3084_s8 + $0x14] sm:$0xf] %vm1520_vm8, %v1898_v35  ;;  %v1665_v28 = vsel %vm776_vm2, %v1629_v42, 0.0  ;;  %v1669_v47 = vsel %vm776_vm2, %v1631_v4, 0.0 }
 0x1f8   : > { %v1565_v11 = vadd.f32 %v1564_v37, %v1563_v22  ;;  %v1666_v5 = vadd.f32 %v1665_v28, %v1664_v1 }
 0x1f9   : > { %v2004_v3 = vpop.f32.mrb[8].mxu0 }
 0x1fa   : > { %v1903_v21 = vpack.c.bf16 %v2004_v3, %v2004_v3  ;;  %v1297_v16 = vpop.f32.mrb[9].mxu0  ;;  %v1668_v33 = vadd.f32 %v1667_v18, %v1666_v5  ;;  %v1567_v41 = vadd.f32 %v1566_v34, %v1565_v11  ;;  %v1634_v6 = vmul.f32 %v2004_v3, %v2004_v3 }
 0x1fb   : > { %v1901_v30 = vpack.c.bf16 %v1297_v16, %v1297_v16  ;;  %v1568_v32 = vsel %vm776_vm2, %v1297_v16, 0.0  ;;  %v2005_v44 = vpop.f32.mrb[10].mxu0  ;;  %v1632_v45 = vmul.f32 %v1297_v16, %v1297_v16  ;;  %v1572_v0 = vsel %vm776_vm2, %v2004_v3, 0.0 }
 0x1fc   : > { %1531 = vst.msk [vmem:[%s3084_s8 + $0x28] sm:$0xf] %vm1520_vm8, %v1903_v21  ;;  %v1904_v48 = vpack.c.bf16 %v2005_v44, %v2005_v44  ;;  %v1300_v59 = vpop.f32.mrb[11].mxu0  ;;  %v1569_v54 = vadd.f32 %v1568_v32, %v1567_v41  ;;  %v1670_v43 = vadd.f32 %v1669_v47, %v1668_v33  ;;  %v1635_v51 = vmul.f32 %v2005_v44, %v2005_v44 }
 0x1fd   : > { %1529 = vst.msk [vmem:[%s3084_s8 + $0x20] sm:$0xf] %vm1520_vm8, %v1901_v30  ;;  %v1902_v8 = vpack.c.bf16 %v1300_v59, %v1300_v59  ;;  %v1671_v15 = vsel %vm776_vm2, %v1632_v45, 0.0  ;;  %v1570_v61 = vsel %vm776_vm2, %v1300_v59, 0.0  ;;  %v1633_v53 = vmul.f32 %v1300_v59, %v1300_v59 }
 0x1fe   : > { %1532 = vst.msk [vmem:[%s3084_s8 + $0x2c] sm:$0xf] %vm1520_vm8, %v1904_v48  ;;  %v1672_v56 = vadd.f32 %v1671_v15, %v1670_v43  ;;  %v1571_v12 = vadd.f32 %v1570_v61, %v1569_v54  ;;  %v1675_v23 = vsel %vm776_vm2, %v1634_v6, 0.0  ;;  %v1574_v50 = vsel %vm776_vm2, %v2005_v44, 0.0 }
 0x1ff   : > { %1530 = vst.msk [vmem:[%s3084_s8 + $0x24] sm:$0xf] %vm1520_vm8, %v1902_v8  ;;  %v1673_v58 = vsel %vm776_vm2, %v1633_v53, 0.0  ;;  %v1677_v57 = vsel %vm776_vm2, %v1635_v51, 0.0 }
 0x200   : > { %v1573_v49 = vadd.f32 %v1572_v0, %v1571_v12  ;;  %v1674_v36 = vadd.f32 %v1673_v58, %v1672_v56 }
 0x201   : > { %v2008_v25 = vpop.f32.mrb[12].mxu0 }
 0x202   : > { %v1907_v40 = vpack.c.bf16 %v2008_v25, %v2008_v25  ;;  %v1313_v63 = vpop.f32.mrb[13].mxu0  ;;  %v1676_v26 = vadd.f32 %v1675_v23, %v1674_v36  ;;  %v1575_v31 = vadd.f32 %v1574_v50, %v1573_v49  ;;  %v1638_v46 = vmul.f32 %v2008_v25, %v2008_v25 }
 0x203   : > { %v1905_v27 = vpack.c.bf16 %v1313_v63, %v1313_v63  ;;  %v1576_v17 = vsel %vm776_vm2, %v1313_v63, 0.0  ;;  %v2009_v29 = vpop.f32.mrb[14].mxu0  ;;  %v1636_v13 = vmul.f32 %v1313_v63, %v1313_v63  ;;  %v1580_v19 = vsel %vm776_vm2, %v2008_v25, 0.0 }
 0x204   : > { %1535 = vst.msk [vmem:[%s3084_s8 + $0x38] sm:$0xf] %vm1520_vm8, %v1907_v40  ;;  %v1908_v24 = vpack.c.bf16 %v2009_v29, %v2009_v29  ;;  %v1316_v20 = vpop.f32.mrb[15].mxu0  ;;  %v1577_v2 = vadd.f32 %v1576_v17, %v1575_v31  ;;  %v1678_v14 = vadd.f32 %v1677_v57, %v1676_v26  ;;  %v1639_v39 = vmul.f32 %v2009_v29, %v2009_v29 }
 0x205   : > { %1533 = vst.msk [vmem:[%s3084_s8 + $0x30] sm:$0xf] %vm1520_vm8, %v1905_v27  ;;  %v1906_v60 = vpack.c.bf16 %v1316_v20, %v1316_v20  ;;  %v1679_v7 = vsel %vm776_vm2, %v1636_v13, 0.0  ;;  %v1578_v62 = vsel %vm776_vm2, %v1316_v20, 0.0  ;;  %v1637_v55 = vmul.f32 %v1316_v20, %v1316_v20 }
 0x206   : > { %1536 = vst.msk [vmem:[%s3084_s8 + $0x3c] sm:$0xf] %vm1520_vm8, %v1908_v24  ;;  %v1680_v9 = vadd.f32 %v1679_v7, %v1678_v14  ;;  %v1579_v52 = vadd.f32 %v1578_v62, %v1577_v2  ;;  %v1683_v42 = vsel %vm776_vm2, %v1638_v46, 0.0  ;;  %v1582_v22 = vsel %vm776_vm2, %v2009_v29, 0.0 }
 0x207   : > { %1534 = vst.msk [vmem:[%s3084_s8 + $0x34] sm:$0xf] %vm1520_vm8, %v1906_v60  ;;  %v1681_v35 = vsel %vm776_vm2, %v1637_v55, 0.0  ;;  %v1685_v34 = vsel %vm776_vm2, %v1639_v39, 0.0 }
 0x208   : > { %v1581_v38 = vadd.f32 %v1580_v19, %v1579_v52  ;;  %v1682_v1 = vadd.f32 %v1681_v35, %v1680_v9 }
 0x209   : > { %v2012_v10 = vpop.f32.mrb[0].mxu1 }
 0x20a   : > { %v1911_v37 = vpack.c.bf16 %v2012_v10, %v2012_v10  ;;  %v1329_v4 = vpop.f32.mrb[1].mxu1  ;;  %v1684_v28 = vadd.f32 %v1683_v42, %v1682_v1  ;;  %v1583_v5 = vadd.f32 %v1582_v22, %v1581_v38  ;;  %v1642_v44 = vmul.f32 %v2012_v10, %v2012_v10 }
 0x20b   : > { %v1909_v11 = vpack.c.bf16 %v1329_v4, %v1329_v4  ;;  %v1584_v3 = vsel %vm776_vm2, %v1329_v4, 0.0  ;;  %v2013_v18 = vpop.f32.mrb[2].mxu1  ;;  %v1640_v21 = vmul.f32 %v1329_v4, %v1329_v4  ;;  %v1588_v43 = vsel %vm776_vm2, %v2012_v10, 0.0 }
 0x20c   : > { %1539 = vst.msk [vmem:[%s3084_s8 + $0x48] sm:$0xf] %vm1520_vm8, %v1911_v37  ;;  %v1912_v16 = vpack.c.bf16 %v2013_v18, %v2013_v18  ;;  %v1332_v33 = vpop.f32.mrb[3].mxu1  ;;  %v1585_v30 = vadd.f32 %v1584_v3, %v1583_v5  ;;  %v1686_v41 = vadd.f32 %v1685_v34, %v1684_v28  ;;  %v1643_v8 = vmul.f32 %v2013_v18, %v2013_v18 }
 0x20d   : > { %1537 = vst.msk [vmem:[%s3084_s8 + $0x40] sm:$0xf] %vm1520_vm8, %v1909_v11  ;;  %v1910_v32 = vpack.c.bf16 %v1332_v33, %v1332_v33  ;;  %v1687_v47 = vsel %vm776_vm2, %v1640_v21, 0.0  ;;  %v1586_v45 = vsel %vm776_vm2, %v1332_v33, 0.0  ;;  %v1641_v48 = vmul.f32 %v1332_v33, %v1332_v33 }
 0x20e   : > { %1540 = vst.msk [vmem:[%s3084_s8 + $0x4c] sm:$0xf] %vm1520_vm8, %v1912_v16  ;;  %v1688_v59 = vadd.f32 %v1687_v47, %v1686_v41  ;;  %v1587_v54 = vadd.f32 %v1586_v45, %v1585_v30  ;;  %v1691_v56 = vsel %vm776_vm2, %v1642_v44, 0.0  ;;  %v1590_v12 = vsel %vm776_vm2, %v2013_v18, 0.0 }
 0x20f   : > { %1538 = vst.msk [vmem:[%s3084_s8 + $0x44] sm:$0xf] %vm1520_vm8, %v1910_v32  ;;  %v1689_v6 = vsel %vm776_vm2, %v1641_v48, 0.0  ;;  %v1693_v50 = vsel %vm776_vm2, %v1643_v8, 0.0 }
 0x210   : > { %v1589_v15 = vadd.f32 %v1588_v43, %v1587_v54  ;;  %v1690_v61 = vadd.f32 %v1689_v6, %v1688_v59 }
 0x211   : > { %v2016_v53 = vpop.f32.mrb[4].mxu1 }
 0x212   : > { %v1915_v0 = vpack.c.bf16 %v2016_v53, %v2016_v53  ;;  %v1345_v51 = vpop.f32.mrb[5].mxu1  ;;  %v1692_v58 = vadd.f32 %v1691_v56, %v1690_v61  ;;  %v1591_v36 = vadd.f32 %v1590_v12, %v1589_v15  ;;  %v1646_v29 = vmul.f32 %v2016_v53, %v2016_v53 }
 0x213   : > { %v1913_v49 = vpack.c.bf16 %v1345_v51, %v1345_v51  ;;  %v1592_v25 = vsel %vm776_vm2, %v1345_v51, 0.0  ;;  %v2017_v23 = vpop.f32.mrb[6].mxu1  ;;  %v1644_v40 = vmul.f32 %v1345_v51, %v1345_v51  ;;  %v1596_v14 = vsel %vm776_vm2, %v2016_v53, 0.0 }
 0x214   : > { %1543 = vst.msk [vmem:[%s3084_s8 + $0x58] sm:$0xf] %vm1520_vm8, %v1915_v0  ;;  %v1916_v63 = vpack.c.bf16 %v2017_v23, %v2017_v23  ;;  %v1348_v26 = vpop.f32.mrb[7].mxu1  ;;  %v1593_v27 = vadd.f32 %v1592_v25, %v1591_v36  ;;  %v1694_v31 = vadd.f32 %v1693_v50, %v1692_v58  ;;  %v1647_v60 = vmul.f32 %v2017_v23, %v2017_v23 }
 0x215   : > { %1541 = vst.msk [vmem:[%s3084_s8 + $0x50] sm:$0xf] %vm1520_vm8, %v1913_v49  ;;  %v1914_v17 = vpack.c.bf16 %v1348_v26, %v1348_v26  ;;  %v1695_v57 = vsel %vm776_vm2, %v1644_v40, 0.0  ;;  %v1594_v13 = vsel %vm776_vm2, %v1348_v26, 0.0  ;;  %v1645_v24 = vmul.f32 %v1348_v26, %v1348_v26 }
 0x216   : > { %1544 = vst.msk [vmem:[%s3084_s8 + $0x5c] sm:$0xf] %vm1520_vm8, %v1916_v63  ;;  %v1696_v20 = vadd.f32 %v1695_v57, %v1694_v31  ;;  %v1595_v2 = vadd.f32 %v1594_v13, %v1593_v27  ;;  %v1699_v9 = vsel %vm776_vm2, %v1646_v29, 0.0  ;;  %v1598_v52 = vsel %vm776_vm2, %v2017_v23, 0.0 }
 0x217   : > { %1542 = vst.msk [vmem:[%s3084_s8 + $0x54] sm:$0xf] %vm1520_vm8, %v1914_v17  ;;  %v1697_v46 = vsel %vm776_vm2, %v1645_v24, 0.0  ;;  %v1701_v22 = vsel %vm776_vm2, %v1647_v60, 0.0 }
 0x218   : > { %v1597_v7 = vadd.f32 %v1596_v14, %v1595_v2  ;;  %v1698_v62 = vadd.f32 %v1697_v46, %v1696_v20 }
 0x219   : > { %v2020_v55 = vpop.f32.mrb[8].mxu1 }
 0x21a   : > { %v1919_v19 = vpack.c.bf16 %v2020_v55, %v2020_v55  ;;  %v1361_v39 = vpop.f32.mrb[9].mxu1  ;;  %v1700_v35 = vadd.f32 %v1699_v9, %v1698_v62  ;;  %v1599_v1 = vadd.f32 %v1598_v52, %v1597_v7  ;;  %v1650_v18 = vmul.f32 %v2020_v55, %v2020_v55 }
 0x21b   : > { %v1917_v38 = vpack.c.bf16 %v1361_v39, %v1361_v39  ;;  %v1600_v10 = vsel %vm776_vm2, %v1361_v39, 0.0  ;;  %v2021_v42 = vpop.f32.mrb[10].mxu1  ;;  %v1648_v37 = vmul.f32 %v1361_v39, %v1361_v39  ;;  %v1604_v41 = vsel %vm776_vm2, %v2020_v55, 0.0 }
 0x21c   : > { %1547 = vst.msk [vmem:[%s3084_s8 + $0x68] sm:$0xf] %vm1520_vm8, %v1919_v19  ;;  %v1920_v4 = vpack.c.bf16 %v2021_v42, %v2021_v42  ;;  %v1364_v28 = vpop.f32.mrb[11].mxu1  ;;  %v1601_v11 = vadd.f32 %v1600_v10, %v1599_v1  ;;  %v1702_v5 = vadd.f32 %v1701_v22, %v1700_v35  ;;  %v1651_v32 = vmul.f32 %v2021_v42, %v2021_v42 }
 0x21d   : > { %1545 = vst.msk [vmem:[%s3084_s8 + $0x60] sm:$0xf] %vm1520_vm8, %v1917_v38  ;;  %v1918_v3 = vpack.c.bf16 %v1364_v28, %v1364_v28  ;;  %v1703_v34 = vsel %vm776_vm2, %v1648_v37, 0.0  ;;  %v1602_v21 = vsel %vm776_vm2, %v1364_v28, 0.0  ;;  %v1649_v16 = vmul.f32 %v1364_v28, %v1364_v28 }
 0x21e   : > { %1548 = vst.msk [vmem:[%s3084_s8 + $0x6c] sm:$0xf] %vm1520_vm8, %v1920_v4  ;;  %v1704_v33 = vadd.f32 %v1703_v34, %v1702_v5  ;;  %v1603_v30 = vadd.f32 %v1602_v21, %v1601_v11  ;;  %v1707_v59 = vsel %vm776_vm2, %v1650_v18, 0.0  ;;  %v1606_v54 = vsel %vm776_vm2, %v2021_v42, 0.0 }
 0x21f   : > { %1546 = vst.msk [vmem:[%s3084_s8 + $0x64] sm:$0xf] %vm1520_vm8, %v1918_v3  ;;  %v1705_v44 = vsel %vm776_vm2, %v1649_v16, 0.0  ;;  %v1709_v12 = vsel %vm776_vm2, %v1651_v32, 0.0 }
 0x220   : > { %v1605_v47 = vadd.f32 %v1604_v41, %v1603_v30  ;;  %v1706_v45 = vadd.f32 %v1705_v44, %v1704_v33 }
 0x221   : > { %v2024_v48 = vpop.f32.mrb[12].mxu1 }
 0x222   : > { %v1923_v43 = vpack.c.bf16 %v2024_v48, %v2024_v48  ;;  %v1377_v8 = vpop.f32.mrb[13].mxu1  ;;  %v1708_v6 = vadd.f32 %v1707_v59, %v1706_v45  ;;  %v1607_v61 = vadd.f32 %v1606_v54, %v1605_v47  ;;  %v1654_v23 = vmul.f32 %v2024_v48, %v2024_v48 }
 0x223   : > { %v1921_v15 = vpack.c.bf16 %v1377_v8, %v1377_v8  ;;  %v1608_v53 = vsel %vm776_vm2, %v1377_v8, 0.0  ;;  %v2025_v56 = vpop.f32.mrb[14].mxu1  ;;  %v1652_v0 = vmul.f32 %v1377_v8, %v1377_v8  ;;  %v1612_v31 = vsel %vm776_vm2, %v2024_v48, 0.0 }
 0x224   : > { %1551 = vst.msk [vmem:[%s3084_s8 + $0x78] sm:$0xf] %vm1520_vm8, %v1923_v43  ;;  %v1924_v51 = vpack.c.bf16 %v2025_v56, %v2025_v56  ;;  %v1380_v58 = vpop.f32.mrb[15].mxu1  ;;  %v1609_v49 = vadd.f32 %v1608_v53, %v1607_v61  ;;  %v1710_v36 = vadd.f32 %v1709_v12, %v1708_v6  ;;  %v1655_v17 = vmul.f32 %v2025_v56, %v2025_v56 }
 0x225   : > { %1549 = vst.msk [vmem:[%s3084_s8 + $0x70] sm:$0xf] %vm1520_vm8, %v1921_v15  ;;  %v1922_v25 = vpack.c.bf16 %v1380_v58, %v1380_v58  ;;  %v1711_v50 = vsel %vm776_vm2, %v1652_v0, 0.0  ;;  %v1610_v40 = vsel %vm776_vm2, %v1380_v58, 0.0  ;;  %v1653_v63 = vmul.f32 %v1380_v58, %v1380_v58 }
 0x226   : > { %1552 = vst.msk [vmem:[%s3084_s8 + $0x7c] sm:$0xf] %vm1520_vm8, %v1924_v51  ;;  %v1712_v26 = vadd.f32 %v1711_v50, %v1710_v36  ;;  %v1611_v27 = vadd.f32 %v1610_v40, %v1609_v49  ;;  %v1715_v24 = vsel %vm776_vm2, %v1654_v23, 0.0  ;;  %v1614_v20 = vsel %vm776_vm2, %v2025_v56, 0.0 }
 0x227   : > { %1550 = vst.msk [vmem:[%s3084_s8 + $0x74] sm:$0xf] %vm1520_vm8, %v1922_v25  ;;  %v1713_v29 = vsel %vm776_vm2, %v1653_v63, 0.0  ;;  %v1717_v60 = vsel %vm776_vm2, %v1655_v17, 0.0 }
 0x228   : > { %v1613_v57 = vadd.f32 %v1612_v31, %v1611_v27  ;;  %v1714_v13 = vadd.f32 %v1713_v29, %v1712_v26 }
 0x22a   : > { %v1615_v2 = vadd.f32 %v1614_v20, %v1613_v57  ;;  %v1716_v14 = vadd.f32 %v1715_v24, %v1714_v13 }
 0x22c   : > { %v1616_v46 = vrot.slane %v1615_v2, 4  ;;  %v1718_v7 = vadd.f32 %v1717_v60, %v1716_v14 }
 0x22e   : > { %v1617_v62 = vadd.f32 %v1616_v46, %v1615_v2  ;;  %v1719_v55 = vrot.slane %v1718_v7, 4 }
 0x230   : > { %v1618_v9 = vrot.slane %v1617_v62, 2  ;;  %v1720_v52 = vadd.f32 %v1719_v55, %v1718_v7 }
 0x232   : > { %v1619_v19 = vadd.f32 %v1618_v9, %v1617_v62  ;;  %v1721_v39 = vrot.slane %v1720_v52, 2 }
 0x234   : > { %v1620_v35 = vrot.slane %v1619_v19, 1  ;;  %v1722_v38 = vadd.f32 %v1721_v39, %v1720_v52 }
 0x236   : > { %v1621_v1 = vadd.f32 %v1620_v35, %v1619_v19  ;;  %v1723_v10 = vrot.slane %v1722_v38, 1 }
 0x238   : > { %1623 = vst.msk [vmem:[%s211_s11] sm:$0x1] %vm1622_vm9, %v1621_v1  ;;  %v1724_v42 = vadd.f32 %v1723_v10, %v1722_v38 }
 0x23a   : > { %1725 = vst.msk [vmem:[%s214_s14] sm:$0x1] %vm1622_vm9, %v1724_v42 }
 0x23b PF: > { %s15_s15 = sadd.s32 1, %s2396_s15  }
 0x23c   : > { %p12_p4 = scmp.ge.s32.totalorder %s15_s15, 4  }
 0x23e   :  { %14 = sbr.rel (!%p12_p4) target bundleno = 1 (0x1), region = 82 }

// kernel: residual_block_forward.4
= control target key start
LH: loop header
LB: loop body
LE: loop exit
PB: predicated region body
PF: predicated region fallthrough
CT: control target
= control target key end

     0   :  { %s3165_s21 = smov 0   ;;  %s4471_s0 = inlined_call_operand.vmem [shape: bf16[2,18,18,4], index: 0, kind: input, shape index: {}]   ;;  %s4472_s1 = inlined_call_operand.vmem [shape: f32[1,4], index: 1, kind: input, shape index: {}]   ;;  %s4473_s2 = inlined_call_operand.vmem [shape: f32[1,4], index: 2, kind: input, shape index: {}]   ;;  %s4474_s3 = inlined_call_operand.vmem [shape: bf16[36,4], index: 3, kind: input, shape index: {}]   ;;  %s4475_s4 = inlined_call_operand.vmem [shape: bf16[2,256,4], index: 4, kind: output, shape index: {0}]   ;;  %s4476_s5 = inlined_call_operand.vmem [shape: f32[2,1,4], index: 5, kind: output, shape index: {1}]   ;;  %s4477_s6 = inlined_call_operand.vmem [shape: f32[2,1,4], index: 6, kind: output, shape index: {2}]  }
   0x1 LB: > { %s2407_s22 = sadd.s32 4294967295, %s3123_s21   ;;  %p2411_p0 = scmp.ge.s32.totalorder %s3123_s21, 1  ;;  %s3123_s21 = sphi %s3165_s21, %s17_s21  }
   0x2   : > { %p217_p1 = scmp.lt.s32.totalorder %s3123_s21, 3 }
   0x4   : > { %p218_p2 = pnand %p2411_p0, %p217_p1 }
   0x5   : > { %p253_p3 = scmp.lt.s32.totalorder (!%p218_p2), %s2407_s22, 1  ;;  %v3184_v0 = vld [vmem:[%s4472_s1] ss:$0 sm:$0xff] (!%p218_p2)  ;;  %v824_v20 = vlaneseq (!%p218_p2)  ;;  %vm1153_vm4 = vcmask (!%p218_p2), 1045504   ;;  %vm954_vm5 = vcmask (!%p218_p2), 1046528   ;;  %s3125_s7 = smov (!%p218_p2), 8  }
   0x6   : > { %221 = sbr.rel (%p218_p2) target bundleno = 678 (0x2a6), region = 36  ;;  %v3195_v11 = vld [vmem:[%s4473_s2] ss:$0 sm:$0xff] (!%p218_p2)  ;;  %s3126_s8 = smov (!%p218_p2), 4  }
   0x7   : > { %v3226_v35 = vshrl.u32 (!%p218_p2), %v824_v20, 7  ;;  %s3128_s17 = smov (!%p218_p2), 12   ;;  %s3129_s20 = smov (!%p218_p2), 24  }
   0x9   : > { %v3240_v48 = vadd.s32 (!%p218_p2), 16, %v3226_v35  ;;  %vm828_vm2 = vcmp.ge.s32.totalorder (!%p218_p2), %v3226_v35, 1 }
   0xb   : > { %vm839_vm3 = vcmp.le.s32.totalorder (!%p218_p2), %v3240_v48, 16 }
   0xd   : > { %s4479_s22 = smov (!%p253_p3, %s2407_s22), 1 }
   0xe   : > { %s2662_s23 = smul.u32 216, %s4479_s22  ;;  %s265_s29 = scalar_lea.vmem %s4476_s5, %s4479_s22 }
  0x10   : > { %s3179_s26 = scalar_lea.vmem %s4471_s0, %s2662_s23  ;;  %s2524_s23 = sshll.u32 %s4479_s22, 7 }
  0x11   : > { %v273_v1 = vld [vmem:[%s3179_s26 + $0xc] sm:$0xff]   ;;  %v275_v2 = vld [vmem:[%s3179_s26 + $0x14] sm:$0x1]  ;;  %v279_v3 = vld [vmem:[%s3179_s26 + $0x24] sm:$0xff]  }
  0x12   : > { %v327_v4 = vunpack.c.l.bf16 %v273_v1  ;;  %v328_v5 = vunpack.c.h.bf16 %v273_v1  ;;  %v329_v6 = vunpack.c.l.bf16 %v275_v2  ;;  %v281_v7 = vld [vmem:[%s3179_s26 + $0x2c] sm:$0x1]  ;;  %v333_v8 = vunpack.c.l.bf16 %v279_v3  ;;  %v2589_v9 = vld [vmem:[%s3179_s26 + $0x18] sm:$0xff]   ;;  %v278_v10 = vld [vmem:[%s3179_s26 + $0x20] sm:$0x1] }
  0x13   : > { %v334_v12 = vunpack.c.h.bf16 %v279_v3  ;;  %v335_v13 = vunpack.c.l.bf16 %v281_v7  ;;  %v2559_v14 = vunpack.c.l.bf16 %v2589_v9  ;;  %v2560_v15 = vunpack.c.h.bf16 %v2589_v9  ;;  %v285_v47 = vld [vmem:[%s3179_s26 + $0x3c] sm:$0xff]   ;;  %v287_v53 = vld [vmem:[%s3179_s26 + $0x44] sm:$0x1]  ;;  %v2590_v56 = vld [vmem:[%s3179_s26 + $0x30] sm:$0xff]  }
  0x14   : > { %v389_v16 = vmul.f32 %v3184_v0, %v327_v4  ;;  %v390_v17 = vmul.f32 %v3184_v0, %v328_v5  ;;  %v391_v18 = vmul.f32 %v3184_v0, %v329_v6  ;;  %v395_v19 = vmul.f32 %v3184_v0, %v333_v8  ;;  %v284_v60 = vld [vmem:[%s3179_s26 + $0x38] sm:$0x1] }
  0x15   : > { %v396_v21 = vmul.f32 %v3184_v0, %v334_v12  ;;  %v397_v22 = vmul.f32 %v3184_v0, %v335_v13  ;;  %v332_v23 = vunpack.c.l.bf16 %v278_v10  ;;  %v392_v30 = vmul.f32 %v2559_v14, %v3184_v0 }
  0x16   : > { %v3204_v24 = vadd.f32 %v3195_v11, %v389_v16  ;;  %v3207_v25 = vadd.f32 %v3195_v11, %v390_v17  ;;  %v3210_v26 = vadd.f32 %v3195_v11, %v391_v18  ;;  %v3213_v27 = vadd.f32 %v3195_v11, %v395_v19 }
  0x17   : > { %v3216_v28 = vadd.f32 %v3195_v11, %v396_v21  ;;  %v3219_v29 = vadd.f32 %v3195_v11, %v397_v22  ;;  %v393_v32 = vmul.f32 %v2560_v15, %v3184_v0  ;;  %v394_v36 = vmul.f32 %v3184_v0, %v332_v23 }
  0x18   : > { %v557_v31 = vmin.f32 %v3204_v24, 0.0  ;;  %v558_v33 = vmin.f32 %v3207_v25, 0.0  ;;  %v559_v34 = vmin.f32 %v3210_v26, 0.0  ;;  %v563_v38 = vmin.f32 %v3213_v27, 0.0 }
  0x19   : > { %v564_v39 = vmin.f32 %v3216_v28, 0.0  ;;  %v565_v42 = vmin.f32 %v3219_v29, 0.0  ;;  %v3233_v43 = vadd.f32 %v3195_v11, %v392_v30  ;;  %v3236_v46 = vadd.f32 %v3195_v11, %v393_v32 }
  0x1a   : > { %v614_v37 = vmul.f32 1.442695, %v557_v31  ;;  %v616_v40 = vmul.f32 1.442695, %v558_v33  ;;  %v618_v41 = vmul.f32 1.442695, %v559_v34  ;;  %v3243_v50 = vadd.f32 %v3195_v11, %v394_v36 }
  0x1b   : > { %v626_v44 = vmul.f32 1.442695, %v563_v38  ;;  %v628_v45 = vmul.f32 1.442695, %v564_v39  ;;  %v630_v49 = vmul.f32 1.442695, %v565_v42  ;;  %v339_v55 = vunpack.c.l.bf16 %v285_v47 }
  0x1c   : > { %3019 = vpow2.f32 %v614_v37  ;;  %vm503_vm0 = vcmp.gt.f32.partialorder %v3204_v24, 0.0  ;;  %v560_v51 = vmin.f32 %v3233_v43, 0.0  ;;  %v561_v52 = vmin.f32 %v3236_v46, 0.0 }
  0x1d   : > { %3021 = vpow2.f32 %v616_v40  ;;  %vm504_vm1 = vcmp.gt.f32.partialorder %v3207_v25, 0.0  ;;  %v562_v54 = vmin.f32 %v3243_v50, 0.0  ;;  %v340_v59 = vunpack.c.h.bf16 %v285_v47 }
  0x1e   : > { %3023 = vpow2.f32 %v618_v41  ;;  %v620_v57 = vmul.f32 1.442695, %v560_v51  ;;  %v622_v58 = vmul.f32 1.442695, %v561_v52  ;;  %v341_v62 = vunpack.c.l.bf16 %v287_v53 }
  0x1f   : > { %3025 = vpow2.f32 %v626_v44  ;;  %v624_v61 = vmul.f32 1.442695, %v562_v54  ;;  %v401_v63 = vmul.f32 %v3184_v0, %v339_v55  ;;  %v402_v1 = vmul.f32 %v3184_v0, %v340_v59 }
  0x20   : > { %3027 = vpow2.f32 %v628_v45  ;;  %v2563_v2 = vunpack.c.l.bf16 %v2590_v56  ;;  %v2564_v3 = vunpack.c.h.bf16 %v2590_v56  ;;  %v403_v4 = vmul.f32 %v3184_v0, %v341_v62 }
  0x21   : > { %3029 = vpow2.f32 %v630_v49  ;;  %v3259_v5 = vadd.f32 %v3195_v11, %v401_v63  ;;  %v338_v6 = vunpack.c.l.bf16 %v284_v60  ;;  %v3262_v7 = vadd.f32 %v3195_v11, %v402_v1 }
  0x22   : > { %3031 = vpow2.f32 %v620_v57  ;;  %v398_v8 = vmul.f32 %v2563_v2, %v3184_v0  ;;  %v399_v9 = vmul.f32 %v2564_v3, %v3184_v0  ;;  %vm505_vm6 = vcmp.gt.f32.partialorder %v3210_v26, 0.0 }
  0x23   : > { %3033 = vpow2.f32 %v622_v58  ;;  %v3268_v10 = vadd.f32 %v3195_v11, %v403_v4  ;;  %v569_v12 = vmin.f32 %v3259_v5, 0.0  ;;  %v400_v13 = vmul.f32 %v3184_v0, %v338_v6 }
  0x24   : > { %3035 = vpow2.f32 %v624_v61  ;;  %vm509_vm7 = vcmp.gt.f32.partialorder %v3213_v27, 0.0  ;;  %vm510_vm8 = vcmp.gt.f32.partialorder %v3216_v28, 0.0  ;;  %vm511_vm9 = vcmp.gt.f32.partialorder %v3219_v29, 0.0 }
  0x25   : > { %v570_v15 = vmin.f32 %v3262_v7, 0.0  ;;  %v571_v18 = vmin.f32 %v3268_v10, 0.0  ;;  %v638_v19 = vmul.f32 1.442695, %v569_v12  ;;  %v3278_v20 = vadd.f32 %v3195_v11, %v398_v8 }
  0x26   : > { %v3020_v14 = vpop.eup %3019  ;;  %vm506_vm10 = vcmp.gt.f32.partialorder %v3233_v43, 0.0  ;;  %vm507_vm11 = vcmp.gt.f32.partialorder %v3236_v46, 0.0  ;;  %vm508_vm12 = vcmp.gt.f32.partialorder %v3243_v50, 0.0  ;;  %v3284_v30 = vadd.f32 %v3195_v11, %v399_v9 }
  0x27   : > { %v3022_v16 = vpop.eup %3021  ;;  %v2420_v17 = vadd.f32 -1.0, %v3020_v14  ;;  %v640_v23 = vmul.f32 1.442695, %v570_v15  ;;  %v3287_v31 = vadd.f32 %v3195_v11, %v400_v13  ;;  %3037 = vpow2.f32 %v638_v19 }
  0x28   : > { %v3024_v21 = vpop.eup %3023  ;;  %v2421_v22 = vadd.f32 -1.0, %v3022_v16  ;;  %v3292_v36 = vmul.f32 1.442695, %v571_v18  ;;  %vm515_vm13 = vcmp.gt.f32.partialorder %v3259_v5, 0.0  ;;  %vm516_vm14 = vcmp.gt.f32.partialorder %v3262_v7, 0.0 }
  0x29   : > { %v3026_v32 = vpop.eup %3025  ;;  %v2422_v33 = vadd.f32 -1.0, %v3024_v21  ;;  %v773_v34 = vsel %vm503_vm0, %v3204_v24, %v2420_v17  ;;  %3039 = vpow2.f32 %v640_v23  ;;  %vm517_vm15 = vcmp.gt.f32.partialorder %v3268_v10, 0.0 }
  0x2a   : > { %v3028_v37 = vpop.eup %3027  ;;  %v3297_v38 = vsel %vm504_vm1, %v3207_v25, %v2421_v22  ;;  %v3301_v39 = vsel %vm828_vm2, %v773_v34, 0.0  ;;  %v2426_v40 = vadd.f32 -1.0, %v3026_v32  ;;  %3041 = vpow2.f32 %v3292_v36 }
  0x2b   : > { %v3030_v41 = vpop.eup %3029  ;;  %v775_v24 = vsel %vm505_vm6, %v3210_v26, %v2422_v33  ;;  %v1159_v42 = vrot.slane %v3301_v39, 2  ;;  %v1160_v44 = vrot.slane %v3297_v38, 2  ;;  %v960_v45 = vrot.slane %v3301_v39, 1 }
  0x2c   : > { %v3032_v47 = vpop.eup %3031  ;;  %v851_v25 = vsel %vm839_vm3, %v775_v24, 0.0  ;;  %v961_v49 = vrot.slane %v3297_v38, 1  ;;  %v2427_v51 = vadd.f32 -1.0, %v3028_v37  ;;  %v2428_v52 = vadd.f32 -1.0, %v3030_v41 }
  0x2d   : > { %v3034_v53 = vpop.eup %3033  ;;  %v1161_v54 = vsel %vm1153_vm4, %v1159_v42, %v1160_v44  ;;  %v1162_v55 = vrot.slane %v851_v25, 2  ;;  %v963_v56 = vrot.slane %v851_v25, 1  ;;  %v779_v26 = vsel %vm509_vm7, %v3213_v27, %v2426_v40 }
  0x2e   : > { %v3036_v57 = vpop.eup %3035  ;;  %v962_v58 = vsel %vm954_vm5, %v960_v45, %v961_v49  ;;  %v3320_v59 = vsel %vm510_vm8, %v3216_v28, %v2427_v51  ;;  %v781_v60 = vsel %vm511_vm9, %v3219_v29, %v2428_v52  ;;  %v3327_v61 = vsel %vm828_vm2, %v779_v26, 0.0  ;;  %v293_v26 = vld [vmem:[%s3179_s26 + $0x5c] sm:$0x1] }
  0x2f   : > { %v1163_v27 = vsel %vm1153_vm4, %v1160_v44, %v1162_v55  ;;  %v964_v62 = vsel %vm954_vm5, %v961_v49, %v963_v56  ;;  %v857_v28 = vsel %vm839_vm3, %v781_v60, 0.0  ;;  %v970_v63 = vrot.slane %v3327_v61, 1  ;;  %v2591_v60 = vld [vmem:[%s3179_s26 + $0x48] sm:$0xff]  }
  0x30   : > { %v2686_v1 = vpack.i.bf16 %v1163_v27, %v1161_v54  ;;  %v2676_v2 = vpack.i.bf16 %v964_v62, %v962_v58  ;;  %v971_v29 = vrot.slane %v3320_v59, 1  ;;  %v973_v3 = vrot.slane %v857_v28, 1 }
  0x31   : > { %v2423_v4 = vadd.f32 -1.0, %v3032_v47  ;;  %v2424_v6 = vadd.f32 -1.0, %v3034_v53  ;;  %v2425_v8 = vadd.f32 -1.0, %v3036_v57  ;;  %v1169_v9 = vrot.slane %v3327_v61, 2  ;;  %v3038_v16 = vpop.eup %3037  ;;  %v291_v53 = vld [vmem:[%s3179_s26 + $0x54] sm:$0xff]  }
  0x32   : > { %2687 = vrot.lane.b32.xlu1 %v2686_v1, %s3125_s7  ;;  %2677 = vrot.lane.b32.xlu0 %v2676_v2, %s3126_s8  ;;  %v972_v12 = vsel %vm954_vm5, %v970_v63, %v971_v29  ;;  %v974_v13 = vsel %vm954_vm5, %v971_v29, %v973_v3  ;;  %v1170_v14 = vrot.slane %v3320_v59, 2  ;;  %v1172_v15 = vrot.slane %v857_v28, 2  ;;  %v290_v1 = vld [vmem:[%s3179_s26 + $0x50] sm:$0x1] }
  0x33   : > { %v2691_v17 = vpack.i.bf16 %v974_v13, %v972_v12  ;;  %v776_v18 = vsel %vm506_vm10, %v3233_v43, %v2423_v4  ;;  %v3349_v19 = vsel %vm507_vm11, %v3236_v46, %v2424_v6  ;;  %v778_v21 = vsel %vm508_vm12, %v3243_v50, %v2425_v8  ;;  %v3040_v22 = vpop.eup %3039 }
  0x34   : > { %v3356_v23 = vsel %vm828_vm2, %v776_v18, 0.0  ;;  %v854_v32 = vsel %vm839_vm3, %v778_v21, 0.0  ;;  %v966_v33 = vrot.slane %v3349_v19, 1  ;;  %v1171_v43 = vsel %vm1153_vm4, %v1169_v9, %v1170_v14 }
  0x35   : > { %v965_v34 = vrot.slane %v3356_v23, 1  ;;  %v968_v46 = vrot.slane %v854_v32, 1  ;;  %v1173_v37 = vsel %vm1153_vm4, %v1170_v14, %v1172_v15  ;;  %v1164_v50 = vrot.slane %v3356_v23, 2  ;;  %v3042_v15 = vpop.eup %3041 }
  0x36   : > { %2692 = vrot.lane.b32.xlu1 %v2691_v17, %s3126_s8  ;;  %v2701_v40 = vpack.i.bf16 %v1173_v37, %v1171_v43  ;;  %v1165_v41 = vrot.slane %v3349_v19, 2  ;;  %v1167_v24 = vrot.slane %v854_v32, 2  ;;  %v2432_v45 = vadd.f32 -1.0, %v3038_v16 }
  0x37   : > { %v967_v42 = vsel %vm954_vm5, %v965_v34, %v966_v33  ;;  %v969_v44 = vsel %vm954_vm5, %v966_v33, %v968_v46  ;;  %v2433_v47 = vadd.f32 -1.0, %v3040_v22  ;;  %v566_v56 = vmin.f32 %v3278_v20, 0.0 }
  0x38   : > { %v2681_v25 = vpack.i.bf16 %v969_v44, %v967_v42  ;;  %v1166_v49 = vsel %vm1153_vm4, %v1164_v50, %v1165_v41  ;;  %v1168_v51 = vsel %vm1153_vm4, %v1165_v41, %v1167_v24  ;;  %v785_v52 = vsel %vm515_vm13, %v3259_v5, %v2432_v45 }
  0x39   : > { %v3378_v36 = vsel %vm516_vm14, %v3262_v7, %v2433_v47  ;;  %v2696_v54 = vpack.i.bf16 %v1168_v51, %v1166_v49  ;;  %v3385_v55 = vsel %vm828_vm2, %v785_v52, 0.0  ;;  %v567_v5 = vmin.f32 %v3284_v30, 0.0  ;;  %v297_v52 = vld [vmem:[%s3179_s26 + $0x6c] sm:$0xff]  }
  0x3a   : > { %2682 = vrot.lane.b32.xlu0 %v2681_v25, %s3126_s8  ;;  %2702 = vrot.lane.b32.xlu1 %v2701_v40, %s3125_s7  ;;  %v980_v7 = vrot.slane %v3385_v55, 1  ;;  %v981_v57 = vrot.slane %v3378_v36, 1  ;;  %v568_v58 = vmin.f32 %v3287_v31, 0.0  ;;  %v632_v27 = vmul.f32 1.442695, %v566_v56 }
  0x3b   : > { %v634_v62 = vmul.f32 1.442695, %v567_v5  ;;  %v345_v28 = vunpack.c.l.bf16 %v291_v53  ;;  %v346_v63 = vunpack.c.h.bf16 %v291_v53  ;;  %v1179_v29 = vrot.slane %v3385_v55, 2  ;;  %v299_v56 = vld [vmem:[%s3179_s26 + $0x74] sm:$0x1] }
  0x3c   : > { %v636_v2 = vmul.f32 1.442695, %v568_v58  ;;  %v1180_v3 = vrot.slane %v3378_v36, 2  ;;  %v347_v4 = vunpack.c.l.bf16 %v293_v26  ;;  %3043 = vpow2.f32 %v632_v27 }
  0x3d   : > { %v407_v6 = vmul.f32 %v3184_v0, %v345_v28  ;;  %v408_v8 = vmul.f32 %v3184_v0, %v346_v63  ;;  %v2567_v9 = vunpack.c.l.bf16 %v2591_v60  ;;  %3045 = vpow2.f32 %v634_v62 }
  0x3e   : > { %2697 = vrot.lane.b32.xlu0 %v2696_v54, %s3125_s7  ;;  %v409_v12 = vmul.f32 %v3184_v0, %v347_v4  ;;  %v2568_v13 = vunpack.c.h.bf16 %v2591_v60  ;;  %v344_v14 = vunpack.c.l.bf16 %v290_v1  ;;  %3047 = vpow2.f32 %v636_v2 }
  0x3f   : > { %v3403_v16 = vadd.f32 %v3195_v11, %v407_v6  ;;  %v3406_v17 = vadd.f32 %v3195_v11, %v408_v8  ;;  %v404_v18 = vmul.f32 %v2567_v9, %v3184_v0  ;;  %v2434_v21 = vadd.f32 -1.0, %v3042_v15 }
  0x40   : > { %v3410_v22 = vadd.f32 %v3195_v11, %v409_v12  ;;  %v405_v32 = vmul.f32 %v2568_v13, %v3184_v0  ;;  %v406_v33 = vmul.f32 %v3184_v0, %v344_v14  ;;  %v982_v43 = vsel %vm954_vm5, %v980_v7, %v981_v57 }
  0x41   : > { %v575_v34 = vmin.f32 %v3403_v16, 0.0  ;;  %v576_v46 = vmin.f32 %v3406_v17, 0.0  ;;  %v787_v37 = vsel %vm517_vm15, %v3268_v10, %v2434_v21  ;;  %v1181_v50 = vsel %vm1153_vm4, %v1179_v29, %v1180_v3 }
  0x42   : > { %v577_v40 = vmin.f32 %v3410_v22, 0.0  ;;  %v3423_v41 = vadd.f32 %v3195_v11, %v404_v18  ;;  %v863_v24 = vsel %vm839_vm3, %v787_v37, 0.0  ;;  %v3428_v45 = vadd.f32 %v3195_v11, %v405_v32 }
  0x43   : > { %v650_v42 = vmul.f32 1.442695, %v575_v34  ;;  %v652_v44 = vmul.f32 1.442695, %v576_v46  ;;  %v983_v47 = vrot.slane %v863_v24, 1  ;;  %v1182_v25 = vrot.slane %v863_v24, 2 }
  0x44   : > { %v654_v10 = vmul.f32 1.442695, %v577_v40  ;;  %v3431_v49 = vadd.f32 %v3195_v11, %v406_v33  ;;  %vm512_vm0 = vcmp.gt.f32.partialorder %v3278_v20, 0.0  ;;  %vm513_vm1 = vcmp.gt.f32.partialorder %v3284_v30, 0.0  ;;  %v3482_v24 = vld [vmem:[%s3179_s26 + $0x60] sm:$0xff]  }
  0x45   : > { %3049 = vpow2.f32 %v650_v42  ;;  %v572_v51 = vmin.f32 %v3423_v41, 0.0  ;;  %v984_v53 = vsel %vm954_vm5, %v981_v57, %v983_v47  ;;  %vm514_vm6 = vcmp.gt.f32.partialorder %v3287_v31, 0.0 }
  0x46   : > { %v1183_v54 = vsel %vm1153_vm4, %v1180_v3, %v1182_v25  ;;  %3051 = vpow2.f32 %v652_v44  ;;  %v3044_v5 = vpop.eup %3043  ;;  %v2711_v26 = vpack.i.bf16 %v984_v53, %v982_v43  ;;  %vm521_vm7 = vcmp.gt.f32.partialorder %v3403_v16, 0.0 }
  0x47   : > { %v2721_v7 = vpack.i.bf16 %v1183_v54, %v1181_v50  ;;  %3053 = vpow2.f32 %v654_v10  ;;  %v573_v58 = vmin.f32 %v3428_v45, 0.0  ;;  %v3046_v60 = vpop.eup %3045  ;;  %v2429_v27 = vadd.f32 -1.0, %v3044_v5 }
  0x48   : > { %vm522_vm8 = vcmp.gt.f32.partialorder %v3406_v17, 0.0  ;;  %v574_v57 = vmin.f32 %v3431_v49, 0.0  ;;  %v644_v62 = vmul.f32 1.442695, %v572_v51  ;;  %v351_v28 = vunpack.c.l.bf16 %v297_v52  ;;  %v3048_v63 = vpop.eup %3047  ;;  %2712 = vrot.lane.b32.xlu1 %v2711_v26, %s3126_s8 }
  0x49   : > { %v2430_v1 = vadd.f32 -1.0, %v3046_v60  ;;  %vm523_vm9 = vcmp.gt.f32.partialorder %v3410_v22, 0.0  ;;  %v646_v2 = vmul.f32 1.442695, %v573_v58  ;;  %v352_v29 = vunpack.c.h.bf16 %v297_v52 }
  0x4a   : > { %v353_v3 = vunpack.c.l.bf16 %v299_v56  ;;  %v2431_v4 = vadd.f32 -1.0, %v3048_v63  ;;  %v782_v6 = vsel %vm512_vm0, %v3278_v20, %v2429_v27  ;;  %3055 = vpow2.f32 %v644_v62 }
  0x4b   : > { %v648_v8 = vmul.f32 1.442695, %v574_v57  ;;  %v3453_v9 = vsel %vm513_vm1, %v3284_v30, %v2430_v1  ;;  %v3457_v12 = vsel %vm828_vm2, %v782_v6, 0.0  ;;  %3057 = vpow2.f32 %v646_v2 }
  0x4c   : > { %v413_v13 = vmul.f32 %v3184_v0, %v351_v28  ;;  %v784_v14 = vsel %vm514_vm6, %v3287_v31, %v2431_v4  ;;  %v975_v20 = vrot.slane %v3457_v12, 1  ;;  %v976_v15 = vrot.slane %v3453_v9, 1  ;;  %2722 = vrot.lane.b32.xlu1 %v2721_v7, %s3125_s7 }
  0x4d   : > { %v1174_v18 = vrot.slane %v3457_v12, 2  ;;  %v860_v30 = vsel %vm839_vm3, %v784_v14, 0.0  ;;  %v1175_v21 = vrot.slane %v3453_v9, 2  ;;  %3059 = vpow2.f32 %v648_v8 }
  0x4e   : > { %v414_v32 = vmul.f32 %v3184_v0, %v352_v29  ;;  %v977_v33 = vsel %vm954_vm5, %v975_v20, %v976_v15  ;;  %v978_v31 = vrot.slane %v860_v30, 1  ;;  %v1177_v43 = vrot.slane %v860_v30, 2 }
  0x4f   : > { %v415_v34 = vmul.f32 %v3184_v0, %v353_v3  ;;  %v3050_v46 = vpop.eup %3049  ;;  %v1176_v37 = vsel %vm1153_vm4, %v1174_v18, %v1175_v21  ;;  %vm518_vm10 = vcmp.gt.f32.partialorder %v3423_v41, 0.0  ;;  %v3476_v50 = vadd.f32 %v3195_v11, %v413_v13 }
  0x50   : > { %v3479_v40 = vadd.f32 %v3195_v11, %v414_v32  ;;  %v3052_v42 = vpop.eup %3051  ;;  %v979_v44 = vsel %vm954_vm5, %v976_v15, %v978_v31  ;;  %v1178_v47 = vsel %vm1153_vm4, %v1175_v21, %v1177_v43  ;;  %v2438_v25 = vadd.f32 -1.0, %v3050_v46 }
  0x51   : > { %vm519_vm11 = vcmp.gt.f32.partialorder %v3428_v45, 0.0  ;;  %v3054_v10 = vpop.eup %3053  ;;  %v2706_v51 = vpack.i.bf16 %v979_v44, %v977_v33  ;;  %v2439_v52 = vadd.f32 -1.0, %v3052_v42  ;;  %vm520_vm12 = vcmp.gt.f32.partialorder %v3431_v49, 0.0  ;;  %v296_v44 = vld [vmem:[%s3179_s26 + $0x68] sm:$0x1] }
  0x52   : > { %v3489_v53 = vadd.f32 %v3195_v11, %v415_v34  ;;  %v2716_v54 = vpack.i.bf16 %v1178_v47, %v1176_v37  ;;  %v2440_v56 = vadd.f32 -1.0, %v3054_v10  ;;  %v791_v5 = vsel %vm521_vm7, %v3403_v16, %v2438_v25 }
  0x53   : > { %v2571_v26 = vunpack.c.l.bf16 %v3482_v24  ;;  %2707 = vrot.lane.b32.xlu0 %v2706_v51, %s3126_s8  ;;  %v3499_v7 = vsel %vm522_vm8, %v3406_v17, %v2439_v52  ;;  %v3503_v58 = vsel %vm828_vm2, %v791_v5, 0.0  ;;  %v581_v60 = vmin.f32 %v3476_v50, 0.0  ;;  %v303_v51 = vld [vmem:[%s3179_s26 + $0x84] sm:$0xff]  }
  0x54   : > { %v582_v27 = vmin.f32 %v3479_v40, 0.0  ;;  %v3056_v57 = vpop.eup %3055  ;;  %v793_v16 = vsel %vm523_vm9, %v3410_v22, %v2440_v56  ;;  %v990_v62 = vrot.slane %v3503_v58, 1  ;;  %v991_v28 = vrot.slane %v3499_v7, 1 }
  0x55   : > { %v1189_v17 = vrot.slane %v3503_v58, 2  ;;  %v3058_v63 = vpop.eup %3057  ;;  %v869_v1 = vsel %vm839_vm3, %v793_v16, 0.0  ;;  %v2435_v2 = vadd.f32 -1.0, %v3056_v57  ;;  %v1190_v29 = vrot.slane %v3499_v7, 2 }
  0x56   : > { %v583_v3 = vmin.f32 %v3489_v53, 0.0  ;;  %v992_v4 = vsel %vm954_vm5, %v990_v62, %v991_v28  ;;  %v993_v6 = vrot.slane %v869_v1, 1  ;;  %v2436_v8 = vadd.f32 -1.0, %v3058_v63 }
  0x57   : > { %v1192_v22 = vrot.slane %v869_v1, 2  ;;  %v3060_v13 = vpop.eup %3059  ;;  %2717 = vrot.lane.b32.xlu0 %v2716_v54, %s3125_s7  ;;  %v788_v14 = vsel %vm518_vm10, %v3423_v41, %v2435_v2  ;;  %v1191_v20 = vsel %vm1153_vm4, %v1189_v17, %v1190_v29  ;;  %v662_v15 = vmul.f32 1.442695, %v581_v60 }
  0x58   : > { %v664_v18 = vmul.f32 1.442695, %v582_v27  ;;  %v994_v30 = vsel %vm954_vm5, %v991_v28, %v993_v6  ;;  %v2437_v21 = vadd.f32 -1.0, %v3060_v13  ;;  %v3527_v32 = vsel %vm519_vm11, %v3428_v45, %v2436_v8  ;;  %v305_v27 = vld [vmem:[%s3179_s26 + $0x8c] sm:$0x1] }
  0x59   : > { %v3531_v33 = vsel %vm828_vm2, %v788_v14, 0.0  ;;  %v2731_v31 = vpack.i.bf16 %v994_v30, %v992_v4  ;;  %v986_v43 = vrot.slane %v3527_v32, 1  ;;  %v1193_v34 = vsel %vm1153_vm4, %v1190_v29, %v1192_v22  ;;  %v2593_v14 = vld [vmem:[%s3179_s26 + $0x78] sm:$0xff]  }
  0x5a   : > { %v985_v41 = vrot.slane %v3531_v33, 1  ;;  %v790_v46 = vsel %vm520_vm12, %v3431_v49, %v2437_v21  ;;  %v2741_v37 = vpack.i.bf16 %v1193_v34, %v1191_v20  ;;  %v1184_v45 = vrot.slane %v3531_v33, 2 }
  0x5b   : > { %v1185_v42 = vrot.slane %v3527_v32, 2  ;;  %2732 = vrot.lane.b32.xlu1 %v2731_v31, %s3126_s8  ;;  %v866_v47 = vsel %vm839_vm3, %v790_v46, 0.0  ;;  %3061 = vpow2.f32 %v662_v15  ;;  %v666_v10 = vmul.f32 1.442695, %v583_v3 }
  0x5c   : > { %v987_v25 = vsel %vm954_vm5, %v985_v41, %v986_v43  ;;  %v988_v52 = vrot.slane %v866_v47, 1  ;;  %v1187_v54 = vrot.slane %v866_v47, 2  ;;  %3063 = vpow2.f32 %v664_v18  ;;  %v302_v18 = vld [vmem:[%s3179_s26 + $0x80] sm:$0x1] }
  0x5d   : > { %v1186_v49 = vsel %vm1153_vm4, %v1184_v45, %v1185_v42  ;;  %3065 = vpow2.f32 %v666_v10  ;;  %v2572_v56 = vunpack.c.h.bf16 %v3482_v24  ;;  %v350_v5 = vunpack.c.l.bf16 %v296_v44 }
  0x5e   : > { %v410_v60 = vmul.f32 %v2571_v26, %v3184_v0  ;;  %v989_v57 = vsel %vm954_vm5, %v986_v43, %v988_v52  ;;  %v1188_v16 = vsel %vm1153_vm4, %v1185_v42, %v1187_v54  ;;  %v357_v62 = vunpack.c.l.bf16 %v303_v51 }
  0x5f   : > { %v358_v28 = vunpack.c.h.bf16 %v303_v51  ;;  %v2726_v17 = vpack.i.bf16 %v989_v57, %v987_v25  ;;  %2742 = vrot.lane.b32.xlu1 %v2741_v37, %s3125_s7  ;;  %v411_v63 = vmul.f32 %v2572_v56, %v3184_v0  ;;  %v412_v1 = vmul.f32 %v3184_v0, %v350_v5 }
  0x60   : > { %v3557_v24 = vadd.f32 %v3195_v11, %v410_v60  ;;  %v359_v26 = vunpack.c.l.bf16 %v305_v27  ;;  %v419_v2 = vmul.f32 %v3184_v0, %v357_v62  ;;  %v2736_v3 = vpack.i.bf16 %v1188_v16, %v1186_v49 }
  0x61   : > { %v420_v29 = vmul.f32 %v3184_v0, %v358_v28  ;;  %2727 = vrot.lane.b32.xlu0 %v2726_v17, %s3126_s8  ;;  %v3563_v4 = vadd.f32 %v3195_v11, %v411_v63  ;;  %v3566_v6 = vadd.f32 %v3195_v11, %v412_v1  ;;  %vm527_vm13 = vcmp.gt.f32.partialorder %v3476_v50, 0.0  ;;  %v309_v1 = vld [vmem:[%s3179_s26 + $0x9c] sm:$0xff]  }
  0x62   : > { %v578_v8 = vmin.f32 %v3557_v24, 0.0  ;;  %v421_v22 = vmul.f32 %v3184_v0, %v359_v26  ;;  %v3571_v13 = vadd.f32 %v3195_v11, %v419_v2  ;;  %vm528_vm14 = vcmp.gt.f32.partialorder %v3479_v40, 0.0 }
  0x63   : > { %v579_v20 = vmin.f32 %v3563_v4, 0.0  ;;  %v580_v15 = vmin.f32 %v3566_v6, 0.0  ;;  %vm529_vm15 = vcmp.gt.f32.partialorder %v3489_v53, 0.0  ;;  %v3581_v21 = vadd.f32 %v3195_v11, %v420_v29 }
  0x64   : > { %v656_v30 = vmul.f32 1.442695, %v578_v8  ;;  %v3584_v31 = vadd.f32 %v3195_v11, %v421_v22  ;;  %v587_v46 = vmin.f32 %v3571_v13, 0.0  ;;  %v2575_v37 = vunpack.c.l.bf16 %v2593_v14 }
  0x65   : > { %v3062_v41 = vpop.eup %3061  ;;  %2737 = vrot.lane.b32.xlu0 %v2736_v3, %s3125_s7  ;;  %v658_v43 = vmul.f32 1.442695, %v579_v20  ;;  %v660_v34 = vmul.f32 1.442695, %v580_v15  ;;  %v2576_v44 = vunpack.c.h.bf16 %v2593_v14  ;;  %v356_v47 = vunpack.c.l.bf16 %v302_v18  ;;  %v3626_v15 = vld [vmem:[%s3179_s26 + $0xa4] sm:$0x1] }
  0x66   : > { %v3064_v45 = vpop.eup %3063  ;;  %v2444_v42 = vadd.f32 -1.0, %v3062_v41  ;;  %3067 = vpow2.f32 %v656_v30  ;;  %v588_v51 = vmin.f32 %v3581_v21, 0.0  ;;  %v589_v52 = vmin.f32 %v3584_v31, 0.0 }
  0x67   : > { %v3066_v25 = vpop.eup %3065  ;;  %v2445_v10 = vadd.f32 -1.0, %v3064_v45  ;;  %3069 = vpow2.f32 %v658_v43  ;;  %vm524_vm0 = vcmp.gt.f32.partialorder %v3557_v24, 0.0  ;;  %v674_v56 = vmul.f32 1.442695, %v587_v46 }
  0x68   : > { %v2446_v49 = vadd.f32 -1.0, %v3066_v25  ;;  %v797_v54 = vsel %vm527_vm13, %v3476_v50, %v2444_v42  ;;  %3071 = vpow2.f32 %v660_v34  ;;  %vm525_vm1 = vcmp.gt.f32.partialorder %v3563_v4, 0.0 }
  0x69   : > { %v3597_v5 = vsel %vm528_vm14, %v3479_v40, %v2445_v10  ;;  %v3601_v60 = vsel %vm828_vm2, %v797_v54, 0.0  ;;  %v676_v27 = vmul.f32 1.442695, %v588_v51  ;;  %v678_v57 = vmul.f32 1.442695, %v589_v52 }
  0x6a   : > { %v799_v50 = vsel %vm529_vm15, %v3489_v53, %v2446_v49  ;;  %v1000_v16 = vrot.slane %v3601_v60, 1  ;;  %v1001_v62 = vrot.slane %v3597_v5, 1  ;;  %vm526_vm6 = vcmp.gt.f32.partialorder %v3566_v6, 0.0 }
  0x6b   : > { %v1199_v40 = vrot.slane %v3601_v60, 2  ;;  %v875_v28 = vsel %vm839_vm3, %v799_v50, 0.0  ;;  %v1200_v17 = vrot.slane %v3597_v5, 2  ;;  %3073 = vpow2.f32 %v674_v56 }
  0x6c   : > { %v416_v63 = vmul.f32 %v2575_v37, %v3184_v0  ;;  %v1002_v53 = vsel %vm954_vm5, %v1000_v16, %v1001_v62  ;;  %v1003_v26 = vrot.slane %v875_v28, 1  ;;  %v1202_v2 = vrot.slane %v875_v28, 2 }
  0x6d   : > { %3075 = vpow2.f32 %v676_v27  ;;  %v1201_v29 = vsel %vm1153_vm4, %v1199_v40, %v1200_v17  ;;  %v417_v3 = vmul.f32 %v2576_v44, %v3184_v0  ;;  %v418_v8 = vmul.f32 %v3184_v0, %v356_v47 }
  0x6e   : > { %3077 = vpow2.f32 %v678_v57  ;;  %v1004_v22 = vsel %vm954_vm5, %v1001_v62, %v1003_v26  ;;  %v1203_v14 = vsel %vm1153_vm4, %v1200_v17, %v1202_v2  ;;  %v3623_v20 = vadd.f32 %v3195_v11, %v416_v63 }
  0x6f   : > { %v363_v18 = vunpack.c.l.bf16 %v309_v1  ;;  %v2751_v30 = vpack.i.bf16 %v1004_v22, %v1002_v53  ;;  %vm533_vm7 = vcmp.gt.f32.partialorder %v3571_v13, 0.0  ;;  %v3630_v41 = vadd.f32 %v3195_v11, %v417_v3 }
  0x70   : > { %v3633_v43 = vadd.f32 %v3195_v11, %v418_v8  ;;  %v3068_v34 = vpop.eup %3067  ;;  %vm534_vm8 = vcmp.gt.f32.partialorder %v3581_v21, 0.0  ;;  %vm535_vm9 = vcmp.gt.f32.partialorder %v3584_v31, 0.0  ;;  %v584_v46 = vmin.f32 %v3623_v20, 0.0 }
  0x71   : > { %v364_v37 = vunpack.c.h.bf16 %v309_v1  ;;  %v3070_v45 = vpop.eup %3069  ;;  %2752 = vrot.lane.b32.xlu1 %v2751_v30, %s3126_s8  ;;  %v2441_v42 = vadd.f32 -1.0, %v3068_v34  ;;  %v2761_v44 = vpack.i.bf16 %v1203_v14, %v1201_v29  ;;  %v585_v47 = vmin.f32 %v3630_v41, 0.0 }
  0x72   : > { %v365_v25 = vunpack.c.l.bf16 %v3626_v15  ;;  %v3072_v10 = vpop.eup %3071  ;;  %v2442_v51 = vadd.f32 -1.0, %v3070_v45  ;;  %v586_v52 = vmin.f32 %v3633_v43, 0.0  ;;  %v668_v49 = vmul.f32 1.442695, %v584_v46 }
  0x73   : > { %v425_v54 = vmul.f32 %v3184_v0, %v363_v18  ;;  %v2443_v56 = vadd.f32 -1.0, %v3072_v10  ;;  %v794_v27 = vsel %vm524_vm0, %v3557_v24, %v2441_v42  ;;  %v670_v57 = vmul.f32 1.442695, %v585_v47 }
  0x74   : > { %v426_v50 = vmul.f32 %v3184_v0, %v364_v37  ;;  %v3650_v16 = vsel %vm525_vm1, %v3563_v4, %v2442_v51  ;;  %v3654_v62 = vsel %vm828_vm2, %v794_v27, 0.0  ;;  %3079 = vpow2.f32 %v668_v49 }
  0x75   : > { %v672_v40 = vmul.f32 1.442695, %v586_v52  ;;  %v3074_v28 = vpop.eup %3073  ;;  %v796_v17 = vsel %vm526_vm6, %v3566_v6, %v2443_v56  ;;  %v995_v24 = vrot.slane %v3654_v62, 1  ;;  %v996_v63 = vrot.slane %v3650_v16, 1  ;;  %2762 = vrot.lane.b32.xlu1 %v2761_v44, %s3125_s7  ;;  %v2594_v52 = vld [vmem:[%s3179_s26 + $0x90] sm:$0xff]  }
  0x76   : > { %v1194_v4 = vrot.slane %v3654_v62, 2  ;;  %v872_v53 = vsel %vm839_vm3, %v796_v17, 0.0  ;;  %v1195_v26 = vrot.slane %v3650_v16, 2  ;;  %v2450_v2 = vadd.f32 -1.0, %v3074_v28 }
  0x77   : > { %v3076_v1 = vpop.eup %3075  ;;  %3081 = vpow2.f32 %v670_v57  ;;  %v997_v3 = vsel %vm954_vm5, %v995_v24, %v996_v63  ;;  %v998_v6 = vrot.slane %v872_v53, 1  ;;  %v1197_v8 = vrot.slane %v872_v53, 2 }
  0x78   : > { %v3078_v29 = vpop.eup %3077  ;;  %v2451_v22 = vadd.f32 -1.0, %v3076_v1  ;;  %v1196_v14 = vsel %vm1153_vm4, %v1194_v4, %v1195_v26  ;;  %v803_v18 = vsel %vm533_vm7, %v3571_v13, %v2450_v2  ;;  %3083 = vpow2.f32 %v672_v40 }
  0x79   : > { %v2452_v15 = vadd.f32 -1.0, %v3078_v29  ;;  %v999_v30 = vsel %vm954_vm5, %v996_v63, %v998_v6  ;;  %v1198_v34 = vsel %vm1153_vm4, %v1195_v26, %v1197_v8  ;;  %v3680_v37 = vsel %vm828_vm2, %v803_v18, 0.0 }
  0x7a   : > { %v3676_v46 = vsel %vm534_vm8, %v3581_v21, %v2451_v22  ;;  %v2746_v45 = vpack.i.bf16 %v999_v30, %v997_v3  ;;  %v2756_v42 = vpack.i.bf16 %v1198_v34, %v1196_v14  ;;  %v1010_v44 = vrot.slane %v3680_v37, 1  ;;  %v3726_v30 = vld [vmem:[%s4472_s1] ss:$0 sm:$0xff] }
  0x7b   : > { %v805_v13 = vsel %vm535_vm9, %v3584_v31, %v2452_v15  ;;  %v1011_v10 = vrot.slane %v3676_v46, 1  ;;  %v1209_v21 = vrot.slane %v3680_v37, 2  ;;  %v1210_v51 = vrot.slane %v3676_v46, 2 }
  0x7c   : > { %v881_v47 = vsel %vm839_vm3, %v805_v13, 0.0  ;;  %2747 = vrot.lane.b32.xlu0 %v2746_v45, %s3126_s8  ;;  %v427_v27 = vmul.f32 %v3184_v0, %v365_v25  ;;  %v3695_v31 = vadd.f32 %v3195_v11, %v425_v54  ;;  %vm530_vm10 = vcmp.gt.f32.partialorder %v3623_v20, 0.0  ;;  %v308_v25 = vld [vmem:[%s3179_s26 + $0x98] sm:$0x1] }
  0x7d   : > { %v1013_v49 = vrot.slane %v881_v47, 1  ;;  %v1212_v56 = vrot.slane %v881_v47, 2  ;;  %v1012_v57 = vsel %vm954_vm5, %v1010_v44, %v1011_v10  ;;  %v1211_v40 = vsel %vm1153_vm4, %v1209_v21, %v1210_v51 }
  0x7e   : > { %v3701_v28 = vadd.f32 %v3195_v11, %v426_v50  ;;  %v3080_v17 = vpop.eup %3079  ;;  %v3706_v4 = vadd.f32 %v3195_v11, %v427_v27  ;;  %v2579_v0 = vunpack.c.l.bf16 %v2594_v52  ;;  %vm531_vm11 = vcmp.gt.f32.partialorder %v3630_v41, 0.0 }
  0x7f   : > { %v1014_v24 = vsel %vm954_vm5, %v1011_v10, %v1013_v49  ;;  %v1213_v63 = vsel %vm1153_vm4, %v1210_v51, %v1212_v56  ;;  %vm532_vm12 = vcmp.gt.f32.partialorder %v3633_v43, 0.0  ;;  %v2447_v1 = vadd.f32 -1.0, %v3080_v17  ;;  %v317_v49 = vld [vmem:[%s3179_s26 + $0xbc] sm:$0x1] }
  0x80   : > { %v2771_v54 = vpack.i.bf16 %v1014_v24, %v1012_v57  ;;  %2757 = vrot.lane.b32.xlu0 %v2756_v42, %s3125_s7  ;;  %v2781_v50 = vpack.i.bf16 %v1213_v63, %v1211_v40  ;;  %v593_v26 = vmin.f32 %v3695_v31, 0.0  ;;  %v594_v2 = vmin.f32 %v3701_v28, 0.0 }
  0x81   : > { %v3082_v53 = vpop.eup %3081  ;;  %v595_v29 = vmin.f32 %v3706_v4, 0.0  ;;  %v800_v3 = vsel %vm530_vm10, %v3623_v20, %v2447_v1  ;;  %v2580_v6 = vunpack.c.h.bf16 %v2594_v52  ;;  %v362_v8 = vunpack.c.l.bf16 %v308_v25  ;;  %v315_v52 = vld [vmem:[%s3179_s26 + $0xb4] sm:$0xff]  }
  0x82   : > { %2772 = vrot.lane.b32.xlu1 %v2771_v54, %s3126_s8  ;;  %v2448_v11 = vadd.f32 -1.0, %v3082_v53  ;;  %v3084_v22 = vpop.eup %3083  ;;  %v3721_v14 = vsel %vm828_vm2, %v800_v3, 0.0  ;;  %v686_v15 = vmul.f32 1.442695, %v593_v26  ;;  %v688_v18 = vmul.f32 1.442695, %v594_v2 }
  0x83   : > { %v422_v34 = vmul.f32 %v3726_v30, %v2579_v0  ;;  %v2449_v45 = vadd.f32 -1.0, %v3084_v22  ;;  %v1005_v42 = vrot.slane %v3721_v14, 1  ;;  %v1204_v13 = vrot.slane %v3721_v14, 2  ;;  %v2595_v26 = vld [vmem:[%s3179_s26 + $0xa8] sm:$0xff]  }
  0x84   : > { %v3732_v20 = vsel %vm531_vm11, %v3630_v41, %v2448_v11  ;;  %3085 = vpow2.f32 %v686_v15  ;;  %v690_v10 = vmul.f32 1.442695, %v595_v29  ;;  %v423_v41 = vmul.f32 %v3726_v30, %v2580_v6 }
  0x85   : > { %v1006_v44 = vrot.slane %v3732_v20, 1  ;;  %v1205_v47 = vrot.slane %v3732_v20, 2  ;;  %v802_v21 = vsel %vm532_vm12, %v3633_v43, %v2449_v45  ;;  %3087 = vpow2.f32 %v688_v18  ;;  %v3752_v43 = vld [vmem:[%s4473_s2] ss:$0 sm:$0xff]  ;;  %v314_v45 = vld [vmem:[%s3179_s26 + $0xb0] sm:$0x1] }
  0x86   : > { %2782 = vrot.lane.b32.xlu1 %v2781_v50, %s3125_s7  ;;  %v424_v51 = vmul.f32 %v3726_v30, %v362_v8  ;;  %v878_v56 = vsel %vm839_vm3, %v802_v21, 0.0  ;;  %3089 = vpow2.f32 %v690_v10  ;;  %v3755_v17 = vadd.f32 %v3752_v43, %v422_v34 }
  0x87   : > { %v1007_v27 = vsel %vm954_vm5, %v1005_v42, %v1006_v44  ;;  %v1008_v57 = vrot.slane %v878_v56, 1  ;;  %v1207_v40 = vrot.slane %v878_v56, 2  ;;  %v3758_v24 = vadd.f32 %v3752_v43, %v423_v41 }
  0x88   : > { %v3761_v63 = vadd.f32 %v3752_v43, %v424_v51  ;;  %v369_v0 = vunpack.c.l.bf16 %v315_v52  ;;  %v370_v25 = vunpack.c.h.bf16 %v315_v52  ;;  %v371_v54 = vunpack.c.l.bf16 %v317_v49 }
  0x89   : > { %v1009_v1 = vsel %vm954_vm5, %v1006_v44, %v1008_v57  ;;  %v1206_v53 = vsel %vm1153_vm4, %v1204_v13, %v1205_v47  ;;  %v1208_v50 = vsel %vm1153_vm4, %v1205_v47, %v1207_v40  ;;  %vm539_vm13 = vcmp.gt.f32.partialorder %v3695_v31, 0.0 }
  0x8a   : > { %v2766_v2 = vpack.i.bf16 %v1009_v1, %v1007_v27  ;;  %v590_v29 = vmin.f32 %v3755_v17, 0.0  ;;  %v591_v11 = vmin.f32 %v3758_v24, 0.0  ;;  %v592_v3 = vmin.f32 %v3761_v63, 0.0 }
  0x8b   : > { %v431_v6 = vmul.f32 %v3726_v30, %v369_v0  ;;  %v432_v8 = vmul.f32 %v3726_v30, %v370_v25  ;;  %v2776_v22 = vpack.i.bf16 %v1208_v50, %v1206_v53  ;;  %v433_v18 = vmul.f32 %v3726_v30, %v371_v54 }
  0x8c   : > { %2767 = vrot.lane.b32.xlu0 %v2766_v2, %s3126_s8  ;;  %v680_v15 = vmul.f32 1.442695, %v590_v29  ;;  %v2583_v34 = vunpack.c.l.bf16 %v2595_v26  ;;  %v682_v42 = vmul.f32 1.442695, %v591_v11  ;;  %v684_v13 = vmul.f32 1.442695, %v592_v3 }
  0x8d   : > { %v3777_v44 = vadd.f32 %v3752_v43, %v431_v6  ;;  %v3780_v47 = vadd.f32 %v3752_v43, %v432_v8  ;;  %vm540_vm14 = vcmp.gt.f32.partialorder %v3701_v28, 0.0  ;;  %v3784_v21 = vadd.f32 %v3752_v43, %v433_v18 }
  0x8e   : > { %v3086_v10 = vpop.eup %3085  ;;  %3091 = vpow2.f32 %v680_v15  ;;  %v2584_v41 = vunpack.c.h.bf16 %v2595_v26  ;;  %vm541_vm15 = vcmp.gt.f32.partialorder %v3706_v4, 0.0  ;;  %v368_v49 = vunpack.c.l.bf16 %v314_v45 }
  0x8f   : > { %v3088_v51 = vpop.eup %3087  ;;  %v2456_v52 = vadd.f32 -1.0, %v3086_v10  ;;  %3093 = vpow2.f32 %v682_v42  ;;  %v599_v57 = vmin.f32 %v3777_v44, 0.0  ;;  %v428_v40 = vmul.f32 %v3726_v30, %v2583_v34 }
  0x90   : > { %v3090_v56 = vpop.eup %3089  ;;  %2777 = vrot.lane.b32.xlu0 %v2776_v22, %s3125_s7  ;;  %v2457_v27 = vadd.f32 -1.0, %v3088_v51  ;;  %3095 = vpow2.f32 %v684_v13  ;;  %v600_v54 = vmin.f32 %v3780_v47, 0.0  ;;  %v601_v1 = vmin.f32 %v3784_v21, 0.0 }
  0x91   : > { %v2458_v0 = vadd.f32 -1.0, %v3090_v56  ;;  %v809_v25 = vsel %vm539_vm13, %v3695_v31, %v2456_v52  ;;  %v698_v26 = vmul.f32 1.442695, %v599_v57  ;;  %v429_v2 = vmul.f32 %v3726_v30, %v2584_v41 }
  0x92   : > { %v3798_v53 = vsel %vm540_vm14, %v3701_v28, %v2457_v27  ;;  %v3802_v50 = vsel %vm828_vm2, %v809_v25, 0.0  ;;  %v700_v8 = vmul.f32 1.442695, %v600_v54  ;;  %v702_v34 = vmul.f32 1.442695, %v601_v1 }
  0x93   : > { %v811_v31 = vsel %vm541_vm15, %v3706_v4, %v2458_v0  ;;  %v1020_v29 = vrot.slane %v3802_v50, 1  ;;  %v1021_v11 = vrot.slane %v3798_v53, 1  ;;  %v1219_v3 = vrot.slane %v3802_v50, 2 }
  0x94   : > { %v887_v28 = vsel %vm839_vm3, %v811_v31, 0.0  ;;  %v1220_v6 = vrot.slane %v3798_v53, 2  ;;  %3097 = vpow2.f32 %v698_v26  ;;  %v430_v45 = vmul.f32 %v3726_v30, %v368_v49 }
  0x95   : > { %v1022_v22 = vsel %vm954_vm5, %v1020_v29, %v1021_v11  ;;  %v1023_v15 = vrot.slane %v887_v28, 1  ;;  %v1222_v18 = vrot.slane %v887_v28, 2  ;;  %3099 = vpow2.f32 %v700_v8 }
  0x96   : > { %v1221_v4 = vsel %vm1153_vm4, %v1219_v3, %v1220_v6  ;;  %v3818_v42 = vadd.f32 %v3752_v43, %v428_v40  ;;  %3101 = vpow2.f32 %v702_v34  ;;  %v3823_v41 = vadd.f32 %v3752_v43, %v429_v2 }
  0x97   : > { %v1024_v13 = vsel %vm954_vm5, %v1021_v11, %v1023_v15  ;;  %v1223_v10 = vsel %vm1153_vm4, %v1220_v6, %v1222_v18  ;;  %vm536_vm0 = vcmp.gt.f32.partialorder %v3755_v17, 0.0  ;;  %vm537_vm1 = vcmp.gt.f32.partialorder %v3758_v24, 0.0 }
  0x98   : > { %v3092_v51 = vpop.eup %3091  ;;  %v2791_v52 = vpack.i.bf16 %v1024_v13, %v1022_v22  ;;  %v3828_v56 = vadd.f32 %v3752_v43, %v430_v45  ;;  %vm538_vm6 = vcmp.gt.f32.partialorder %v3761_v63, 0.0  ;;  %v596_v57 = vmin.f32 %v3818_v42, 0.0  ;;  %v2596_v22 = vld [vmem:[%s3179_s26 + $0xc0] sm:$0xff]  }
  0x99   : > { %v3094_v49 = vpop.eup %3093  ;;  %v2453_v27 = vadd.f32 -1.0, %v3092_v51  ;;  %v597_v40 = vmin.f32 %v3823_v41, 0.0  ;;  %v2801_v54 = vpack.i.bf16 %v1223_v10, %v1221_v4  ;;  %vm545_vm7 = vcmp.gt.f32.partialorder %v3777_v44, 0.0 }
  0x9a   : > { %v3096_v0 = vpop.eup %3095  ;;  %2792 = vrot.lane.b32.xlu1 %v2791_v52, %s3126_s8  ;;  %v2454_v25 = vadd.f32 -1.0, %v3094_v49  ;;  %v598_v1 = vmin.f32 %v3828_v56, 0.0  ;;  %vm546_vm8 = vcmp.gt.f32.partialorder %v3780_v47, 0.0  ;;  %v692_v31 = vmul.f32 1.442695, %v596_v57 }
  0x9b   : > { %v2455_v26 = vadd.f32 -1.0, %v3096_v0  ;;  %v806_v2 = vsel %vm536_vm0, %v3755_v17, %v2453_v27  ;;  %vm547_vm9 = vcmp.gt.f32.partialorder %v3784_v21, 0.0  ;;  %v694_v3 = vmul.f32 1.442695, %v597_v40 }
  0x9c   : > { %v3841_v29 = vsel %vm537_vm1, %v3758_v24, %v2454_v25  ;;  %v3845_v11 = vsel %vm828_vm2, %v806_v2, 0.0  ;;  %3103 = vpow2.f32 %v692_v31  ;;  %v696_v34 = vmul.f32 1.442695, %v598_v1 }
  0x9d   : > { %v808_v28 = vsel %vm538_vm6, %v3761_v63, %v2455_v26  ;;  %v1015_v17 = vrot.slane %v3845_v11, 1  ;;  %v1016_v6 = vrot.slane %v3841_v29, 1  ;;  %v1214_v8 = vrot.slane %v3845_v11, 2 }
  0x9e   : > { %v3098_v24 = vpop.eup %3097  ;;  %v884_v15 = vsel %vm839_vm3, %v808_v28, 0.0  ;;  %2802 = vrot.lane.b32.xlu1 %v2801_v54, %s3125_s7  ;;  %v1215_v18 = vrot.slane %v3841_v29, 2  ;;  %3105 = vpow2.f32 %v694_v3  ;;  %v2587_v52 = vunpack.c.l.bf16 %v2596_v22  ;;  %v320_v54 = vld [vmem:[%s3179_s26 + $0xc8] sm:$0x1]  ;;  %s4330_s26 = scalar_lea.vmem %s4475_s4, %s2524_s23 }
  0x9f   : > { %v1017_v63 = vsel %vm954_vm5, %v1015_v17, %v1016_v6  ;;  %v1018_v4 = vrot.slane %v884_v15, 1  ;;  %v1217_v45 = vrot.slane %v884_v15, 2  ;;  %v2462_v13 = vadd.f32 -1.0, %v3098_v24  ;;  %v3100_v10 = vpop.eup %3099 }
  0xa0   : > { %v1216_v51 = vsel %vm1153_vm4, %v1214_v8, %v1215_v18  ;;  %v2588_v49 = vunpack.c.h.bf16 %v2596_v22  ;;  %v3102_v27 = vpop.eup %3101  ;;  %v2463_v0 = vadd.f32 -1.0, %v3100_v10  ;;  %3107 = vpow2.f32 %v696_v34 }
  0xa1   : > { %v1019_v57 = vsel %vm954_vm5, %v1016_v6, %v1018_v4  ;;  %v1218_v40 = vsel %vm1153_vm4, %v1215_v18, %v1217_v45  ;;  %v815_v25 = vsel %vm545_vm7, %v3777_v44, %v2462_v13  ;;  %v2464_v2 = vadd.f32 -1.0, %v3102_v27 }
  0xa2   : > { %v2786_v1 = vpack.i.bf16 %v1019_v57, %v1017_v63  ;;  %v2796_v26 = vpack.i.bf16 %v1218_v40, %v1216_v51  ;;  %v3869_v31 = vsel %vm828_vm2, %v815_v25, 0.0  ;;  %v3874_v3 = vsel %vm546_vm8, %v3780_v47, %v2463_v0 }
  0xa3   : > { %v1030_v28 = vrot.slane %v3869_v31, 1  ;;  %v1229_v17 = vrot.slane %v3869_v31, 2  ;;  %v817_v44 = vsel %vm547_vm9, %v3784_v21, %v2464_v2  ;;  %v1031_v6 = vrot.slane %v3874_v3, 1 }
  0xa4   : > { %2787 = vrot.lane.b32.xlu0 %v2786_v1, %s3126_s8  ;;  %v1230_v8 = vrot.slane %v3874_v3, 2  ;;  %v374_v22 = vunpack.c.l.bf16 %v320_v54  ;;  %v893_v47 = vsel %vm839_vm3, %v817_v44, 0.0  ;;  %v434_v24 = vmul.f32 %v3726_v30, %v2587_v52 }
  0xa5   : > { %v435_v15 = vmul.f32 %v3726_v30, %v2588_v49  ;;  %v1032_v18 = vsel %vm954_vm5, %v1030_v28, %v1031_v6  ;;  %v1033_v34 = vrot.slane %v893_v47, 1  ;;  %v1232_v63 = vrot.slane %v893_v47, 2 }
  0xa6   : > { %v436_v4 = vmul.f32 %v3726_v30, %v374_v22  ;;  %v3891_v21 = vadd.f32 %v3752_v43, %v434_v24  ;;  %v3104_v13 = vpop.eup %3103  ;;  %vm542_vm10 = vcmp.gt.f32.partialorder %v3818_v42, 0.0  ;;  %v1231_v51 = vsel %vm1153_vm4, %v1229_v17, %v1230_v8 }
  0xa7   : > { %v3894_v45 = vadd.f32 %v3752_v43, %v435_v15  ;;  %v1034_v10 = vsel %vm954_vm5, %v1031_v6, %v1033_v34  ;;  %v1233_v52 = vsel %vm1153_vm4, %v1230_v8, %v1232_v63  ;;  %v2459_v27 = vadd.f32 -1.0, %v3104_v13 }
  0xa8   : > { %2797 = vrot.lane.b32.xlu0 %v2796_v26, %s3125_s7  ;;  %v2811_v49 = vpack.i.bf16 %v1034_v10, %v1032_v18  ;;  %v496_v30 = vadd.f32 %v3752_v43, %v436_v4  ;;  %v3106_v57 = vpop.eup %3105  ;;  %vm543_vm11 = vcmp.gt.f32.partialorder %v3823_v41, 0.0  ;;  %v3127_v40 = vmov 0.0   ;;  %v3926_v4 = vpop.permute.xlu1 %2687 }
  0xa9   : > { %v955_v0 = vrot.slane %v3127_v40, 1  ;;  %v602_v25 = vmin.f32 %v3891_v21, 0.0  ;;  %v603_v54 = vmin.f32 %v3894_v45, 0.0  ;;  %v2460_v1 = vadd.f32 -1.0, %v3106_v57 }
  0xaa   : > { %2812 = vrot.lane.b32.xlu1 %v2811_v49, %s3126_s8  ;;  %v812_v26 = vsel %vm542_vm10, %v3818_v42, %v2459_v27  ;;  %v2821_v2 = vpack.i.bf16 %v1233_v52, %v1231_v51  ;;  %v604_v28 = vmin.f32 %v496_v30, 0.0  ;;  %v3108_v6 = vpop.eup %3107  ;;  %vm544_vm12 = vcmp.gt.f32.partialorder %v3828_v56, 0.0  ;;  %v3929_v52 = vpop.permute.xlu0 %2677 }
  0xab   : > { %v3910_v43 = vsel %vm828_vm2, %v812_v26, 0.0  ;;  %v704_v17 = vmul.f32 1.442695, %v602_v25  ;;  %v706_v44 = vmul.f32 1.442695, %v603_v54  ;;  %v3914_v8 = vsel %vm543_vm11, %v3823_v41, %v2460_v1 }
  0xac   : > { %v708_v22 = vmul.f32 1.442695, %v604_v28  ;;  %v2461_v47 = vadd.f32 -1.0, %v3108_v6  ;;  %v1025_v24 = vrot.slane %v3910_v43, 1  ;;  %v1026_v42 = vrot.slane %v3914_v8, 1  ;;  %v3937_v25 = vpop.permute.xlu1 %2692 }
  0xad   : > { %3109 = vpow2.f32 %v704_v17  ;;  %v3919_v15 = vpack.i.bf16 %v955_v0, %v955_v0  ;;  %v1224_v34 = vrot.slane %v3910_v43, 2  ;;  %v1225_v63 = vrot.slane %v3914_v8, 2 }
  0xae   : > { %2822 = vrot.lane.b32.xlu1 %v2821_v2, %s3125_s7  ;;  %3111 = vpow2.f32 %v706_v44  ;;  %v814_v18 = vsel %vm544_vm12, %v3828_v56, %v2461_v47  ;;  %v1027_v13 = vsel %vm954_vm5, %v1025_v24, %v1026_v42  ;;  %vm548_vm13 = vcmp.gt.f32.partialorder %v3891_v21, 0.0  ;;  %v2683_v1 = vpop.permute.xlu0 %2682 }
  0xaf   : > { %3113 = vpow2.f32 %v708_v22  ;;  %v890_v41 = vsel %vm839_vm3, %v814_v18, 0.0  ;;  %v1226_v49 = vsel %vm1153_vm4, %v1224_v34, %v1225_v63  ;;  %vm549_vm14 = vcmp.gt.f32.partialorder %v3894_v45, 0.0 }
  0xb0   : > { %v1028_v10 = vrot.slane %v890_v41, 1  ;;  %v1227_v51 = vrot.slane %v890_v41, 2  ;;  %vm550_vm15 = vcmp.gt.f32.partialorder %v496_v30, 0.0  ;;  %vm1685_vm0 = vcmask 195584  }
  0xb1   : > { %vm1754_vm1 = vcmask 293888   ;;  %vm2096_vm6 = vcmask 27648   ;;  %vm2198_vm7 = vcmask 24576  }
  0xb2   : > { %2832 = vrot.lane.b32.xlu1 %v3919_v15, %s3126_s8  ;;  %v1029_v56 = vsel %vm954_vm5, %v1026_v42, %v1028_v10  ;;  %v1228_v27 = vsel %vm1153_vm4, %v1225_v63, %v1227_v51  ;;  %v3953_v63 = vpop.permute.xlu1 %2702  ;;  %v1154_v51 = vrot.slane %v3127_v40, 2  ;;  %v3016_v40 = vld [vmem:[%s4474_s3] sm:$0xff]  }
  0xb3   : > { %v2806_v57 = vpack.i.bf16 %v1029_v56, %v1027_v13  ;;  %v2816_v0 = vpack.i.bf16 %v1228_v27, %v1226_v49  ;;  %v2685_v56 = vunpack.i.h.bf16 %v2683_v1  ;;  %v2684_v49 = vunpack.i.l.bf16 %v2683_v1  ;;  %2616 = vmatprep.subr.bf16.mxu0 %v3016_v40  ;;  %2654 = vmatprep.subr.bf16.mxu1 %v3016_v40 }
  0xb4   : > { %v2851_v1 = vpack.i.bf16 %v1154_v51, %v1154_v51  ;;  %2617 = vmatpush3.bf16.msra.mxu0 %v3016_v40  ;;  %2657 = vmatpush3.bf16.msra.mxu1 %v3016_v40 }
  0xb5   : > { %2807 = vrot.lane.b32.xlu0 %v2806_v57, %s3126_s8 }
  0xb7   : > { %v3110_v54 = vpop.eup %3109 }
  0xb8   : > { %v3112_v26 = vpop.eup %3111  ;;  %v2465_v2 = vadd.f32 -1.0, %v3110_v54 }
  0xb9   : > { %v3114_v28 = vpop.eup %3113  ;;  %v2466_v17 = vadd.f32 -1.0, %v3112_v26  ;;  %2817 = vrot.lane.b32.xlu0 %v2816_v0, %s3125_s7 }
  0xba   : > { %v2467_v44 = vadd.f32 -1.0, %v3114_v28  ;;  %v818_v6 = vsel %vm548_vm13, %v3891_v21, %v2465_v2  ;;  %v2680_v2 = vunpack.i.h.bf16 %v3929_v52  ;;  %v2679_v28 = vunpack.i.l.bf16 %v3929_v52 }
  0xbb   : > { %v3944_v22 = vsel %vm549_vm14, %v3894_v45, %v2466_v17  ;;  %v3948_v47 = vsel %vm828_vm2, %v818_v6, 0.0  ;;  %v2698_v45 = vpop.permute.xlu0 %2697  ;;  %vm1352_vm2 = vcmask 31744   ;;  %v3965_v17 = vpop.permute.xlu1 %2712  ;;  %v2690_v52 = vunpack.i.h.bf16 %v3926_v4 }
  0xbc   : > { %v820_v24 = vsel %vm550_vm15, %v496_v30, %v2467_v44  ;;  %v1035_v42 = vrot.slane %v3948_v47, 1  ;;  %v1036_v18 = vrot.slane %v3944_v22, 1  ;;  %v1234_v34 = vrot.slane %v3948_v47, 2 }
  0xbd   : > { %v896_v41 = vsel %vm839_vm3, %v820_v24, 0.0  ;;  %v1235_v21 = vrot.slane %v3944_v22, 2  ;;  %v2700_v0 = vunpack.i.h.bf16 %v2698_v45  ;;  %v2699_v48 = vunpack.i.l.bf16 %v2698_v45 }
  0xbe   : > { %v1037_v13 = vsel %vm954_vm5, %v1035_v42, %v1036_v18  ;;  %v1038_v35 = vrot.slane %v896_v41, 1  ;;  %v1237_v10 = vrot.slane %v896_v41, 2  ;;  %v1358_v44 = vsel %vm1352_vm2, %v3349_v19, %v2685_v56 }
  0xbf   : > { %v1236_v30 = vsel %vm1153_vm4, %v1234_v34, %v1235_v21  ;;  %v1357_v6 = vsel %vm1352_vm2, %v3356_v23, %v2684_v49  ;;  %vm1389_vm3 = vcmask 64512   ;;  %v2689_v24 = vunpack.i.l.bf16 %v3926_v4 }
  0xc0   : > { %v1039_v27 = vsel %vm954_vm5, %v1036_v18, %v1038_v35  ;;  %v1238_v57 = vsel %vm1153_vm4, %v1235_v21, %v1237_v10  ;;  %v3979_v18 = vsel %vm1389_vm3, %v1357_v6, %v2699_v48  ;;  %v3982_v34 = vsel %vm1389_vm3, %v1358_v44, %v2700_v0 }
  0xc1   : > { %v2826_v54 = vpack.i.bf16 %v1039_v27, %v1037_v13  ;;  %v2841_v26 = vpack.i.bf16 %v1238_v57, %v1236_v30  ;;  %v1356_v19 = vsel %vm1352_vm2, %v3297_v38, %v2680_v2  ;;  %v1355_v23 = vsel %vm1352_vm2, %v3301_v39, %v2679_v28  ;;  %v3017_v13 = vld [vmem:[%s4474_s3 + $0x8] sm:$0xff]  }
  0xc2   : > { %v2695_v41 = vunpack.i.h.bf16 %v3937_v25  ;;  %v2694_v21 = vunpack.i.l.bf16 %v3937_v25  ;;  %v2705_v4 = vunpack.i.h.bf16 %v3953_v63  ;;  %v2704_v45 = vunpack.i.l.bf16 %v3953_v63  ;;  %v2723_v63 = vpop.permute.xlu1 %2722  ;;  %2618 = vmatprep.subr.bf16.mxu0 %v3017_v13  ;;  %2655 = vmatprep.subr.bf16.mxu1 %v3017_v13 }
  0xc3   : > { %2827 = vrot.lane.b32.xlu0 %v2826_v54, %s3126_s8  ;;  %2842 = vrot.lane.b32.xlu1 %v2841_v26, %s3125_s7  ;;  %v2861_v25 = vpack.i.bf16 %v3982_v34, %v3979_v18  ;;  %v4001_v35 = vsel %vm1389_vm3, %v1355_v23, %v2689_v24  ;;  %v4004_v10 = vsel %vm1389_vm3, %v1356_v19, %v2690_v52  ;;  %v3018_v26 = vld [vmem:[%s4474_s3 + $0x10] ss:$0 sps:$4 sm:$0x33]   ;;  %vm1803_vm4 = vcmask 1041408  }
  0xc4   : > { %v1359_v51 = vsel %vm1352_vm2, %v3327_v61, %v2694_v21  ;;  %2619 = vmatpush3.bf16.msra.mxu0 %v3017_v13  ;;  %2658 = vmatpush3.bf16.msra.mxu1 %v3017_v13  ;;  %v2856_v0 = vpack.i.bf16 %v4004_v10, %v4001_v35  ;;  %v2715_v2 = vunpack.i.h.bf16 %v3965_v17  ;;  %v2725_v28 = vunpack.i.h.bf16 %v2723_v63 }
  0xc5   : > { %v2708_v42 = vpop.permute.xlu0 %2707  ;;  %v4011_v27 = vsel %vm1389_vm3, %v1359_v51, %v2704_v45  ;;  %v2724_v40 = vunpack.i.l.bf16 %v2723_v63  ;;  %2660 = vmatprep.subr.msk.bf16.mxu0 %vm1803_vm4, %v3018_v26  ;;  %v1805_v44 = vsel %vm1803_vm4, %v3018_v26, 0  ;;  %2661 = vmatprep.subr.msk.bf16.mxu1 %vm1803_vm4, %v3018_v26  ;;  %vm1652_vm5 = vcmask 97280  }
  0xc6   : > { %v2710_v38 = vunpack.i.h.bf16 %v2708_v42  ;;  %v2709_v39 = vunpack.i.l.bf16 %v2708_v42 }
  0xc7   : > { %2837 = vrot.lane.b32.xlu0 %v3919_v15, %s3126_s8  ;;  %2852 = vrot.lane.b32.xlu1 %v2851_v1, %s3125_s7  ;;  %v1360_v15 = vsel %vm1352_vm2, %v3320_v59, %v2695_v41  ;;  %s268_s8 = scalar_lea.vmem %s4477_s6, %s4479_s22 }
  0xc8   : > { %v4014_v57 = vsel %vm1389_vm3, %v1360_v15, %v2705_v4  ;;  %v1362_v59 = vsel %vm1352_vm2, %v3453_v9, %v2710_v38  ;;  %v1361_v61 = vsel %vm1352_vm2, %v3457_v12, %v2709_v39  ;;  %v2714_v9 = vunpack.i.l.bf16 %v3965_v17  ;;  %2621 = vmatpush3.bf16.msra.mxu0 %v1805_v44  ;;  %2659 = vmatpush3.bf16.msra.mxu1 %v1805_v44 }
  0xc9   : > { %v2718_v30 = vpop.permute.xlu0 %2717  ;;  %v2871_v12 = vpack.i.bf16 %v4014_v57, %v4011_v27  ;;  %v1364_v17 = vsel %vm1352_vm2, %v3378_v36, %v2715_v2 }
  0xca   : > { %v2720_v56 = vunpack.i.h.bf16 %v2718_v30  ;;  %v2719_v49 = vunpack.i.l.bf16 %v2718_v30  ;;  %v1363_v52 = vsel %vm1352_vm2, %v3385_v55, %v2714_v9  ;;  %v4049_v19 = vsel %vm1389_vm3, %v1364_v17, %v2725_v28 }
  0xcb   : > { %2847 = vrot.lane.b32.xlu0 %v2851_v1, %s3125_s7  ;;  %2862 = vrot.lane.b32.xlu1 %v2861_v25, %s3128_s17  ;;  %v4046_v42 = vsel %vm1389_vm3, %v1363_v52, %v2724_v40 }
  0xcc   : > { %v4025_v48 = vsel %vm1389_vm3, %v1361_v61, %v2719_v49  ;;  %v4028_v54 = vsel %vm1389_vm3, %v1362_v59, %v2720_v56  ;;  %v2891_v36 = vpack.i.bf16 %v4049_v19, %v4046_v42 }
  0xcd   : > { %v2733_v1 = vpop.permute.xlu1 %2732  ;;  %v2881_v6 = vpack.i.bf16 %v4028_v54, %v4025_v48 }
  0xce   : > { %v2735_v4 = vunpack.i.h.bf16 %v2733_v1  ;;  %v2734_v45 = vunpack.i.l.bf16 %v2733_v1 }
  0xcf   : > { %2857 = vrot.lane.b32.xlu0 %v2856_v0, %s3128_s17  ;;  %2872 = vrot.lane.b32.xlu1 %v2871_v12, %s3129_s20 }
  0xd0   : > { %v1368_v56 = vsel %vm1352_vm2, %v3499_v7, %v2735_v4  ;;  %v1367_v49 = vsel %vm1352_vm2, %v3503_v58, %v2734_v45 }
  0xd1   : > { %v2743_v21 = vpop.permute.xlu1 %2742 }
  0xd2   : > { %v2745_v13 = vunpack.i.h.bf16 %v2743_v21  ;;  %v2744_v38 = vunpack.i.l.bf16 %v2743_v21 }
  0xd3   : > { %v2728_v24 = vpop.permute.xlu0 %2727  ;;  %2867 = vrot.lane.b32.xlu0 %v2861_v25, %s3129_s20  ;;  %2882 = vrot.lane.b32.xlu1 %v2881_v6, %s3128_s17 }
  0xd4   : > { %v2730_v23 = vunpack.i.h.bf16 %v2728_v24  ;;  %v2729_v41 = vunpack.i.l.bf16 %v2728_v24 }
  0xd6   : > { %v1366_v25 = vsel %vm1352_vm2, %v3527_v32, %v2730_v23  ;;  %v1365_v30 = vsel %vm1352_vm2, %v3531_v33, %v2729_v41  ;;  %v4075_v32 = vsel %vm1389_vm3, %v1367_v49, %v2744_v38  ;;  %v4078_v33 = vsel %vm1389_vm3, %v1368_v56, %v2745_v13 }
  0xd7   : > { %v2738_v55 = vpop.permute.xlu0 %2737  ;;  %2877 = vrot.lane.b32.xlu0 %v2871_v12, %s3128_s17  ;;  %2892 = vrot.lane.b32.xlu1 %v2891_v36, %s3129_s20  ;;  %v2911_v59 = vpack.i.bf16 %v4078_v33, %v4075_v32 }
  0xd8   : > { %v2740_v39 = vunpack.i.h.bf16 %v2738_v55  ;;  %v2739_v63 = vunpack.i.l.bf16 %v2738_v55 }
  0xda   : > { %v4062_v15 = vsel %vm1389_vm3, %v1365_v30, %v2739_v63  ;;  %v4065_v51 = vsel %vm1389_vm3, %v1366_v25, %v2740_v39 }
  0xdb   : > { %v2901_v0 = vpack.i.bf16 %v4065_v51, %v4062_v15  ;;  %2887 = vrot.lane.b32.xlu0 %v2881_v6, %s3129_s20 }
  0xdd   : > { %2902 = vrot.lane.b32.xlu1 %v2901_v0, %s3128_s17 }
  0xdf   : > { %2897 = vrot.lane.b32.xlu0 %v2891_v36, %s3128_s17 }
  0xe1   : > { %2912 = vrot.lane.b32.xlu1 %v2911_v59, %s3129_s20 }
  0xe3   : > { %2907 = vrot.lane.b32.xlu0 %v2901_v0, %s3129_s20  ;;  %v2753_v7 = vpop.permute.xlu1 %2752 }
  0xe4   : > { %v2755_v9 = vunpack.i.h.bf16 %v2753_v7  ;;  %v2754_v12 = vunpack.i.l.bf16 %v2753_v7 }
  0xe6   : > { %v1372_v41 = vsel %vm1352_vm2, %v3597_v5, %v2755_v9  ;;  %v1371_v21 = vsel %vm1352_vm2, %v3601_v60, %v2754_v12 }
  0xe7   : > { %2917 = vrot.lane.b32.xlu0 %v2911_v59, %s3128_s17  ;;  %v2763_v2 = vpop.permute.xlu1 %2762 }
  0xe8   : > { %v2765_v40 = vunpack.i.h.bf16 %v2763_v2  ;;  %v2764_v1 = vunpack.i.l.bf16 %v2763_v2 }
  0xee   : > { %v2748_v58 = vpop.permute.xlu0 %2747 }
  0xef   : > { %v2750_v61 = vunpack.i.h.bf16 %v2748_v58  ;;  %v2749_v26 = vunpack.i.l.bf16 %v2748_v58 }
  0xf1   : > { %v1370_v17 = vsel %vm1352_vm2, %v3650_v16, %v2750_v61  ;;  %v1369_v52 = vsel %vm1352_vm2, %v3654_v62, %v2749_v26  ;;  %v4104_v16 = vsel %vm1389_vm3, %v1371_v21, %v2764_v1  ;;  %v4107_v62 = vsel %vm1389_vm3, %v1372_v41, %v2765_v40 }
  0xf2   : > { %v2758_v28 = vpop.permute.xlu0 %2757  ;;  %v2931_v5 = vpack.i.bf16 %v4107_v62, %v4104_v16 }
  0xf3   : > { %v2760_v44 = vunpack.i.h.bf16 %v2758_v28  ;;  %v2759_v6 = vunpack.i.l.bf16 %v2758_v28 }
  0xf4   : > { %v2773_v4 = vpop.permute.xlu1 %2772 }
  0xf5   : > { %v4092_v24 = vsel %vm1389_vm3, %v1369_v52, %v2759_v6  ;;  %v4095_v23 = vsel %vm1389_vm3, %v1370_v17, %v2760_v44  ;;  %v2775_v38 = vunpack.i.h.bf16 %v2773_v4  ;;  %v2774_v39 = vunpack.i.l.bf16 %v2773_v4 }
  0xf6   : > { %v2921_v36 = vpack.i.bf16 %v4095_v23, %v4092_v24 }
  0xf7   : > { %v1376_v61 = vsel %vm1352_vm2, %v3676_v46, %v2775_v38  ;;  %v1375_v26 = vsel %vm1352_vm2, %v3680_v37, %v2774_v39 }
  0xf8   : > { %2922 = vrot.lane.b32.xlu1 %v2921_v36, %s3128_s17  ;;  %2927 = vrot.lane.b32.xlu0 %v2921_v36, %s3129_s20  ;;  %v2783_v13 = vpop.permute.xlu1 %2782 }
  0xf9   : > { %v2785_v25 = vunpack.i.h.bf16 %v2783_v13  ;;  %v2784_v30 = vunpack.i.l.bf16 %v2783_v13 }
  0xfc   : > { %2932 = vrot.lane.b32.xlu1 %v2931_v5, %s3129_s20  ;;  %2937 = vrot.lane.b32.xlu0 %v2931_v5, %s3128_s17 }
  0xfe   : > { %v2768_v60 = vpop.permute.xlu0 %2767 }
  0xff   : > { %v2770_v45 = vunpack.i.h.bf16 %v2768_v60  ;;  %v2769_v55 = vunpack.i.l.bf16 %v2768_v60 }
 0x101   : > { %v1374_v0 = vsel %vm1352_vm2, %v3732_v20, %v2770_v45  ;;  %v1373_v59 = vsel %vm1352_vm2, %v3721_v14, %v2769_v55  ;;  %v4132_v20 = vsel %vm1389_vm3, %v1375_v26, %v2784_v30  ;;  %v4135_v14 = vsel %vm1389_vm3, %v1376_v61, %v2785_v25 }
 0x102   : > { %v2778_v63 = vpop.permute.xlu0 %2777  ;;  %v2951_v9 = vpack.i.bf16 %v4135_v14, %v4132_v20 }
 0x103   : > { %v2780_v56 = vunpack.i.h.bf16 %v2778_v63  ;;  %v2779_v49 = vunpack.i.l.bf16 %v2778_v63 }
 0x105   : > { %v4120_v7 = vsel %vm1389_vm3, %v1373_v59, %v2779_v49  ;;  %v4123_v58 = vsel %vm1389_vm3, %v1374_v0, %v2780_v56 }
 0x106   : > { %v2941_v2 = vpack.i.bf16 %v4123_v58, %v4120_v7 }
 0x108   : > { %2942 = vrot.lane.b32.xlu1 %v2941_v2, %s3128_s17  ;;  %2947 = vrot.lane.b32.xlu0 %v2941_v2, %s3129_s20 }
 0x10c   : > { %2952 = vrot.lane.b32.xlu1 %v2951_v9, %s3129_s20  ;;  %2957 = vrot.lane.b32.xlu0 %v2951_v9, %s3128_s17  ;;  %v2793_v46 = vpop.permute.xlu1 %2792 }
 0x10d   : > { %v2795_v1 = vunpack.i.h.bf16 %v2793_v46  ;;  %v2794_v44 = vunpack.i.l.bf16 %v2793_v46 }
 0x10f   : > { %v1380_v45 = vsel %vm1352_vm2, %v3798_v53, %v2795_v1  ;;  %v1379_v55 = vsel %vm1352_vm2, %v3802_v50, %v2794_v44 }
 0x110   : > { %v2803_v40 = vpop.permute.xlu1 %2802 }
 0x111   : > { %v2805_v17 = vunpack.i.h.bf16 %v2803_v40  ;;  %v2804_v52 = vunpack.i.l.bf16 %v2803_v40 }
 0x116   : > { %v2788_v37 = vpop.permute.xlu0 %2787 }
 0x117   : > { %v2790_v12 = vunpack.i.h.bf16 %v2788_v37  ;;  %v2789_v28 = vunpack.i.l.bf16 %v2788_v37 }
 0x119   : > { %v1378_v36 = vsel %vm1352_vm2, %v3841_v29, %v2790_v12  ;;  %v1377_v4 = vsel %vm1352_vm2, %v3845_v11, %v2789_v28  ;;  %v4160_v29 = vsel %vm1389_vm3, %v1379_v55, %v2804_v52  ;;  %v4163_v11 = vsel %vm1389_vm3, %v1380_v45, %v2805_v17 }
 0x11a   : > { %v2798_v6 = vpop.permute.xlu0 %2797  ;;  %v2971_v38 = vpack.i.bf16 %v4163_v11, %v4160_v29 }
 0x11b   : > { %v2800_v41 = vunpack.i.h.bf16 %v2798_v6  ;;  %v2799_v21 = vunpack.i.l.bf16 %v2798_v6 }
 0x11c   : > { %v2813_v53 = vpop.permute.xlu1 %2812 }
 0x11d   : > { %v4148_v5 = vsel %vm1389_vm3, %v1377_v4, %v2799_v21  ;;  %v4151_v60 = vsel %vm1389_vm3, %v1378_v36, %v2800_v41  ;;  %v2815_v30 = vunpack.i.h.bf16 %v2813_v53  ;;  %v2814_v56 = vunpack.i.l.bf16 %v2813_v53 }
 0x11e   : > { %v2961_v13 = vpack.i.bf16 %v4151_v60, %v4148_v5 }
 0x11f   : > { %v1384_v28 = vsel %vm1352_vm2, %v3874_v3, %v2815_v30  ;;  %v1383_v40 = vsel %vm1352_vm2, %v3869_v31, %v2814_v56 }
 0x120   : > { %2962 = vrot.lane.b32.xlu1 %v2961_v13, %s3128_s17  ;;  %2967 = vrot.lane.b32.xlu0 %v2961_v13, %s3129_s20  ;;  %v2823_v39 = vpop.permute.xlu1 %2822 }
 0x121   : > { %v2825_v0 = vunpack.i.h.bf16 %v2823_v39  ;;  %v2824_v59 = vunpack.i.l.bf16 %v2823_v39 }
 0x124   : > { %2972 = vrot.lane.b32.xlu1 %v2971_v38, %s3129_s20  ;;  %2977 = vrot.lane.b32.xlu0 %v2971_v38, %s3128_s17  ;;  %v2833_v46 = vpop.permute.xlu1 %2832 }
 0x127   : > { %v2808_v50 = vpop.permute.xlu0 %2807 }
 0x128   : > { %v2810_v63 = vunpack.i.h.bf16 %v2808_v50  ;;  %v2809_v25 = vunpack.i.l.bf16 %v2808_v50 }
 0x12a   : > { %v1382_v2 = vsel %vm1352_vm2, %v3914_v8, %v2810_v63  ;;  %v1381_v9 = vsel %vm1352_vm2, %v3910_v43, %v2809_v25  ;;  %v4188_v8 = vsel %vm1389_vm3, %v1383_v40, %v2824_v59  ;;  %v4191_v43 = vsel %vm1389_vm3, %v1384_v28, %v2825_v0 }
 0x12b   : > { %v2818_v49 = vpop.permute.xlu0 %2817  ;;  %v2991_v44 = vpack.i.bf16 %v4191_v43, %v4188_v8 }
 0x12c   : > { %v2820_v61 = vunpack.i.h.bf16 %v2818_v49  ;;  %v2819_v26 = vunpack.i.l.bf16 %v2818_v49 }
 0x12e   : > { %v4176_v37 = vsel %vm1389_vm3, %v1381_v9, %v2819_v26  ;;  %v4179_v12 = vsel %vm1389_vm3, %v1382_v2, %v2820_v61  ;;  %v2835_v26 = vunpack.i.h.bf16 %v2833_v46  ;;  %v2834_v2 = vunpack.i.l.bf16 %v2833_v46 }
 0x12f   : > { %v2981_v1 = vpack.i.bf16 %v4179_v12, %v4176_v37 }
 0x130   : > { %v1354_v46 = vsel %vm1352_vm2, 0.0, %v2835_v26 }
 0x131   : > { %2982 = vrot.lane.b32.xlu1 %v2981_v1, %s3128_s17  ;;  %2987 = vrot.lane.b32.xlu0 %v2981_v1, %s3129_s20 }
 0x135   : > { %v2828_v3 = vpop.permute.xlu0 %2827  ;;  %v2843_v6 = vpop.permute.xlu1 %2842  ;;  %2992 = vrot.lane.b32.xlu1 %v2991_v44, %s3129_s20  ;;  %2997 = vrot.lane.b32.xlu0 %v2991_v44, %s3128_s17 }
 0x136   : > { %v2830_v17 = vunpack.i.h.bf16 %v2828_v3  ;;  %v2829_v31 = vunpack.i.l.bf16 %v2828_v3  ;;  %v2845_v52 = vunpack.i.h.bf16 %v2843_v6  ;;  %v2844_v41 = vunpack.i.l.bf16 %v2843_v6 }
 0x138   : > { %v1386_v21 = vsel %vm1352_vm2, %v3944_v22, %v2830_v17  ;;  %v1385_v36 = vsel %vm1352_vm2, %v3948_v47, %v2829_v31 }
 0x139   : > { %v2838_v4 = vpop.permute.xlu0 %2837  ;;  %v2853_v45 = vpop.permute.xlu1 %2852  ;;  %v1422_v55 = vsel %vm1389_vm3, %v1385_v36, %v2844_v41  ;;  %v1423_v13 = vsel %vm1389_vm3, %v1386_v21, %v2845_v52  ;;  %v1353_v41 = vsel %vm1352_vm2, 0.0, %v2834_v2 }
 0x13a   : > { %v2840_v38 = vunpack.i.h.bf16 %v2838_v4  ;;  %v2839_v53 = vunpack.i.l.bf16 %v2838_v4  ;;  %v2855_v50 = vunpack.i.h.bf16 %v2853_v45  ;;  %v2854_v39 = vunpack.i.l.bf16 %v2853_v45 }
 0x13b   : > { %v3001_v63 = vpack.i.bf16 %v1423_v13, %v1422_v55 }
 0x13c   : > { %v1388_v25 = vsel %vm1352_vm2, 0.0, %v2840_v38  ;;  %v1387_v30 = vsel %vm1352_vm2, 0.0, %v2839_v53 }
 0x13d   : > { %v2848_v56 = vpop.permute.xlu0 %2847  ;;  %3002 = vrot.lane.b32.xlu1 %v3001_v63, %s3128_s17  ;;  %3007 = vrot.lane.b32.xlu0 %v3001_v63, %s3129_s20  ;;  %v1424_v22 = vsel %vm1389_vm3, %v1387_v30, %v2854_v39  ;;  %v1425_v47 = vsel %vm1389_vm3, %v1388_v25, %v2855_v50  ;;  %v2863_v49 = vpop.permute.xlu1 %2862 }
 0x13e   : > { %v3011_v0 = vpack.i.bf16 %v1425_v47, %v1424_v22  ;;  %v2865_v59 = vunpack.i.h.bf16 %v2863_v49  ;;  %v2864_v61 = vunpack.i.l.bf16 %v2863_v49  ;;  %v2850_v40 = vunpack.i.h.bf16 %v2848_v56 }
 0x13f   : > { %v2849_v1 = vunpack.i.l.bf16 %v2848_v56 }
 0x140   : > { %v1655_v31 = vsel %vm1652_vm5, %v4001_v35, %v2864_v61  ;;  %v1656_v52 = vsel %vm1652_vm5, %v4004_v10, %v2865_v59  ;;  %v1391_v55 = vsel %vm1389_vm3, %v1354_v46, %v2850_v40 }
 0x141   : > { %3012 = vrot.lane.b32.xlu1 %v3011_v0, %s3129_s20  ;;  %v2858_v9 = vpop.permute.xlu0 %2857  ;;  %v2873_v28 = vpop.permute.xlu1 %2872  ;;  %v1390_v13 = vsel %vm1389_vm3, %v1353_v41, %v2849_v1 }
 0x142   : > { %v2875_v44 = vunpack.i.h.bf16 %v2873_v28  ;;  %v2874_v3 = vunpack.i.l.bf16 %v2873_v28  ;;  %v2860_v6 = vunpack.i.h.bf16 %v2858_v9  ;;  %v2859_v17 = vunpack.i.l.bf16 %v2858_v9 }
 0x144   : > { %v1688_v36 = vsel %vm1685_vm0, %v1655_v31, %v2874_v3  ;;  %v1689_v4 = vsel %vm1685_vm0, %v1656_v52, %v2875_v44  ;;  %v1653_v53 = vsel %vm1652_vm5, %v1390_v13, %v2859_v17  ;;  %v1654_v10 = vsel %vm1652_vm5, %v1391_v55, %v2860_v6 }
 0x145   : > { %v2868_v21 = vpop.permute.xlu0 %2867  ;;  %v2883_v45 = vpop.permute.xlu1 %2882  ;;  %v1719_v63 = vpack.c.bf16 %v1689_v4, %v1688_v36 }
 0x146   : > { %v2870_v38 = vunpack.i.h.bf16 %v2868_v21  ;;  %v2869_v35 = vunpack.i.l.bf16 %v2868_v21  ;;  %v2885_v50 = vunpack.i.h.bf16 %v2883_v45  ;;  %v2884_v39 = vunpack.i.l.bf16 %v2883_v45 }
 0x148   : > { %v1686_v25 = vsel %vm1685_vm0, %v1653_v53, %v2869_v35  ;;  %v1687_v30 = vsel %vm1685_vm0, %v1654_v10, %v2870_v38  ;;  %v1660_v26 = vsel %vm1652_vm5, %v4014_v57, %v2885_v50  ;;  %v1659_v2 = vsel %vm1652_vm5, %v4011_v27, %v2884_v39 }
 0x149   : > { %v2878_v56 = vpop.permute.xlu0 %2877  ;;  %v1718_v22 = vpack.c.bf16 %v1687_v30, %v1686_v25  ;;  %v2893_v47 = vpop.permute.xlu1 %2892 }
 0x14a   : > { %v2895_v49 = vunpack.i.h.bf16 %v2893_v47  ;;  %v2894_v0 = vunpack.i.l.bf16 %v2893_v47  ;;  %v2880_v59 = vunpack.i.h.bf16 %v2878_v56  ;;  %v2879_v61 = vunpack.i.l.bf16 %v2878_v56 }
 0x14b   : > { %2622 = vmatprep.mubr.msk.bf16.mxu0 %vm1754_vm1, %v1718_v22 }
 0x14c   : > { %2623 = vmatmul.mubr.msk.bf16.vlgmr.msra.gmra.mrb[0].mxu0 %vm1754_vm1, %v1719_v63  ;;  %v1692_v9 = vsel %vm1685_vm0, %v1659_v2, %v2894_v0  ;;  %v1693_v28 = vsel %vm1685_vm0, %v1660_v26, %v2895_v49  ;;  %v1658_v6 = vsel %vm1652_vm5, %v3982_v34, %v2880_v59  ;;  %v1657_v17 = vsel %vm1652_vm5, %v3979_v18, %v2879_v61 }
 0x14d   : > { %v2888_v40 = vpop.permute.xlu0 %2887  ;;  %v1721_v57 = vpack.c.bf16 %v1693_v28, %v1692_v9 }
 0x14e   : > { %v2890_v1 = vunpack.i.h.bf16 %v2888_v40  ;;  %v2889_v44 = vunpack.i.l.bf16 %v2888_v40 }
 0x14f   : > { %v2903_v3 = vpop.permute.xlu1 %2902 }
 0x150   : > { %v1690_v31 = vsel %vm1685_vm0, %v1657_v17, %v2889_v44  ;;  %v1691_v27 = vsel %vm1685_vm0, %v1658_v6, %v2890_v1  ;;  %v2905_v52 = vunpack.i.h.bf16 %v2903_v3  ;;  %v2904_v46 = vunpack.i.l.bf16 %v2903_v3 }
 0x151   : > { %v1720_v41 = vpack.c.bf16 %v1691_v27, %v1690_v31  ;;  %v2898_v21 = vpop.permute.xlu0 %2897 }
 0x152   : > { %v2900_v4 = vunpack.i.h.bf16 %v2898_v21  ;;  %v2899_v45 = vunpack.i.l.bf16 %v2898_v21  ;;  %v1664_v34 = vsel %vm1652_vm5, %v4049_v19, %v2905_v52  ;;  %v1663_v18 = vsel %vm1652_vm5, %v4046_v42, %v2904_v46 }
 0x153   : > { %v2913_v36 = vpop.permute.xlu1 %2912  ;;  %2626 = vmatprep.mubr.msk.bf16.mxu0 %vm1754_vm1, %v1720_v41 }
 0x154   : > { %v2915_v55 = vunpack.i.h.bf16 %v2913_v36  ;;  %v2914_v13 = vunpack.i.l.bf16 %v2913_v36  ;;  %2627 = vmatmul.mubr.msk.bf16.gmra.mrb[4].mxu0 %vm1754_vm1, %v1721_v57  ;;  %v1662_v39 = vsel %vm1652_vm5, %v4028_v54, %v2900_v4  ;;  %v1661_v63 = vsel %vm1652_vm5, %v4025_v48, %v2899_v45 }
 0x155   : > { %v2908_v38 = vpop.permute.xlu0 %2907 }
 0x156   : > { %v1696_v35 = vsel %vm1685_vm0, %v1663_v18, %v2914_v13  ;;  %v1697_v53 = vsel %vm1685_vm0, %v1664_v34, %v2915_v55  ;;  %v2910_v10 = vunpack.i.h.bf16 %v2908_v38  ;;  %v2909_v50 = vunpack.i.l.bf16 %v2908_v38 }
 0x157   : > { %v1723_v42 = vpack.c.bf16 %v1697_v53, %v1696_v35 }
 0x158   : > { %v1694_v19 = vsel %vm1685_vm0, %v1661_v63, %v2909_v50  ;;  %v1695_v25 = vsel %vm1685_vm0, %v1662_v39, %v2910_v10 }
 0x159   : > { %v1722_v30 = vpack.c.bf16 %v1695_v25, %v1694_v19  ;;  %v2918_v56 = vpop.permute.xlu0 %2917 }
 0x15a   : > { %v2920_v22 = vunpack.i.h.bf16 %v2918_v56  ;;  %v2919_v47 = vunpack.i.l.bf16 %v2918_v56 }
 0x15b   : > { %2630 = vmatprep.mubr.msk.bf16.mxu0 %vm1754_vm1, %v1722_v30 }
 0x15c   : > { %2631 = vmatmul.mubr.msk.bf16.gmra.mrb[8].mxu0 %vm1754_vm1, %v1723_v42  ;;  %v1666_v48 = vsel %vm1652_vm5, %v4065_v51, %v2920_v22  ;;  %v1665_v61 = vsel %vm1652_vm5, %v4062_v15, %v2919_v47 }
 0x16a   : > { %v2923_v49 = vpop.permute.xlu1 %2922  ;;  %v2928_v0 = vpop.permute.xlu0 %2927 }
 0x16b   : > { %v2930_v59 = vunpack.i.h.bf16 %v2928_v0  ;;  %v2929_v54 = vunpack.i.l.bf16 %v2928_v0  ;;  %v2925_v26 = vunpack.i.h.bf16 %v2923_v49  ;;  %v2924_v2 = vunpack.i.l.bf16 %v2923_v49 }
 0x16d   : > { %v1698_v9 = vsel %vm1685_vm0, %v1665_v61, %v2929_v54  ;;  %v1699_v28 = vsel %vm1685_vm0, %v1666_v48, %v2930_v59  ;;  %v1668_v6 = vsel %vm1652_vm5, %v4078_v33, %v2925_v26  ;;  %v1667_v17 = vsel %vm1652_vm5, %v4075_v32, %v2924_v2 }
 0x16e   : > { %v1724_v40 = vpack.c.bf16 %v1699_v28, %v1698_v9  ;;  %v2933_v1 = vpop.permute.xlu1 %2932  ;;  %v2938_v31 = vpop.permute.xlu0 %2937 }
 0x16f   : > { %v2935_v44 = vunpack.i.h.bf16 %v2933_v1  ;;  %v2934_v3 = vunpack.i.l.bf16 %v2933_v1  ;;  %v2940_v27 = vunpack.i.h.bf16 %v2938_v31  ;;  %v2939_v52 = vunpack.i.l.bf16 %v2938_v31 }
 0x170   : > { %2634 = vmatprep.mubr.msk.bf16.mxu0 %vm1754_vm1, %v1724_v40 }
 0x171   : > { %v1700_v15 = vsel %vm1685_vm0, %v1667_v17, %v2934_v3  ;;  %v1701_v51 = vsel %vm1685_vm0, %v1668_v6, %v2935_v44  ;;  %v1669_v32 = vsel %vm1652_vm5, %v4092_v24, %v2939_v52  ;;  %v1670_v45 = vsel %vm1652_vm5, %v4095_v23, %v2940_v27 }
 0x172   : > { %v1725_v57 = vpack.c.bf16 %v1701_v51, %v1700_v15 }
 0x174   : > { %2635 = vmatmul.mubr.msk.bf16.gmra.mrb[12].mxu0 %vm1754_vm1, %v1725_v57 }
 0x17a   : > { %v2943_v46 = vpop.permute.xlu1 %2942  ;;  %v2948_v41 = vpop.permute.xlu0 %2947 }
 0x17b   : > { %v2950_v21 = vunpack.i.h.bf16 %v2948_v41  ;;  %v2949_v36 = vunpack.i.l.bf16 %v2948_v41  ;;  %v2945_v33 = vunpack.i.h.bf16 %v2943_v46  ;;  %v2944_v4 = vunpack.i.l.bf16 %v2943_v46 }
 0x17d   : > { %v1702_v55 = vsel %vm1685_vm0, %v1669_v32, %v2949_v36  ;;  %v1703_v13 = vsel %vm1685_vm0, %v1670_v45, %v2950_v21  ;;  %v1672_v53 = vsel %vm1652_vm5, %v4107_v62, %v2945_v33  ;;  %v1671_v10 = vsel %vm1652_vm5, %v4104_v16, %v2944_v4 }
 0x17e   : > { %v2953_v34 = vpop.permute.xlu1 %2952  ;;  %v1726_v18 = vpack.c.bf16 %v1703_v13, %v1702_v55  ;;  %v2958_v39 = vpop.permute.xlu0 %2957 }
 0x17f   : > { %v2955_v38 = vunpack.i.h.bf16 %v2953_v34  ;;  %v2954_v35 = vunpack.i.l.bf16 %v2953_v34  ;;  %v2960_v63 = vunpack.i.h.bf16 %v2958_v39  ;;  %v2959_v19 = vunpack.i.l.bf16 %v2958_v39 }
 0x180   : > { %2638 = vmatprep.mubr.msk.bf16.mxu1 %vm1754_vm1, %v1726_v18 }
 0x181   : > { %v1704_v24 = vsel %vm1685_vm0, %v1671_v10, %v2954_v35  ;;  %v1705_v23 = vsel %vm1685_vm0, %v1672_v53, %v2955_v38  ;;  %v1674_v62 = vsel %vm1652_vm5, %v4123_v58, %v2960_v63  ;;  %v1673_v16 = vsel %vm1652_vm5, %v4120_v7, %v2959_v19 }
 0x182   : > { %v1727_v50 = vpack.c.bf16 %v1705_v23, %v1704_v24 }
 0x184   : > { %2639 = vmatmul.mubr.msk.bf16.vlgmr.msra.gmra.mrb[0].mxu1 %vm1754_vm1, %v1727_v50 }
 0x192   : > { %v2963_v25 = vpop.permute.xlu1 %2962  ;;  %v2968_v42 = vpop.permute.xlu0 %2967 }
 0x193   : > { %v2970_v30 = vunpack.i.h.bf16 %v2968_v42  ;;  %v2969_v56 = vunpack.i.l.bf16 %v2968_v42  ;;  %v2965_v22 = vunpack.i.h.bf16 %v2963_v25  ;;  %v2964_v47 = vunpack.i.l.bf16 %v2963_v25 }
 0x195   : > { %v1706_v49 = vsel %vm1685_vm0, %v1673_v16, %v2969_v56  ;;  %v1707_v0 = vsel %vm1685_vm0, %v1674_v62, %v2970_v30  ;;  %v1676_v26 = vsel %vm1652_vm5, %v4135_v14, %v2965_v22  ;;  %v1675_v2 = vsel %vm1652_vm5, %v4132_v20, %v2964_v47 }
 0x196   : > { %v1728_v59 = vpack.c.bf16 %v1707_v0, %v1706_v49  ;;  %v2973_v54 = vpop.permute.xlu1 %2972  ;;  %v2978_v28 = vpop.permute.xlu0 %2977 }
 0x197   : > { %v2975_v48 = vunpack.i.h.bf16 %v2973_v54  ;;  %v2974_v61 = vunpack.i.l.bf16 %v2973_v54  ;;  %v2980_v40 = vunpack.i.h.bf16 %v2978_v28  ;;  %v2979_v1 = vunpack.i.l.bf16 %v2978_v28 }
 0x198   : > { %2642 = vmatprep.mubr.msk.bf16.mxu1 %vm1754_vm1, %v1728_v59 }
 0x199   : > { %v1708_v7 = vsel %vm1685_vm0, %v1675_v2, %v2974_v61  ;;  %v1709_v58 = vsel %vm1685_vm0, %v1676_v26, %v2975_v48  ;;  %v1678_v14 = vsel %vm1652_vm5, %v4151_v60, %v2980_v40  ;;  %v1677_v20 = vsel %vm1652_vm5, %v4148_v5, %v2979_v1 }
 0x19a   : > { %v1729_v9 = vpack.c.bf16 %v1709_v58, %v1708_v7 }
 0x19c   : > { %2643 = vmatmul.mubr.msk.bf16.gmra.mrb[4].mxu1 %vm1754_vm1, %v1729_v9 }
 0x1a3   : > { %v2983_v44 = vpop.permute.xlu1 %2982  ;;  %v2988_v3 = vpop.permute.xlu0 %2987 }
 0x1a4   : > { %v2990_v6 = vunpack.i.h.bf16 %v2988_v3  ;;  %v2989_v17 = vunpack.i.l.bf16 %v2988_v3  ;;  %v2985_v15 = vunpack.i.h.bf16 %v2983_v44  ;;  %v2984_v51 = vunpack.i.l.bf16 %v2983_v44 }
 0x1a6   : > { %v1710_v57 = vsel %vm1685_vm0, %v1677_v20, %v2989_v17  ;;  %v1711_v31 = vsel %vm1685_vm0, %v1678_v14, %v2990_v6  ;;  %v1680_v36 = vsel %vm1652_vm5, %v4163_v11, %v2985_v15  ;;  %v1679_v60 = vsel %vm1652_vm5, %v4160_v29, %v2984_v51 }
 0x1a7   : > { %v1730_v27 = vpack.c.bf16 %v1711_v31, %v1710_v57  ;;  %v2993_v52 = vpop.permute.xlu1 %2992  ;;  %v2998_v21 = vpop.permute.xlu0 %2997 }
 0x1a8   : > { %v2995_v46 = vunpack.i.h.bf16 %v2993_v52  ;;  %v2994_v41 = vunpack.i.l.bf16 %v2993_v52  ;;  %v3000_v32 = vunpack.i.h.bf16 %v2998_v21  ;;  %v2999_v45 = vunpack.i.l.bf16 %v2998_v21 }
 0x1a9   : > { %2646 = vmatprep.mubr.msk.bf16.mxu1 %vm1754_vm1, %v1730_v27 }
 0x1aa   : > { %v1712_v5 = vsel %vm1685_vm0, %v1679_v60, %v2994_v41  ;;  %v1713_v33 = vsel %vm1685_vm0, %v1680_v36, %v2995_v46  ;;  %v1682_v11 = vsel %vm1652_vm5, %v4179_v12, %v3000_v32  ;;  %v1681_v29 = vsel %vm1652_vm5, %v4176_v37, %v2999_v45 }
 0x1ab   : > { %v1731_v4 = vpack.c.bf16 %v1713_v33, %v1712_v5 }
 0x1ad   : > { %2647 = vmatmul.mubr.msk.bf16.gmra.mrb[8].mxu1 %vm1754_vm1, %v1731_v4 }
 0x1af   : > { %v3003_v55 = vpop.permute.xlu1 %3002  ;;  %v3008_v13 = vpop.permute.xlu0 %3007 }
 0x1b0   : > { %v3010_v34 = vunpack.i.h.bf16 %v3008_v13  ;;  %v3009_v18 = vunpack.i.l.bf16 %v3008_v13  ;;  %v3005_v38 = vunpack.i.h.bf16 %v3003_v55  ;;  %v3004_v35 = vunpack.i.l.bf16 %v3003_v55 }
 0x1b2   : > { %v1714_v53 = vsel %vm1685_vm0, %v1681_v29, %v3009_v18  ;;  %v1715_v10 = vsel %vm1685_vm0, %v1682_v11, %v3010_v34  ;;  %v1684_v63 = vsel %vm1652_vm5, %v4191_v43, %v3005_v38  ;;  %v1683_v12 = vsel %vm1652_vm5, %v4188_v8, %v3004_v35 }
 0x1b3   : > { %v1732_v24 = vpack.c.bf16 %v1715_v10, %v1714_v53  ;;  %v3013_v23 = vpop.permute.xlu1 %3012 }
 0x1b4   : > { %v3015_v50 = vunpack.i.h.bf16 %v3013_v23  ;;  %v3014_v39 = vunpack.i.l.bf16 %v3013_v23 }
 0x1b5   : > { %2650 = vmatprep.mubr.msk.bf16.mxu1 %vm1754_vm1, %v1732_v24 }
 0x1b6   : > { %v1716_v37 = vsel %vm1685_vm0, %v1683_v12, %v3014_v39  ;;  %v1717_v19 = vsel %vm1685_vm0, %v1684_v63, %v3015_v50 }
 0x1b7   : > { %v1733_v25 = vpack.c.bf16 %v1717_v19, %v1716_v37 }
 0x1b9   : > { %2651 = vmatmul.mubr.msk.bf16.gmra.mrb[12].mxu1 %vm1754_vm1, %v1733_v25 }
 0x21f   : > { %v2624_v43 = vpop.f32.mrb[0].mxu0 }
 0x220   : > { %v2527_v8 = vpack.c.bf16 %v2624_v43, %v2624_v43  ;;  %v1841_v42 = vpop.f32.mrb[1].mxu0  ;;  %v2202_v16 = vmul.f32 %v2624_v43, %v2624_v43  ;;  %v2132_v26 = vsel %vm1352_vm2, %v2624_v43, 0.0 }
 0x221   : > { %v2525_v30 = vpack.c.bf16 %v1841_v42, %v1841_v42  ;;  %v2200_v56 = vmul.f32 %v1841_v42, %v1841_v42  ;;  %v2625_v62 = vpop.f32.mrb[2].mxu0  ;;  %v2129_v49 = vsel %vm1352_vm2, %v1841_v42, 0.0 }
 0x222   : > { %2099 = vst.msk [vmem:[%s4330_s26 + $0x8] sm:$0xf] %vm2096_vm6, %v2527_v8  ;;  %v2528_v22 = vpack.c.bf16 %v2625_v62, %v2625_v62  ;;  %v1844_v47 = vpop.f32.mrb[3].mxu0  ;;  %v2203_v48 = vmul.f32 %v2625_v62, %v2625_v62  ;;  %v2235_v28 = vsel %vm1352_vm2, %v2202_v16, 0.0  ;;  %v2134_v1 = vsel %vm1352_vm2, %v2625_v62, 0.0 }
 0x223   : > { %2097 = vst.msk [vmem:[%s4330_s26] sm:$0xf] %vm2096_vm6, %v2525_v30  ;;  %v2526_v0 = vpack.c.bf16 %v1844_v47, %v1844_v47  ;;  %v2130_v59 = vsel %vm1352_vm2, %v1844_v47, 0.0  ;;  %v2201_v54 = vmul.f32 %v1844_v47, %v1844_v47  ;;  %v2232_v2 = vsel %vm1352_vm2, %v2200_v56, 0.0 }
 0x224   : > { %2100 = vst.msk [vmem:[%s4330_s26 + $0xc] sm:$0xf] %vm2096_vm6, %v2528_v22  ;;  %v2131_v61 = vadd.f32 %v2130_v59, %v2129_v49  ;;  %v2237_v44 = vsel %vm1352_vm2, %v2203_v48, 0.0 }
 0x225   : > { %2098 = vst.msk [vmem:[%s4330_s26 + $0x4] sm:$0xf] %vm2096_vm6, %v2526_v0  ;;  %v2233_v7 = vsel %vm1352_vm2, %v2201_v54, 0.0 }
 0x226   : > { %v2133_v58 = vadd.f32 %v2132_v26, %v2131_v61  ;;  %v2234_v9 = vadd.f32 %v2233_v7, %v2232_v2 }
 0x227   : > { %v2628_v40 = vpop.f32.mrb[4].mxu0 }
 0x228   : > { %v2236_v3 = vadd.f32 %v2235_v28, %v2234_v9  ;;  %v2531_v6 = vpack.c.bf16 %v2628_v40, %v2628_v40  ;;  %v1857_v17 = vpop.f32.mrb[5].mxu0  ;;  %v2135_v20 = vadd.f32 %v2134_v1, %v2133_v58  ;;  %v2206_v36 = vmul.f32 %v2628_v40, %v2628_v40 }
 0x229   : > { %v2529_v14 = vpack.c.bf16 %v1857_v17, %v1857_v17  ;;  %v2136_v15 = vsel %vm1352_vm2, %v1857_v17, 0.0  ;;  %v2204_v51 = vmul.f32 %v1857_v17, %v1857_v17  ;;  %v2629_v57 = vpop.f32.mrb[6].mxu0  ;;  %v2140_v32 = vsel %vm1352_vm2, %v2628_v40, 0.0 }
 0x22a   : > { %2103 = vst.msk [vmem:[%s4330_s26 + $0x18] sm:$0xf] %vm2096_vm6, %v2531_v6  ;;  %v2238_v31 = vadd.f32 %v2237_v44, %v2236_v3  ;;  %v2532_v27 = vpack.c.bf16 %v2629_v57, %v2629_v57  ;;  %v1860_v52 = vpop.f32.mrb[7].mxu0  ;;  %v2137_v46 = vadd.f32 %v2136_v15, %v2135_v20  ;;  %v2207_v45 = vmul.f32 %v2629_v57, %v2629_v57 }
 0x22b   : > { %2101 = vst.msk [vmem:[%s4330_s26 + $0x10] sm:$0xf] %vm2096_vm6, %v2529_v14  ;;  %v2239_v41 = vsel %vm1352_vm2, %v2204_v51, 0.0  ;;  %v2530_v21 = vpack.c.bf16 %v1860_v52, %v1860_v52  ;;  %v2138_v5 = vsel %vm1352_vm2, %v1860_v52, 0.0  ;;  %v2205_v33 = vmul.f32 %v1860_v52, %v1860_v52 }
 0x22c   : > { %v2240_v60 = vadd.f32 %v2239_v41, %v2238_v31  ;;  %2104 = vst.msk [vmem:[%s4330_s26 + $0x1c] sm:$0xf] %vm2096_vm6, %v2532_v27  ;;  %v2139_v4 = vadd.f32 %v2138_v5, %v2137_v46  ;;  %v2243_v11 = vsel %vm1352_vm2, %v2206_v36, 0.0  ;;  %v2142_v29 = vsel %vm1352_vm2, %v2629_v57, 0.0 }
 0x22d   : > { %2102 = vst.msk [vmem:[%s4330_s26 + $0x14] sm:$0xf] %vm2096_vm6, %v2530_v21  ;;  %v2241_v55 = vsel %vm1352_vm2, %v2205_v33, 0.0  ;;  %v2245_v39 = vsel %vm1352_vm2, %v2207_v45, 0.0 }
 0x22e   : > { %v2141_v13 = vadd.f32 %v2140_v32, %v2139_v4  ;;  %v2242_v34 = vadd.f32 %v2241_v55, %v2240_v60 }
 0x22f   : > { %v2632_v18 = vpop.f32.mrb[8].mxu0 }
 0x230   : > { %v2535_v38 = vpack.c.bf16 %v2632_v18, %v2632_v18  ;;  %v1873_v35 = vpop.f32.mrb[9].mxu0  ;;  %v2244_v53 = vadd.f32 %v2243_v11, %v2242_v34  ;;  %v2143_v24 = vadd.f32 %v2142_v29, %v2141_v13  ;;  %v2210_v8 = vmul.f32 %v2632_v18, %v2632_v18 }
 0x231   : > { %v2533_v10 = vpack.c.bf16 %v1873_v35, %v1873_v35  ;;  %v2144_v23 = vsel %vm1352_vm2, %v1873_v35, 0.0  ;;  %v2633_v50 = vpop.f32.mrb[10].mxu0  ;;  %v2208_v63 = vmul.f32 %v1873_v35, %v1873_v35  ;;  %v2148_v22 = vsel %vm1352_vm2, %v2632_v18, 0.0 }
 0x232   : > { %2107 = vst.msk [vmem:[%s4330_s26 + $0x28] sm:$0xf] %vm2096_vm6, %v2535_v38  ;;  %v2536_v12 = vpack.c.bf16 %v2633_v50, %v2633_v50  ;;  %v1876_v37 = vpop.f32.mrb[11].mxu0  ;;  %v2145_v19 = vadd.f32 %v2144_v23, %v2143_v24  ;;  %v2246_v25 = vadd.f32 %v2245_v39, %v2244_v53  ;;  %v2211_v47 = vmul.f32 %v2633_v50, %v2633_v50 }
 0x233   : > { %2105 = vst.msk [vmem:[%s4330_s26 + $0x20] sm:$0xf] %vm2096_vm6, %v2533_v10  ;;  %v2534_v43 = vpack.c.bf16 %v1876_v37, %v1876_v37  ;;  %v2247_v42 = vsel %vm1352_vm2, %v2208_v63, 0.0  ;;  %v2146_v30 = vsel %vm1352_vm2, %v1876_v37, 0.0  ;;  %v2209_v56 = vmul.f32 %v1876_v37, %v1876_v37 }
 0x234   : > { %2108 = vst.msk [vmem:[%s4330_s26 + $0x2c] sm:$0xf] %vm2096_vm6, %v2536_v12  ;;  %v2248_v62 = vadd.f32 %v2247_v42, %v2246_v25  ;;  %v2147_v16 = vadd.f32 %v2146_v30, %v2145_v19  ;;  %v2251_v54 = vsel %vm1352_vm2, %v2210_v8, 0.0  ;;  %v2150_v48 = vsel %vm1352_vm2, %v2633_v50, 0.0 }
 0x235   : > { %2106 = vst.msk [vmem:[%s4330_s26 + $0x24] sm:$0xf] %vm2096_vm6, %v2534_v43  ;;  %v2249_v49 = vsel %vm1352_vm2, %v2209_v56, 0.0  ;;  %v2253_v2 = vsel %vm1352_vm2, %v2211_v47, 0.0 }
 0x236   : > { %v2149_v0 = vadd.f32 %v2148_v22, %v2147_v16  ;;  %v2250_v59 = vadd.f32 %v2249_v49, %v2248_v62 }
 0x238   : > { %v2252_v61 = vadd.f32 %v2251_v54, %v2250_v59  ;;  %v2151_v26 = vadd.f32 %v2150_v48, %v2149_v0 }
 0x23a   : > { %v2254_v7 = vadd.f32 %v2253_v2, %v2252_v61 }
 0x247   : > { %v2636_v58 = vpop.f32.mrb[12].mxu0 }
 0x248   : > { %v2539_v9 = vpack.c.bf16 %v2636_v58, %v2636_v58  ;;  %v1889_v28 = vpop.f32.mrb[13].mxu0  ;;  %v2214_v57 = vmul.f32 %v2636_v58, %v2636_v58  ;;  %v2156_v46 = vsel %vm1352_vm2, %v2636_v58, 0.0 }
 0x249   : > { %v2537_v40 = vpack.c.bf16 %v1889_v28, %v1889_v28  ;;  %v2152_v1 = vsel %vm1352_vm2, %v1889_v28, 0.0  ;;  %v2212_v44 = vmul.f32 %v1889_v28, %v1889_v28  ;;  %v2637_v3 = vpop.f32.mrb[14].mxu0 }
 0x24a   : > { %2111 = vst.msk [vmem:[%s4330_s26 + $0x38] sm:$0xf] %vm2096_vm6, %v2539_v9  ;;  %v2153_v6 = vadd.f32 %v2152_v1, %v2151_v26  ;;  %v2540_v17 = vpack.c.bf16 %v2637_v3, %v2637_v3  ;;  %v1892_v14 = vpop.f32.mrb[15].mxu0  ;;  %v2215_v41 = vmul.f32 %v2637_v3, %v2637_v3  ;;  %v2158_v60 = vsel %vm1352_vm2, %v2637_v3, 0.0 }
 0x24b   : > { %2109 = vst.msk [vmem:[%s4330_s26 + $0x30] sm:$0xf] %vm2096_vm6, %v2537_v40  ;;  %v2255_v20 = vsel %vm1352_vm2, %v2212_v44, 0.0  ;;  %v2538_v15 = vpack.c.bf16 %v1892_v14, %v1892_v14  ;;  %v2154_v51 = vsel %vm1352_vm2, %v1892_v14, 0.0  ;;  %v2213_v52 = vmul.f32 %v1892_v14, %v1892_v14 }
 0x24c   : > { %v2256_v31 = vadd.f32 %v2255_v20, %v2254_v7  ;;  %2112 = vst.msk [vmem:[%s4330_s26 + $0x3c] sm:$0xf] %vm2096_vm6, %v2540_v17  ;;  %v2155_v27 = vadd.f32 %v2154_v51, %v2153_v6  ;;  %v2259_v33 = vsel %vm1352_vm2, %v2214_v57, 0.0  ;;  %v2261_v45 = vsel %vm1352_vm2, %v2215_v41, 0.0 }
 0x24d   : > { %2110 = vst.msk [vmem:[%s4330_s26 + $0x34] sm:$0xf] %vm2096_vm6, %v2538_v15  ;;  %v2257_v36 = vsel %vm1352_vm2, %v2213_v52, 0.0 }
 0x24e   : > { %v2157_v21 = vadd.f32 %v2156_v46, %v2155_v27  ;;  %v2258_v5 = vadd.f32 %v2257_v36, %v2256_v31 }
 0x250   : > { %v2159_v4 = vadd.f32 %v2158_v60, %v2157_v21  ;;  %v2260_v32 = vadd.f32 %v2259_v33, %v2258_v5 }
 0x252   : > { %v2262_v55 = vadd.f32 %v2261_v45, %v2260_v32 }
 0x257   : > { %v2640_v13 = vpop.f32.mrb[0].mxu1 }
 0x258   : > { %v2543_v34 = vpack.c.bf16 %v2640_v13, %v2640_v13  ;;  %v1905_v18 = vpop.f32.mrb[1].mxu1  ;;  %v2218_v63 = vmul.f32 %v2640_v13, %v2640_v13  ;;  %v2164_v25 = vsel %vm1352_vm2, %v2640_v13, 0.0 }
 0x259   : > { %v2541_v11 = vpack.c.bf16 %v1905_v18, %v1905_v18  ;;  %v2160_v29 = vsel %vm1352_vm2, %v1905_v18, 0.0  ;;  %v2216_v38 = vmul.f32 %v1905_v18, %v1905_v18  ;;  %v2641_v35 = vpop.f32.mrb[2].mxu1 }
 0x25a   : > { %2115 = vst.msk [vmem:[%s4330_s26 + $0x48] sm:$0xf] %vm2096_vm6, %v2543_v34  ;;  %v2161_v53 = vadd.f32 %v2160_v29, %v2159_v4  ;;  %v2544_v10 = vpack.c.bf16 %v2641_v35, %v2641_v35  ;;  %v1908_v24 = vpop.f32.mrb[3].mxu1  ;;  %v2219_v43 = vmul.f32 %v2641_v35, %v2641_v35  ;;  %v2166_v30 = vsel %vm1352_vm2, %v2641_v35, 0.0 }
 0x25b   : > { %2113 = vst.msk [vmem:[%s4330_s26 + $0x40] sm:$0xf] %vm2096_vm6, %v2541_v11  ;;  %v2263_v23 = vsel %vm1352_vm2, %v2216_v38, 0.0  ;;  %v2542_v50 = vpack.c.bf16 %v1908_v24, %v1908_v24  ;;  %v2162_v39 = vsel %vm1352_vm2, %v1908_v24, 0.0  ;;  %v2217_v19 = vmul.f32 %v1908_v24, %v1908_v24 }
 0x25c   : > { %v2264_v12 = vadd.f32 %v2263_v23, %v2262_v55  ;;  %2116 = vst.msk [vmem:[%s4330_s26 + $0x4c] sm:$0xf] %vm2096_vm6, %v2544_v10  ;;  %v2163_v37 = vadd.f32 %v2162_v39, %v2161_v53  ;;  %v2267_v62 = vsel %vm1352_vm2, %v2218_v63, 0.0  ;;  %v2269_v47 = vsel %vm1352_vm2, %v2219_v43, 0.0 }
 0x25d   : > { %2114 = vst.msk [vmem:[%s4330_s26 + $0x44] sm:$0xf] %vm2096_vm6, %v2542_v50  ;;  %v2265_v42 = vsel %vm1352_vm2, %v2217_v19, 0.0 }
 0x25e   : > { %v2165_v8 = vadd.f32 %v2164_v25, %v2163_v37  ;;  %v2266_v56 = vadd.f32 %v2265_v42, %v2264_v12 }
 0x260   : > { %v2167_v16 = vadd.f32 %v2166_v30, %v2165_v8  ;;  %v2268_v22 = vadd.f32 %v2267_v62, %v2266_v56 }
 0x262   : > { %v2270_v49 = vadd.f32 %v2269_v47, %v2268_v22 }
 0x26f   : > { %v2644_v0 = vpop.f32.mrb[4].mxu1 }
 0x270   : > { %v2547_v59 = vpack.c.bf16 %v2644_v0, %v2644_v0  ;;  %v1921_v54 = vpop.f32.mrb[5].mxu1  ;;  %v2222_v44 = vmul.f32 %v2644_v0, %v2644_v0  ;;  %v2172_v14 = vsel %vm1352_vm2, %v2644_v0, 0.0 }
 0x271   : > { %v2545_v48 = vpack.c.bf16 %v1921_v54, %v1921_v54  ;;  %v2168_v61 = vsel %vm1352_vm2, %v1921_v54, 0.0  ;;  %v2220_v26 = vmul.f32 %v1921_v54, %v1921_v54  ;;  %v2645_v2 = vpop.f32.mrb[6].mxu1 }
 0x272   : > { %2119 = vst.msk [vmem:[%s4330_s26 + $0x58] sm:$0xf] %vm2096_vm6, %v2547_v59  ;;  %v2169_v7 = vadd.f32 %v2168_v61, %v2167_v16  ;;  %v2548_v58 = vpack.c.bf16 %v2645_v2, %v2645_v2  ;;  %v1924_v9 = vpop.f32.mrb[7].mxu1  ;;  %v2223_v20 = vmul.f32 %v2645_v2, %v2645_v2  ;;  %v2174_v57 = vsel %vm1352_vm2, %v2645_v2, 0.0 }
 0x273   : > { %2117 = vst.msk [vmem:[%s4330_s26 + $0x50] sm:$0xf] %vm2096_vm6, %v2545_v48  ;;  %v2271_v28 = vsel %vm1352_vm2, %v2220_v26, 0.0  ;;  %v2546_v40 = vpack.c.bf16 %v1924_v9, %v1924_v9  ;;  %v2170_v1 = vsel %vm1352_vm2, %v1924_v9, 0.0  ;;  %v2221_v17 = vmul.f32 %v1924_v9, %v1924_v9 }
 0x274   : > { %v2272_v3 = vadd.f32 %v2271_v28, %v2270_v49  ;;  %2120 = vst.msk [vmem:[%s4330_s26 + $0x5c] sm:$0xf] %vm2096_vm6, %v2548_v58  ;;  %v2171_v6 = vadd.f32 %v2170_v1, %v2169_v7  ;;  %v2275_v27 = vsel %vm1352_vm2, %v2222_v44, 0.0  ;;  %v2277_v41 = vsel %vm1352_vm2, %v2223_v20, 0.0 }
 0x275   : > { %2118 = vst.msk [vmem:[%s4330_s26 + $0x54] sm:$0xf] %vm2096_vm6, %v2546_v40  ;;  %v2273_v51 = vsel %vm1352_vm2, %v2221_v17, 0.0 }
 0x276   : > { %v2173_v15 = vadd.f32 %v2172_v14, %v2171_v6  ;;  %v2274_v31 = vadd.f32 %v2273_v51, %v2272_v3 }
 0x278   : > { %v2175_v52 = vadd.f32 %v2174_v57, %v2173_v15  ;;  %v2276_v46 = vadd.f32 %v2275_v27, %v2274_v31 }
 0x27a   : > { %v2278_v21 = vadd.f32 %v2277_v41, %v2276_v46 }
 0x280   : > { %v2648_v36 = vpop.f32.mrb[8].mxu1 }
 0x281   : > { %v2551_v60 = vpack.c.bf16 %v2648_v36, %v2648_v36  ;;  %v1937_v5 = vpop.f32.mrb[9].mxu1  ;;  %v2226_v38 = vmul.f32 %v2648_v36, %v2648_v36  ;;  %v2180_v24 = vsel %vm1352_vm2, %v2648_v36, 0.0 }
 0x282   : > { %v2549_v33 = vpack.c.bf16 %v1937_v5, %v1937_v5  ;;  %v2176_v4 = vsel %vm1352_vm2, %v1937_v5, 0.0  ;;  %v2224_v32 = vmul.f32 %v1937_v5, %v1937_v5  ;;  %v2649_v45 = vpop.f32.mrb[10].mxu1 }
 0x283   : > { %2123 = vst.msk [vmem:[%s4330_s26 + $0x68] sm:$0xf] %vm2096_vm6, %v2551_v60  ;;  %v2177_v55 = vadd.f32 %v2176_v4, %v2175_v52  ;;  %v2552_v13 = vpack.c.bf16 %v2649_v45, %v2649_v45  ;;  %v1940_v34 = vpop.f32.mrb[11].mxu1  ;;  %v2227_v23 = vmul.f32 %v2649_v45, %v2649_v45  ;;  %v2182_v63 = vsel %vm1352_vm2, %v2649_v45, 0.0 }
 0x284   : > { %2121 = vst.msk [vmem:[%s4330_s26 + $0x60] sm:$0xf] %vm2096_vm6, %v2549_v33  ;;  %v2279_v18 = vsel %vm1352_vm2, %v2224_v32, 0.0  ;;  %v2550_v11 = vpack.c.bf16 %v1940_v34, %v1940_v34  ;;  %v2178_v29 = vsel %vm1352_vm2, %v1940_v34, 0.0  ;;  %v2225_v10 = vmul.f32 %v1940_v34, %v1940_v34 }
 0x285   : > { %v2280_v35 = vadd.f32 %v2279_v18, %v2278_v21  ;;  %2124 = vst.msk [vmem:[%s4330_s26 + $0x6c] sm:$0xf] %vm2096_vm6, %v2552_v13  ;;  %v2179_v53 = vadd.f32 %v2178_v29, %v2177_v55  ;;  %v2283_v37 = vsel %vm1352_vm2, %v2226_v38, 0.0  ;;  %v2285_v43 = vsel %vm1352_vm2, %v2227_v23, 0.0 }
 0x286   : > { %2122 = vst.msk [vmem:[%s4330_s26 + $0x64] sm:$0xf] %vm2096_vm6, %v2550_v11  ;;  %v2281_v39 = vsel %vm1352_vm2, %v2225_v10, 0.0 }
 0x287   : > { %v2181_v50 = vadd.f32 %v2180_v24, %v2179_v53  ;;  %v2282_v12 = vadd.f32 %v2281_v39, %v2280_v35 }
 0x289   : > { %v2183_v19 = vadd.f32 %v2182_v63, %v2181_v50  ;;  %v2284_v25 = vadd.f32 %v2283_v37, %v2282_v12 }
 0x28b   : > { %v2286_v56 = vadd.f32 %v2285_v43, %v2284_v25 }
 0x28c   : > { %v2652_v8 = vpop.f32.mrb[12].mxu1 }
 0x28d   : > { %v2555_v42 = vpack.c.bf16 %v2652_v8, %v2652_v8  ;;  %v1953_v30 = vpop.f32.mrb[13].mxu1  ;;  %v2230_v26 = vmul.f32 %v2652_v8, %v2652_v8  ;;  %v2188_v9 = vsel %vm1352_vm2, %v2652_v8, 0.0 }
 0x28e   : > { %v2553_v62 = vpack.c.bf16 %v1953_v30, %v1953_v30  ;;  %v2184_v16 = vsel %vm1352_vm2, %v1953_v30, 0.0  ;;  %v2228_v22 = vmul.f32 %v1953_v30, %v1953_v30  ;;  %v2653_v47 = vpop.f32.mrb[14].mxu1 }
 0x28f   : > { %2127 = vst.msk [vmem:[%s4330_s26 + $0x78] sm:$0xf] %vm2096_vm6, %v2555_v42  ;;  %v2185_v49 = vadd.f32 %v2184_v16, %v2183_v19  ;;  %v2556_v0 = vpack.c.bf16 %v2653_v47, %v2653_v47  ;;  %v1956_v59 = vpop.f32.mrb[15].mxu1  ;;  %v2231_v28 = vmul.f32 %v2653_v47, %v2653_v47  ;;  %v2190_v44 = vsel %vm1352_vm2, %v2653_v47, 0.0 }
 0x290   : > { %2125 = vst.msk [vmem:[%s4330_s26 + $0x70] sm:$0xf] %vm2096_vm6, %v2553_v62  ;;  %v2287_v54 = vsel %vm1352_vm2, %v2228_v22, 0.0  ;;  %v2554_v48 = vpack.c.bf16 %v1956_v59, %v1956_v59  ;;  %v2186_v61 = vsel %vm1352_vm2, %v1956_v59, 0.0  ;;  %v2229_v58 = vmul.f32 %v1956_v59, %v1956_v59 }
 0x291   : > { %v2288_v2 = vadd.f32 %v2287_v54, %v2286_v56  ;;  %2128 = vst.msk [vmem:[%s4330_s26 + $0x7c] sm:$0xf] %vm2096_vm6, %v2556_v0  ;;  %v2187_v7 = vadd.f32 %v2186_v61, %v2185_v49  ;;  %v2291_v6 = vsel %vm1352_vm2, %v2230_v26, 0.0  ;;  %v2293_v20 = vsel %vm1352_vm2, %v2231_v28, 0.0 }
 0x292   : > { %2126 = vst.msk [vmem:[%s4330_s26 + $0x74] sm:$0xf] %vm2096_vm6, %v2554_v48  ;;  %v2289_v1 = vsel %vm1352_vm2, %v2229_v58, 0.0 }
 0x293   : > { %v2189_v40 = vadd.f32 %v2188_v9, %v2187_v7  ;;  %v2290_v3 = vadd.f32 %v2289_v1, %v2288_v2 }
 0x295   : > { %v2191_v17 = vadd.f32 %v2190_v44, %v2189_v40  ;;  %v2292_v14 = vadd.f32 %v2291_v6, %v2290_v3 }
 0x297   : > { %v2192_v15 = vrot.slane %v2191_v17, 4  ;;  %v2294_v51 = vadd.f32 %v2293_v20, %v2292_v14 }
 0x299   : > { %v2193_v57 = vadd.f32 %v2192_v15, %v2191_v17  ;;  %v2295_v31 = vrot.slane %v2294_v51, 4 }
 0x29b   : > { %v2194_v27 = vrot.slane %v2193_v57, 2  ;;  %v2296_v52 = vadd.f32 %v2295_v31, %v2294_v51 }
 0x29d   : > { %v2195_v46 = vadd.f32 %v2194_v27, %v2193_v57  ;;  %v2297_v41 = vrot.slane %v2296_v52, 2 }
 0x29f   : > { %v2196_v21 = vrot.slane %v2195_v46, 1  ;;  %v2298_v36 = vadd.f32 %v2297_v41, %v2296_v52 }
 0x2a1   : > { %v2197_v60 = vadd.f32 %v2196_v21, %v2195_v46  ;;  %v2299_v5 = vrot.slane %v2298_v36, 1 }
 0x2a3   : > { %2199 = vst.msk [vmem:[%s265_s29] sm:$0x1] %vm2198_vm7, %v2197_v60  ;;  %v2300_v33 = vadd.f32 %v2299_v5, %v2298_v36 }
 0x2a5   : > { %2301 = vst.msk [vmem:[%s268_s8] sm:$0x1] %vm2198_vm7, %v2300_v33 }
 0x2a6 PF: > { %s17_s21 = sadd.s32 1, %s3123_s21  }
 0x2a7   : > { %p14_p4 = scmp.ge.s32.totalorder %s17_s21, 4  }
 0x2a9   :  { %16 = sbr.rel (!%p14_p4) target bundleno = 1 (0x1), region = 90 }

</bundles_post_ra>
